<compile_context>
chip_gen: v6e
topology: v6e:2x2x1
jax: 0.10.0
libtpu: 0.0.40
codegen_flags: <defaults>
</compile_context>

<pallas_src>
import functools

import jax
import jax.numpy as jnp
import numpy as np
from jax import lax
from jax.experimental import pallas as pl
from jax.experimental.pallas import tpu as pltpu


# ---------------------------------------------------------------------------
# Pallas kernel: both critic heads fused along lanes, TB samples per grid step
# ---------------------------------------------------------------------------
def _critic2_kernel(bt2_ref,                      # SMEM scalar-prefetch: (2,) f32 final biases
                    sp_ref, cat_ref, diag_ref,
                    ws1_ref, emb_ref, we_ref,
                    wm1sp_ref, wm1cl_ref, wsq_ref, brow_ref,
                    out_ref, *, tanh_dtype):
    f32, bf16 = jnp.float32, jnp.bfloat16
    tb, n, fsp = sp_ref.shape                      # (TB, N, 6)
    ncls, twoE = emb_ref.shape                     # (C, 2E)
    twoH = wsq_ref.shape[-1]                       # 2H (both heads on lanes)
    hdim = twoH // 2
    tbn = tb * n

    def act(x):                                    # tanh on the EUP; bf16 on v6e/v7x, f32 on v5e
        return jnp.tanh(x.astype(tanh_dtype))

    def mm(x, w):                                  # MXU matmul: bf16 operands, f32 accumulation
        return jnp.dot(x.astype(bf16), w, preferred_element_type=f32)

    br = brow_ref[...]                             # (8, 2H) f32 packed bias / row-vector table

    # spatial_lin (heads fused on lanes): Linear(6,2H) -> Tanh -> Linear(2H,2H block-diag)
    sp = sp_ref[...].reshape(tbn, fsp)
    s1 = act(mm(sp, ws1_ref[...]) + br[0])                         # bs1
    spatial = mm(s1, wsq_ref[0]) + br[1]                           # ws2 (block-diag), bs2

    # embed_category: one-hot (C tiny) @ fused table -> Tanh -> Linear(E,E block-diag)
    onehot = (cat_ref[...][:, :, None] ==
              lax.broadcasted_iota(jnp.int32, (tb, n, ncls), 2)
              ).astype(f32).reshape(tbn, ncls)
    emb = mm(onehot, emb_ref[...])                                 # (TB*N, 2E)
    cls = mm(act(emb), we_ref[...]) + br[2][:twoE]                 # we (block-diag), be

    # h = tanh(concat([spatial, cls])) -- concat eliminated: tanh commutes with concat and the
    # EdgeConv layer-1 weight was pre-split along its input features.
    sp_t = act(spatial)                                            # (TB*N, 2H)
    cl_t = act(cls)                                                # (TB*N, 2E)

    # EdgeConv layer-1, merged a/b matmul (columns [a1|a2|b1|b2]):
    #   edge (i,j) pre-activation = h_i@Wa + (h_j-h_i)@Wb + b1 = (a_i - b_i + b1) + b_j
    ab = mm(sp_t, wm1sp_ref[...]) + mm(cl_t, wm1cl_ref[...])       # (TB*N, 4H)
    a = ab[:, :twoH]
    b = ab[:, twoH:]
    c = a - b + br[3]                                              # bm1
    b3 = b.reshape(tb, n, twoH)
    c3 = c.reshape(tb, n, twoH)
    pre = c3[:, :, None, :] + b3[:, None, :, :]                    # (TB, N, N, 2H) f32
    m1 = act(pre)

    # EdgeConv layer-2: one tall matmul over all TB*N*N edges, block-diag over heads
    m2 = (mm(m1.reshape(tb * n * n, twoH), wsq_ref[1]) + br[4]     # wm2, bm2
          ).reshape(tb, n, n, twoH)

    # Max-aggregate over neighbours j != i via the precomputed -1e30 diagonal bias.
    # (knn = N-1 -> fully connected, no self loop; assumes N >= 2, sentinel safe for the
    #  tanh-bounded activations of this network.)
    conv = jnp.max(m2 + diag_ref[...][None, :, :, None], axis=2)   # (TB, N, 2H)
    x = act(conv).reshape(tbn, twoH)

    # tail: Linear(2H,2H block-diag) -> Tanh -> per-head Linear(H,1) done as a lane reduction
    t1 = act(mm(x, wsq_ref[2]) + br[5]).astype(f32)                # wt1, bt1
    prod = t1.reshape(tb, n, twoH) * br[6]                         # wt2 rows (both heads)
    out_ref[0] = jnp.sum(prod[:, :, :hdim], axis=-1) + bt2_ref[0]  # q1 (TB, N)
    out_ref[1] = jnp.sum(prod[:, :, hdim:], axis=-1) + bt2_ref[1]  # q2 (TB, N)


# ---------------------------------------------------------------------------
# Generation-aware tiling / dtype policy
# ---------------------------------------------------------------------------
def _device_profile():
    kind = ""
    try:
        kind = jax.devices()[0].device_kind.lower()
    except Exception:
        pass
    is_v7 = ("v7" in kind) or ("7x" in kind)
    is_v6 = "v6" in kind
    if is_v7:
        phys_vmem = 64 * 2 ** 20                   # v7x: 64 MiB per TensorCore
    elif any(g in kind for g in ("v4", "v5", "v6")):
        phys_vmem = 128 * 2 ** 20
    else:
        phys_vmem = 32 * 2 ** 20                   # unknown / older parts: stay conservative
    tanh_dtype = jnp.bfloat16 if (is_v6 or is_v7) else jnp.float32  # no bf16 EUP/VPU on v5e
    min_steps = 2 if is_v7 else 1                  # keep both v7x TensorCores busy when possible
    return phys_vmem, tanh_dtype, min_steps


def _pick_tb(bs, n, width, tile_budget_bytes, min_steps=1):
    """Largest legal batch tile: divides bs, (tb % 8 == 0 or tb == bs), fits the VMEM budget."""
    per_sample = 5 * n * n * width * 4             # ~5 live f32 edge-sized intermediates
    cap = max(1, min(bs, 256, tile_budget_bytes // max(1, per_sample)))
    if min_steps > 1:
        cap = min(cap, max(1, bs // min_steps))
    if bs % 8 != 0:
        return bs                                  # only tb == bs satisfies the (8,128) rule
    best = 8                                       # smallest legal multiple-of-8 divisor
    d = 8
    while d <= cap:
        if bs % d == 0:
            best = d
        d += 8
    return best


# ---------------------------------------------------------------------------
# Wrapper: one pallas_call computes both heads for all batch tiles
# ---------------------------------------------------------------------------
def critic_heads(spatial_inp, categories, fused):
    bs, n, fsp = spatial_inp.shape
    assert n >= 2, "EdgeConv over knn=num_objs-1 assumes num_objs >= 2"
    twoH = fused["wsq"].shape[-1]

    phys_vmem, tanh_dtype, min_steps = _device_profile()
    vmem_limit = int(min(3 * phys_vmem // 4, 96 * 2 ** 20))
    tb = _pick_tb(bs, n, twoH, vmem_limit // 3, min_steps)
    nb = bs // tb

    diag = jnp.where(jnp.eye(n, dtype=bool), jnp.float32(-1e30), jnp.float32(0.0))   # (N, N)

    kernel = functools.partial(_critic2_kernel, tanh_dtype=tanh_dtype)

    idx_b3 = lambda b, bt2: (b, 0, 0)
    idx_b2 = lambda b, bt2: (b, 0)
    idx_00 = lambda b, bt2: (0, 0)
    idx_000 = lambda b, bt2: (0, 0, 0)

    in_specs = [
        pl.BlockSpec((tb, n, fsp), idx_b3),                       # spatial input (per tile)
        pl.BlockSpec((tb, n), idx_b2),                            # categories (per tile)
        pl.BlockSpec((n, n), idx_00),                             # diagonal mask bias
        pl.BlockSpec(fused["ws1"].shape, idx_00),
        pl.BlockSpec(fused["emb_tab"].shape, idx_00),
        pl.BlockSpec(fused["we"].shape, idx_00),
        pl.BlockSpec(fused["wm1sp"].shape, idx_00),
        pl.BlockSpec(fused["wm1cl"].shape, idx_00),
        pl.BlockSpec(fused["wsq"].shape, idx_000),                # stacked block-diag weights
        pl.BlockSpec(fused["brow"].shape, idx_00),                # packed bias/row table
    ]
    out_spec = pl.BlockSpec((2, tb, n), lambda b, bt2: (0, b, 0))

    out = pl.pallas_call(
        kernel,
        out_shape=jax.ShapeDtypeStruct((2, bs, n), jnp.float32),
        grid_spec=pltpu.PrefetchScalarGridSpec(
            num_scalar_prefetch=1,                                # bt2 -> SMEM
            grid=(nb,),
            in_specs=in_specs,
            out_specs=out_spec),
        compiler_params=pltpu.CompilerParams(
            dimension_semantics=("parallel",),
            vmem_limit_bytes=vmem_limit),
    )(fused["bt2"], spatial_inp, categories, diag,
      fused["ws1"], fused["emb_tab"], fused["we"],
      fused["wm1sp"], fused["wm1cl"], fused["wsq"], fused["brow"])
    return out


# ---------------------------------------------------------------------------
# Glue: CriticTanh.forward(state, action) -> (q1, q2)
# ---------------------------------------------------------------------------
def critic_tanh_forward(state, action, tar_scores, fused_params, num_objs):
    bs = state.shape[0]
    s = state.reshape(bs, num_objs, 3)
    positions = s[:, :, :2]                                       # (bs, N, 2)
    categories = s[:, :, 2].astype(jnp.int32)                     # (bs, N)
    act = action.reshape(bs, num_objs, 2)                         # (bs, N, 2)
    # TODO(synk): target_score.get_score is external; tar_scores is provided as an input.
    spatial_inp = jnp.concatenate([positions, act, jnp.tanh(tar_scores)], axis=-1)   # (bs,N,6)
    q = critic_heads(spatial_inp, categories, fused_params)       # (2, bs, N)
    return q[0], q[1]


# ---------------------------------------------------------------------------
# Parameter fusion: two heads -> lane-fused / block-diagonal kernel operands
# ---------------------------------------------------------------------------
def _block_diag(a, b):
    z1 = jnp.zeros((a.shape[0], b.shape[1]), a.dtype)
    z2 = jnp.zeros((b.shape[0], a.shape[1]), a.dtype)
    return jnp.concatenate([jnp.concatenate([a, z1], axis=1),
                            jnp.concatenate([z2, b], axis=1)], axis=0)


def _two_head_ab(wa1, wb1, wa2, wb2):
    # rows = fused per-head input features; columns = [a1 | a2 | b1 | b2]
    z = jnp.zeros_like(wa1)
    top = jnp.concatenate([wa1, z, wb1, z], axis=1)
    bot = jnp.concatenate([z, wa2, z, wb2], axis=1)
    return jnp.concatenate([top, bot], axis=0)


def fuse_critic_params(p1, p2):
    H = p1["ws2"].shape[0]
    E = p1["we"].shape[0]
    D = H + E
    assert E <= H, "bias-row packing assumes embed_dim <= hidden_dim (true for module defaults)"
    bf = jnp.bfloat16

    def split_wm1(p):
        w = p["wm1"]                           # (2D, H): rows = [h_i | h_j - h_i]
        return w[:H], w[H:D], w[D:D + H], w[D + H:]

    a_sp1, a_cl1, b_sp1, b_cl1 = split_wm1(p1)
    a_sp2, a_cl2, b_sp2, b_cl2 = split_wm1(p2)

    def crow(k):                               # (1, W) per head -> fused (2W,) row
        return jnp.concatenate([p1[k][0], p2[k][0]], axis=0)

    be_row = jnp.concatenate([crow("be"), jnp.zeros((2 * (H - E),), jnp.float32)])
    wt2_row = jnp.concatenate([p1["wt2"][:, 0], p2["wt2"][:, 0]], axis=0)          # (2H,)

    return {
        "ws1": jnp.concatenate([p1["ws1"], p2["ws1"]], axis=1).astype(bf),         # (6, 2H)
        "emb_tab": jnp.concatenate([p1["emb_table"], p2["emb_table"]], axis=1).astype(bf),
        "we": _block_diag(p1["we"], p2["we"]).astype(bf),                          # (2E, 2E)
        "wm1sp": _two_head_ab(a_sp1, b_sp1, a_sp2, b_sp2).astype(bf),              # (2H, 4H)
        "wm1cl": _two_head_ab(a_cl1, b_cl1, a_cl2, b_cl2).astype(bf),              # (2E, 4H)
        "wsq": jnp.stack([_block_diag(p1["ws2"], p2["ws2"]),
                          _block_diag(p1["wm2"], p2["wm2"]),
                          _block_diag(p1["wt1"], p2["wt1"])], axis=0).astype(bf),  # (3, 2H, 2H)
        "brow": jnp.stack([crow("bs1"), crow("bs2"), be_row, crow("bm1"),
                           crow("bm2"), crow("bt1"), wt2_row,
                           jnp.zeros((2 * H,), jnp.float32)], axis=0),             # (8, 2H) f32
        "bt2": jnp.concatenate([p1["bt2"][0], p2["bt2"][0]], axis=0),              # (2,) f32
    }


# ---------------------------------------------------------------------------
# Deterministic per-head parameter init (shapes follow the module's __init__)
# ---------------------------------------------------------------------------
def init_head_params(key, hidden, embed, num_classes):
    ks = jax.random.split(key, 8)

    def lin(k, fin, fout):
        lim = 1.0 / np.sqrt(fin)
        kw, kb = jax.random.split(k)
        w = jax.random.uniform(kw, (fin, fout), jnp.float32, -lim, lim)
        b = jax.random.uniform(kb, (1, fout), jnp.float32, -lim, lim)
        return w, b

    d = hidden + embed
    p = {}
    p["emb_table"] = jax.random.normal(ks[0], (num_classes, embed), jnp.float32)
    p["ws1"], p["bs1"] = lin(ks[1], 6, hidden)
    p["ws2"], p["bs2"] = lin(ks[2], hidden, hidden)
    p["we"], p["be"] = lin(ks[3], embed, embed)
    p["wm1"], p["bm1"] = lin(ks[4], 2 * d, hidden)          # EdgeConv mlp layer 1
    p["wm2"], p["bm2"] = lin(ks[5], hidden, hidden)         # EdgeConv mlp layer 2
    p["wt1"], p["bt1"] = lin(ks[6], hidden, hidden)
    p["wt2"], p["bt2"] = lin(ks[7], hidden, 1)
    return p


# ---------------------------------------------------------------------------
# Pure-JAX f32 reference (mirrors PyTorch semantics with fully-connected knn graph)
# ---------------------------------------------------------------------------
def _head_ref(spatial_inp, emb, p):
    lin = lambda x, w, b: x @ w + b
    s1 = jnp.tanh(lin(spatial_inp, p["ws1"], p["bs1"]))
    spatial = lin(s1, p["ws2"], p["bs2"])
    cls = lin(jnp.tanh(emb), p["we"], p["be"])
    h = jnp.tanh(jnp.concatenate([spatial, cls], axis=-1))   # (bs, N, H+E)
    bs, n, d = h.shape
    hi = jnp.broadcast_to(h[:, :, None, :], (bs, n, n, d))
    hj = jnp.broadcast_to(h[:, None, :, :], (bs, n, n, d))
    e = jnp.concatenate([hi, hj - hi], axis=-1)               # (bs, N, N, 2D)
    m = jnp.tanh(e @ p["wm1"] + p["bm1"]) @ p["wm2"] + p["bm2"]
    eye = jnp.eye(n, dtype=bool)[None, :, :, None]
    conv = jnp.max(jnp.where(eye, -jnp.inf, m), axis=2)
    x = jnp.tanh(conv)
    t1 = jnp.tanh(lin(x, p["wt1"], p["bt1"]))
    return (t1 @ p["wt2"] + p["bt2"])[..., 0]


if __name__ == "__main__":
    # Small, consistent shapes: bs=8, num_objs=8 (knn = num_objs-1 = 7), hidden=32, embed=16.
    BS, N, H, E, C = 8, 8, 32, 16, 3

    key = jax.random.PRNGKey(0)
    k_pos, k_cat, k_act, k_tar, k_p1, k_p2 = jax.random.split(key, 6)

    positions = jax.random.normal(k_pos, (BS, N, 2), jnp.float32)
    categories = jax.random.randint(k_cat, (BS, N), 0, C).astype(jnp.float32)
    state = jnp.concatenate([positions, categories[..., None]], axis=-1).reshape(BS, N * 3)
    action = jax.random.normal(k_act, (BS, N * 2), jnp.float32)
    tar_scores = jax.random.normal(k_tar, (BS, N, 2), jnp.float32)   # stand-in for target_score

    p1 = init_head_params(k_p1, H, E, C)
    p2 = init_head_params(k_p2, H, E, C)
    fused = fuse_critic_params(p1, p2)

    q1, q2 = critic_tanh_forward(state, action, tar_scores, fused, N)
    jax.block_until_ready((q1, q2))

    # Correctness check against the pure-f32 JAX reference. The kernel uses bf16 MXU operands
    # (and bf16 tanh on v6e/v7x), so the tolerance covers bf16 rounding across ~8 layers.
    s = state.reshape(BS, N, 3)
    spatial_inp = jnp.concatenate(
        [s[:, :, :2], action.reshape(BS, N, 2), jnp.tanh(tar_scores)], axis=-1)
    cats = s[:, :, 2].astype(jnp.int32)
    q1_ref = _head_ref(spatial_inp, p1["emb_table"][cats], p1)
    q2_ref = _head_ref(spatial_inp, p2["emb_table"][cats], p2)
    np.testing.assert_allclose(np.asarray(q1), np.asarray(q1_ref), rtol=5e-2, atol=5e-2)
    np.testing.assert_allclose(np.asarray(q2), np.asarray(q2_ref), rtol=5e-2, atol=5e-2)

    assert q1.shape == (BS, N) and q2.shape == (BS, N)
    print("KERNEL_OK")
</pallas_src>

<mosaic_0001>
module attributes {stable_mosaic.version = 11 : i64} {
  func.func @_critic2_kernel(%arg0: i32, %arg1: memref<2xf32, #tpu.memory_space<smem>>, %arg2: memref<8x8x6xf32, #tpu.memory_space<vmem>>, %arg3: memref<8x8xi32, #tpu.memory_space<vmem>>, %arg4: memref<8x8xf32, #tpu.memory_space<vmem>>, %arg5: memref<6x64xbf16, #tpu.memory_space<vmem>>, %arg6: memref<3x32xbf16, #tpu.memory_space<vmem>>, %arg7: memref<32x32xbf16, #tpu.memory_space<vmem>>, %arg8: memref<64x128xbf16, #tpu.memory_space<vmem>>, %arg9: memref<32x128xbf16, #tpu.memory_space<vmem>>, %arg10: memref<3x64x64xbf16, #tpu.memory_space<vmem>>, %arg11: memref<8x64xf32, #tpu.memory_space<vmem>>, %arg12: memref<2x8x8xf32, #tpu.memory_space<vmem>>) attributes {dimension_semantics = [#tpu.dimension_semantics<parallel>], iteration_bounds = array<i64: 1>, scalar_prefetch = 1 : i64, scratch_operands = 0 : i64, tpu.core_type = #tpu.core_type<tc>, window_params = [{transform_indices = @transform_0, window_bounds = array<i64: 8, 8, 6>}, {transform_indices = @transform_1, window_bounds = array<i64: 8, 8>}, {pipeline_mode = #tpu.pipeline_mode<synchronous>, transform_indices = @transform_2, window_bounds = array<i64: 8, 8>}, {pipeline_mode = #tpu.pipeline_mode<synchronous>, transform_indices = @transform_3, window_bounds = array<i64: 6, 64>}, {pipeline_mode = #tpu.pipeline_mode<synchronous>, transform_indices = @transform_4, window_bounds = array<i64: 3, 32>}, {pipeline_mode = #tpu.pipeline_mode<synchronous>, transform_indices = @transform_5, window_bounds = array<i64: 32, 32>}, {pipeline_mode = #tpu.pipeline_mode<synchronous>, transform_indices = @transform_6, window_bounds = array<i64: 64, 128>}, {pipeline_mode = #tpu.pipeline_mode<synchronous>, transform_indices = @transform_7, window_bounds = array<i64: 32, 128>}, {pipeline_mode = #tpu.pipeline_mode<synchronous>, transform_indices = @transform_8, window_bounds = array<i64: 3, 64, 64>}, {pipeline_mode = #tpu.pipeline_mode<synchronous>, transform_indices = @transform_9, window_bounds = array<i64: 8, 64>}, {transform_indices = @transform_10, window_bounds = array<i64: 2, 8, 8>}]} {
    %c0 = arith.constant 0 : index
    %c0_0 = arith.constant 0 : index
    %0 = vector.load %arg11[%c0, %c0_0] : memref<8x64xf32, #tpu.memory_space<vmem>>, vector<8x64xf32>
    %c0_1 = arith.constant 0 : index
    %c0_2 = arith.constant 0 : index
    %c0_3 = arith.constant 0 : index
    %1 = vector.load %arg2[%c0_1, %c0_2, %c0_3] : memref<8x8x6xf32, #tpu.memory_space<vmem>>, vector<8x8x6xf32>
    %2 = vector.shape_cast %1 : vector<8x8x6xf32> to vector<64x6xf32>
    %c0_4 = arith.constant 0 : index
    %c0_5 = arith.constant 0 : index
    %3 = vector.load %arg5[%c0_4, %c0_5] : memref<6x64xbf16, #tpu.memory_space<vmem>>, vector<6x64xbf16>
    %4 = arith.truncf %2 : vector<64x6xf32> to vector<64x6xbf16>
    %cst = arith.constant dense<0.000000e+00> : vector<64x64xf32>
    %5 = tpu.matmul %4, %3, %cst {dimension_numbers = #tpu.dot_dimension_numbers<[1], [0], [0], [1], [0, 0, 1, 1], [], []>} : vector<64x6xbf16>, vector<6x64xbf16>, vector<64x64xf32> -> vector<64x64xf32>
    %6 = vector.extract_strided_slice %0 {offsets = [0, 0], sizes = [1, 64], strides = [1, 1]} : vector<8x64xf32> to vector<1x64xf32>
    %7 = vector.shape_cast %6 : vector<1x64xf32> to vector<64xf32>
    %8 = vector.shape_cast %7 : vector<64xf32> to vector<1x64xf32>
    %9 = vector.broadcast %8 : vector<1x64xf32> to vector<64x64xf32>
    %10 = arith.addf %5, %9 : vector<64x64xf32>
    %11 = math.tanh %10 : vector<64x64xf32>
    %c0_6 = arith.constant 0 : index
    %c0_7 = arith.constant 0 : index
    %c0_8 = arith.constant 0 : index
    %12 = vector.load %arg10[%c0_6, %c0_7, %c0_8] : memref<3x64x64xbf16, #tpu.memory_space<vmem>>, vector<1x64x64xbf16>
    %13 = vector.shape_cast %12 : vector<1x64x64xbf16> to vector<64x64xbf16>
    %14 = arith.truncf %11 : vector<64x64xf32> to vector<64x64xbf16>
    %cst_9 = arith.constant dense<0.000000e+00> : vector<64x64xf32>
    %15 = tpu.matmul %14, %13, %cst_9 {dimension_numbers = #tpu.dot_dimension_numbers<[1], [0], [0], [1], [0, 0, 1, 1], [], []>} : vector<64x64xbf16>, vector<64x64xbf16>, vector<64x64xf32> -> vector<64x64xf32>
    %16 = vector.extract_strided_slice %0 {offsets = [1, 0], sizes = [1, 64], strides = [1, 1]} : vector<8x64xf32> to vector<1x64xf32>
    %17 = vector.shape_cast %16 : vector<1x64xf32> to vector<64xf32>
    %18 = vector.shape_cast %17 : vector<64xf32> to vector<1x64xf32>
    %19 = vector.broadcast %18 : vector<1x64xf32> to vector<64x64xf32>
    %20 = arith.addf %15, %19 : vector<64x64xf32>
    %c0_10 = arith.constant 0 : index
    %c0_11 = arith.constant 0 : index
    %21 = vector.load %arg3[%c0_10, %c0_11] : memref<8x8xi32, #tpu.memory_space<vmem>>, vector<8x8xi32>
    %22 = vector.shape_cast %21 : vector<8x8xi32> to vector<8x8x1xi32>
    %23 = tpu.iota {dimensions = array<i32: 2>} : vector<8x8x3xi32>
    %24 = vector.broadcast %22 : vector<8x8x1xi32> to vector<8x8x3xi32>
    %25 = arith.cmpi eq, %24, %23 : vector<8x8x3xi32>
    %26 = arith.extui %25 : vector<8x8x3xi1> to vector<8x8x3xi32>
    %27 = arith.sitofp %26 : vector<8x8x3xi32> to vector<8x8x3xf32>
    %28 = vector.shape_cast %27 : vector<8x8x3xf32> to vector<64x3xf32>
    %c0_12 = arith.constant 0 : index
    %c0_13 = arith.constant 0 : index
    %29 = vector.load %arg6[%c0_12, %c0_13] : memref<3x32xbf16, #tpu.memory_space<vmem>>, vector<3x32xbf16>
    %30 = arith.truncf %28 : vector<64x3xf32> to vector<64x3xbf16>
    %cst_14 = arith.constant dense<0.000000e+00> : vector<64x32xf32>
    %31 = tpu.matmul %30, %29, %cst_14 {dimension_numbers = #tpu.dot_dimension_numbers<[1], [0], [0], [1], [0, 0, 1, 1], [], []>} : vector<64x3xbf16>, vector<3x32xbf16>, vector<64x32xf32> -> vector<64x32xf32>
    %32 = math.tanh %31 : vector<64x32xf32>
    %c0_15 = arith.constant 0 : index
    %c0_16 = arith.constant 0 : index
    %33 = vector.load %arg7[%c0_15, %c0_16] : memref<32x32xbf16, #tpu.memory_space<vmem>>, vector<32x32xbf16>
    %34 = arith.truncf %32 : vector<64x32xf32> to vector<64x32xbf16>
    %cst_17 = arith.constant dense<0.000000e+00> : vector<64x32xf32>
    %35 = tpu.matmul %34, %33, %cst_17 {dimension_numbers = #tpu.dot_dimension_numbers<[1], [0], [0], [1], [0, 0, 1, 1], [], []>} : vector<64x32xbf16>, vector<32x32xbf16>, vector<64x32xf32> -> vector<64x32xf32>
    %36 = vector.extract_strided_slice %0 {offsets = [2, 0], sizes = [1, 64], strides = [1, 1]} : vector<8x64xf32> to vector<1x64xf32>
    %37 = vector.shape_cast %36 : vector<1x64xf32> to vector<64xf32>
    %38 = vector.extract_strided_slice %37 {offsets = [0], sizes = [32], strides = [1]} : vector<64xf32> to vector<32xf32>
    %39 = vector.shape_cast %38 : vector<32xf32> to vector<1x32xf32>
    %40 = vector.broadcast %39 : vector<1x32xf32> to vector<64x32xf32>
    %41 = arith.addf %35, %40 : vector<64x32xf32>
    %42 = math.tanh %20 : vector<64x64xf32>
    %43 = math.tanh %41 : vector<64x32xf32>
    %c0_18 = arith.constant 0 : index
    %c0_19 = arith.constant 0 : index
    %44 = vector.load %arg8[%c0_18, %c0_19] : memref<64x128xbf16, #tpu.memory_space<vmem>>, vector<64x128xbf16>
    %45 = arith.truncf %42 : vector<64x64xf32> to vector<64x64xbf16>
    %cst_20 = arith.constant dense<0.000000e+00> : vector<64x128xf32>
    %46 = tpu.matmul %45, %44, %cst_20 {dimension_numbers = #tpu.dot_dimension_numbers<[1], [0], [0], [1], [0, 0, 1, 1], [], []>} : vector<64x64xbf16>, vector<64x128xbf16>, vector<64x128xf32> -> vector<64x128xf32>
    %c0_21 = arith.constant 0 : index
    %c0_22 = arith.constant 0 : index
    %47 = vector.load %arg9[%c0_21, %c0_22] : memref<32x128xbf16, #tpu.memory_space<vmem>>, vector<32x128xbf16>
    %48 = arith.truncf %43 : vector<64x32xf32> to vector<64x32xbf16>
    %cst_23 = arith.constant dense<0.000000e+00> : vector<64x128xf32>
    %49 = tpu.matmul %48, %47, %cst_23 {dimension_numbers = #tpu.dot_dimension_numbers<[1], [0], [0], [1], [0, 0, 1, 1], [], []>} : vector<64x32xbf16>, vector<32x128xbf16>, vector<64x128xf32> -> vector<64x128xf32>
    %50 = arith.addf %46, %49 : vector<64x128xf32>
    %51 = vector.extract_strided_slice %50 {offsets = [0, 0], sizes = [64, 64], strides = [1, 1]} : vector<64x128xf32> to vector<64x64xf32>
    %52 = vector.extract_strided_slice %50 {offsets = [0, 64], sizes = [64, 64], strides = [1, 1]} : vector<64x128xf32> to vector<64x64xf32>
    %53 = arith.subf %51, %52 : vector<64x64xf32>
    %54 = vector.extract_strided_slice %0 {offsets = [3, 0], sizes = [1, 64], strides = [1, 1]} : vector<8x64xf32> to vector<1x64xf32>
    %55 = vector.shape_cast %54 : vector<1x64xf32> to vector<64xf32>
    %56 = vector.shape_cast %55 : vector<64xf32> to vector<1x64xf32>
    %57 = vector.broadcast %56 : vector<1x64xf32> to vector<64x64xf32>
    %58 = arith.addf %53, %57 : vector<64x64xf32>
    %59 = vector.shape_cast %52 : vector<64x64xf32> to vector<8x8x64xf32>
    %60 = vector.shape_cast %58 : vector<64x64xf32> to vector<8x8x64xf32>
    %61 = vector.shape_cast %60 : vector<8x8x64xf32> to vector<8x8x1x64xf32>
    %62 = vector.shape_cast %59 : vector<8x8x64xf32> to vector<8x1x8x64xf32>
    %63 = vector.broadcast %61 : vector<8x8x1x64xf32> to vector<8x8x8x64xf32>
    %64 = vector.broadcast %62 : vector<8x1x8x64xf32> to vector<8x8x8x64xf32>
    %65 = arith.addf %63, %64 : vector<8x8x8x64xf32>
    %66 = math.tanh %65 : vector<8x8x8x64xf32>
    %67 = vector.shape_cast %66 : vector<8x8x8x64xf32> to vector<512x64xf32>
    %c1 = arith.constant 1 : index
    %c0_24 = arith.constant 0 : index
    %c0_25 = arith.constant 0 : index
    %68 = vector.load %arg10[%c1, %c0_24, %c0_25] : memref<3x64x64xbf16, #tpu.memory_space<vmem>>, vector<1x64x64xbf16>
    %69 = vector.shape_cast %68 : vector<1x64x64xbf16> to vector<64x64xbf16>
    %70 = arith.truncf %67 : vector<512x64xf32> to vector<512x64xbf16>
    %cst_26 = arith.constant dense<0.000000e+00> : vector<512x64xf32>
    %71 = tpu.matmul %70, %69, %cst_26 {dimension_numbers = #tpu.dot_dimension_numbers<[1], [0], [0], [1], [0, 0, 1, 1], [], []>} : vector<512x64xbf16>, vector<64x64xbf16>, vector<512x64xf32> -> vector<512x64xf32>
    %72 = vector.extract_strided_slice %0 {offsets = [4, 0], sizes = [1, 64], strides = [1, 1]} : vector<8x64xf32> to vector<1x64xf32>
    %73 = vector.shape_cast %72 : vector<1x64xf32> to vector<64xf32>
    %74 = vector.shape_cast %73 : vector<64xf32> to vector<1x64xf32>
    %75 = vector.broadcast %74 : vector<1x64xf32> to vector<512x64xf32>
    %76 = arith.addf %71, %75 : vector<512x64xf32>
    %77 = vector.shape_cast %76 : vector<512x64xf32> to vector<8x8x8x64xf32>
    %c0_27 = arith.constant 0 : index
    %c0_28 = arith.constant 0 : index
    %78 = vector.load %arg4[%c0_27, %c0_28] : memref<8x8xf32, #tpu.memory_space<vmem>>, vector<8x8xf32>
    %79 = vector.shape_cast %78 : vector<8x8xf32> to vector<1x8x8x1xf32>
    %80 = vector.broadcast %79 : vector<1x8x8x1xf32> to vector<8x8x8x64xf32>
    %81 = arith.addf %77, %80 : vector<8x8x8x64xf32>
    %cst_29 = arith.constant dense<0xFF800000> : vector<8x8x64xf32>
    %82 = vector.multi_reduction <maximumf>, %81, %cst_29 [2] : vector<8x8x8x64xf32> to vector<8x8x64xf32>
    %83 = math.tanh %82 : vector<8x8x64xf32>
    %84 = vector.shape_cast %83 : vector<8x8x64xf32> to vector<64x64xf32>
    %c2 = arith.constant 2 : index
    %c0_30 = arith.constant 0 : index
    %c0_31 = arith.constant 0 : index
    %85 = vector.load %arg10[%c2, %c0_30, %c0_31] : memref<3x64x64xbf16, #tpu.memory_space<vmem>>, vector<1x64x64xbf16>
    %86 = vector.shape_cast %85 : vector<1x64x64xbf16> to vector<64x64xbf16>
    %87 = arith.truncf %84 : vector<64x64xf32> to vector<64x64xbf16>
    %cst_32 = arith.constant dense<0.000000e+00> : vector<64x64xf32>
    %88 = tpu.matmul %87, %86, %cst_32 {dimension_numbers = #tpu.dot_dimension_numbers<[1], [0], [0], [1], [0, 0, 1, 1], [], []>} : vector<64x64xbf16>, vector<64x64xbf16>, vector<64x64xf32> -> vector<64x64xf32>
    %89 = vector.extract_strided_slice %0 {offsets = [5, 0], sizes = [1, 64], strides = [1, 1]} : vector<8x64xf32> to vector<1x64xf32>
    %90 = vector.shape_cast %89 : vector<1x64xf32> to vector<64xf32>
    %91 = vector.shape_cast %90 : vector<64xf32> to vector<1x64xf32>
    %92 = vector.broadcast %91 : vector<1x64xf32> to vector<64x64xf32>
    %93 = arith.addf %88, %92 : vector<64x64xf32>
    %94 = math.tanh %93 : vector<64x64xf32>
    %95 = vector.shape_cast %94 : vector<64x64xf32> to vector<8x8x64xf32>
    %96 = vector.extract_strided_slice %0 {offsets = [6, 0], sizes = [1, 64], strides = [1, 1]} : vector<8x64xf32> to vector<1x64xf32>
    %97 = vector.shape_cast %96 : vector<1x64xf32> to vector<64xf32>
    %98 = vector.shape_cast %97 : vector<64xf32> to vector<1x1x64xf32>
    %99 = vector.broadcast %98 : vector<1x1x64xf32> to vector<8x8x64xf32>
    %100 = arith.mulf %95, %99 : vector<8x8x64xf32>
    %101 = vector.extract_strided_slice %100 {offsets = [0, 0, 0], sizes = [8, 8, 32], strides = [1, 1, 1]} : vector<8x8x64xf32> to vector<8x8x32xf32>
    %cst_33 = arith.constant dense<0.000000e+00> : vector<8x8xf32>
    %102 = vector.multi_reduction <add>, %101, %cst_33 [2] : vector<8x8x32xf32> to vector<8x8xf32>
    %c0_34 = arith.constant 0 : index
    %103 = memref.load %arg1[%c0_34] : memref<2xf32, #tpu.memory_space<smem>>
    %104 = vector.broadcast %103 : f32 to vector<8x8xf32>
    %105 = arith.addf %102, %104 : vector<8x8xf32>
    %c0_35 = arith.constant 0 : index
    %c0_36 = arith.constant 0 : index
    %c0_37 = arith.constant 0 : index
    %106 = vector.load %arg12[%c0_35, %c0_36, %c0_37] : memref<2x8x8xf32, #tpu.memory_space<vmem>>, vector<1x8x8xf32>
    %107 = vector.shape_cast %106 : vector<1x8x8xf32> to vector<8x8xf32>
    %108 = vector.shape_cast %105 : vector<8x8xf32> to vector<1x8x8xf32>
    tpu.vector_store %arg12[%c0_35, %c0_36, %c0_37], %108 {strides = array<i32>} : memref<2x8x8xf32, #tpu.memory_space<vmem>>, vector<1x8x8xf32>,
    %109 = vector.extract_strided_slice %100 {offsets = [0, 0, 32], sizes = [8, 8, 32], strides = [1, 1, 1]} : vector<8x8x64xf32> to vector<8x8x32xf32>
    %cst_38 = arith.constant dense<0.000000e+00> : vector<8x8xf32>
    %110 = vector.multi_reduction <add>, %109, %cst_38 [2] : vector<8x8x32xf32> to vector<8x8xf32>
    %c1_39 = arith.constant 1 : index
    %111 = memref.load %arg1[%c1_39] : memref<2xf32, #tpu.memory_space<smem>>
    %112 = vector.broadcast %111 : f32 to vector<8x8xf32>
    %113 = arith.addf %110, %112 : vector<8x8xf32>
    %c1_40 = arith.constant 1 : index
    %c0_41 = arith.constant 0 : index
    %c0_42 = arith.constant 0 : index
    %114 = vector.load %arg12[%c1_40, %c0_41, %c0_42] : memref<2x8x8xf32, #tpu.memory_space<vmem>>, vector<1x8x8xf32>
    %115 = vector.shape_cast %114 : vector<1x8x8xf32> to vector<8x8xf32>
    %116 = vector.shape_cast %113 : vector<8x8xf32> to vector<1x8x8xf32>
    tpu.vector_store %arg12[%c1_40, %c0_41, %c0_42], %116 {strides = array<i32>} : memref<2x8x8xf32, #tpu.memory_space<vmem>>, vector<1x8x8xf32>,
    return
  }
  func.func @transform_0(%arg0: i32, %arg1: memref<2xf32, #tpu.memory_space<smem>>) -> (i32, i32, i32) {
    %c0_i32 = arith.constant 0 : i32
    %c0_i32_0 = arith.constant 0 : i32
    %c0_i32_1 = arith.constant 0 : i32
    return %arg0, %c0_i32, %c0_i32_0 : i32, i32, i32
  }
  func.func @transform_1(%arg0: i32, %arg1: memref<2xf32, #tpu.memory_space<smem>>) -> (i32, i32) {
    %c0_i32 = arith.constant 0 : i32
    %c0_i32_0 = arith.constant 0 : i32
    return %arg0, %c0_i32 : i32, i32
  }
  func.func @transform_2(%arg0: i32, %arg1: memref<2xf32, #tpu.memory_space<smem>>) -> (i32, i32) {
    %c0_i32 = arith.constant 0 : i32
    %c0_i32_0 = arith.constant 0 : i32
    %c0_i32_1 = arith.constant 0 : i32
    return %c0_i32, %c0_i32_0 : i32, i32
  }
  func.func @transform_3(%arg0: i32, %arg1: memref<2xf32, #tpu.memory_space<smem>>) -> (i32, i32) {
    %c0_i32 = arith.constant 0 : i32
    %c0_i32_0 = arith.constant 0 : i32
    %c0_i32_1 = arith.constant 0 : i32
    return %c0_i32, %c0_i32_0 : i32, i32
  }
  func.func @transform_4(%arg0: i32, %arg1: memref<2xf32, #tpu.memory_space<smem>>) -> (i32, i32) {
    %c0_i32 = arith.constant 0 : i32
    %c0_i32_0 = arith.constant 0 : i32
    %c0_i32_1 = arith.constant 0 : i32
    return %c0_i32, %c0_i32_0 : i32, i32
  }
  func.func @transform_5(%arg0: i32, %arg1: memref<2xf32, #tpu.memory_space<smem>>) -> (i32, i32) {
    %c0_i32 = arith.constant 0 : i32
    %c0_i32_0 = arith.constant 0 : i32
    %c0_i32_1 = arith.constant 0 : i32
    return %c0_i32, %c0_i32_0 : i32, i32
  }
  func.func @transform_6(%arg0: i32, %arg1: memref<2xf32, #tpu.memory_space<smem>>) -> (i32, i32) {
    %c0_i32 = arith.constant 0 : i32
    %c0_i32_0 = arith.constant 0 : i32
    %c0_i32_1 = arith.constant 0 : i32
    return %c0_i32, %c0_i32_0 : i32, i32
  }
  func.func @transform_7(%arg0: i32, %arg1: memref<2xf32, #tpu.memory_space<smem>>) -> (i32, i32) {
    %c0_i32 = arith.constant 0 : i32
    %c0_i32_0 = arith.constant 0 : i32
    %c0_i32_1 = arith.constant 0 : i32
    return %c0_i32, %c0_i32_0 : i32, i32
  }
  func.func @transform_8(%arg0: i32, %arg1: memref<2xf32, #tpu.memory_space<smem>>) -> (i32, i32, i32) {
    %c0_i32 = arith.constant 0 : i32
    %c0_i32_0 = arith.constant 0 : i32
    %c0_i32_1 = arith.constant 0 : i32
    %c0_i32_2 = arith.constant 0 : i32
    return %c0_i32, %c0_i32_0, %c0_i32_1 : i32, i32, i32
  }
  func.func @transform_9(%arg0: i32, %arg1: memref<2xf32, #tpu.memory_space<smem>>) -> (i32, i32) {
    %c0_i32 = arith.constant 0 : i32
    %c0_i32_0 = arith.constant 0 : i32
    %c0_i32_1 = arith.constant 0 : i32
    return %c0_i32, %c0_i32_0 : i32, i32
  }
  func.func @transform_10(%arg0: i32, %arg1: memref<2xf32, #tpu.memory_space<smem>>) -> (i32, i32, i32) {
    %c0_i32 = arith.constant 0 : i32
    %c0_i32_0 = arith.constant 0 : i32
    %c0_i32_1 = arith.constant 0 : i32
    return %c0_i32, %arg0, %c0_i32_0 : i32, i32, i32
  }
}

</mosaic_0001>

<bundles_post_ra>
// kernel: tpu_custom_call.1
= control target key start
LH: loop header
LB: loop body
LE: loop exit
PB: predicated region body
PF: predicated region fallthrough
CT: control target
= control target key end

     0   :  { %s4377_s17 = smov [#allocation3]   ;;  %s5548_s0 = inlined_call_operand.hbm [shape: f32[2], index: 0, kind: input, shape index: {}]   ;;  %s5549_s1 = inlined_call_operand.vmem [shape: f32[8,8,6], index: 1, kind: input, shape index: {}]   ;;  %s5550_s2 = inlined_call_operand.hbm [shape: s32[8,8], index: 2, kind: input, shape index: {}]   ;;  %s5551_s3 = inlined_call_operand.hbm [shape: f32[8,8], index: 3, kind: input, shape index: {}]   ;;  %s5552_s4 = inlined_call_operand.hbm [shape: bf16[6,64], index: 4, kind: input, shape index: {}]   ;;  %s5553_s5 = inlined_call_operand.hbm [shape: bf16[3,32], index: 5, kind: input, shape index: {}]   ;;  %s5554_s6 = inlined_call_operand.hbm [shape: bf16[32,32], index: 6, kind: input, shape index: {}]   ;;  %s5555_s7 = inlined_call_operand.vmem [shape: bf16[64,128], index: 7, kind: input, shape index: {}]   ;;  %s5556_s8 = inlined_call_operand.hbm [shape: bf16[32,128], index: 8, kind: input, shape index: {}]   ;;  %s5557_s9 = inlined_call_operand.vmem [shape: bf16[3,64,64], index: 9, kind: input, shape index: {}]   ;;  %s5558_s10 = inlined_call_operand.hbm [shape: f32[8,64], index: 10, kind: input, shape index: {}]   ;;  %s5559_s11 = inlined_call_operand.hbm [shape: f32[2,8,8], index: 11, kind: output, shape index: {}]  }
   0x1   :  { %17 = dma.hbm_to_smem %s5548_s0, 16, %s4377_s17, [#allocation2] }
   0x2   :  { %4365 = dma.done.wait [#allocation2], 16 }
   0x3   :  { %4366 = vsyncadd [#allocation2], 4294967280 }
   0x4   :  { %19 = sfence }
   0x5   :  { %20 = vsyncpa [#allocation5], 0 }
   0x6   :  { %21 = vsyncpa [#allocation8], 0 }
   0x7   :  { %22 = vsyncpa [#allocation11], 0 }
   0x8   :  { %23 = vsyncpa [#allocation14], 0 }
   0x9   :  { %24 = vsyncpa [#allocation6], 0  ;;  %s4378_s20 = smov [#allocation7]   ;;  %s4379_s22 = smov [#allocation10]  }
   0xa   :  { %s43_s21 = sshll.u32 %s4378_s20, 4  ;;  %s63_s23 = sshll.u32 %s4379_s22, 4  ;;  %s44_s21 = int_to_ptr.vmem [resolvable:$true] %s43_s21  ;;  %s64_s23 = int_to_ptr.vmem [resolvable:$true] %s63_s23 }
   0xb   :  { %s4213_s24 = scalar_lea.vmem %s44_s21, 128  ;;  %p4218_p1 = scmp.lt.s32.totalorder %s44_s21, %s44_s21 }
   0xc   :  { %p4214_p0 = scmp.ne.s32.totalorder %s44_s21, %s4213_s24  ;;  %p4219_p2 = scmp.lt.s32.totalorder %s4213_s24, %s4213_s24 }
   0xe   :  { %p4220_p3 = por %p4219_p2, %p4218_p1 }
  0x10   :  { %p4221_p4 = pnand %p4220_p3, %p4214_p0 }
  0x12   :  { %4224 = shalt.err (!%p4221_p4)
}
  0x13   :  { %46 = dma.hbm_to_vmem [thread:$0]  %s5551_s3, 128, %s44_s21, [#allocation8]  }
  0x14   :  { %s4233_s26 = scalar_lea.vmem %s64_s23, 32  ;;  %p4238_p6 = scmp.lt.s32.totalorder %s64_s23, %s64_s23 }
  0x15   :  { %p4234_p5 = scmp.ne.s32.totalorder %s64_s23, %s4233_s26  ;;  %p4239_p7 = scmp.lt.s32.totalorder %s4233_s26, %s4233_s26 }
  0x17   :  { %p4240_p8 = por %p4239_p7, %p4238_p6 }
  0x19   :  { %p4241_p9 = pnand %p4240_p8, %p4234_p5 }
  0x1b   :  { %4244 = shalt.err (!%p4241_p9)
}
  0x1c   :  { %66 = dma.hbm_to_vmem [thread:$0]  %s5553_s5, 32, %s64_s23, [#allocation11]  }
  0x1d   :  { %s4380_s29 = smov [#allocation13]   ;;  %s4381_s12 = smov [#allocation4]  }
  0x1e   :  { %s86_s30 = sshll.u32 %s4380_s29, 4  ;;  %s33_s13 = sshll.u32 %s4381_s12, 4  ;;  %s87_s30 = int_to_ptr.vmem [resolvable:$true] %s86_s30  ;;  %s34_s13 = int_to_ptr.vmem [resolvable:$true] %s33_s13 }
  0x1f   :  { %s4253_s14 = scalar_lea.vmem %s87_s30, 256  ;;  %p4258_p11 = scmp.lt.s32.totalorder %s87_s30, %s87_s30 }
  0x20   :  { %p4254_p10 = scmp.ne.s32.totalorder %s87_s30, %s4253_s14  ;;  %p4259_p12 = scmp.lt.s32.totalorder %s4253_s14, %s4253_s14 }
  0x22   :  { %p4260_p13 = por %p4259_p12, %p4258_p11 }
  0x24   :  { %p4261_p0 = pnand %p4260_p13, %p4254_p10 }
  0x26   :  { %4264 = shalt.err (!%p4261_p0)
}
  0x27   :  { %s4382_s3 = smov 64   ;;  %s4383_s15 = smov 4  }
  0x28   :  { %92 = dma.hbm_to_vmem [thread:$0]  %s5556_s8, 256, %s87_s30, [#allocation14], %s4382_s3, %s4382_s3, %s4383_s15  }
  0x29   :  { %s4273_s17 = scalar_lea.vmem %s34_s13, 128  ;;  %p4278_p2 = scmp.lt.s32.totalorder %s34_s13, %s34_s13 }
  0x2a   :  { %p4274_p1 = scmp.ne.s32.totalorder %s34_s13, %s4273_s17  ;;  %p4279_p3 = scmp.lt.s32.totalorder %s4273_s17, %s4273_s17 }
  0x2c   :  { %p4280_p4 = por %p4279_p3, %p4278_p2 }
  0x2e   :  { %p4281_p5 = pnand %p4280_p4, %p4274_p1 }
  0x30   :  { %4284 = shalt.err (!%p4281_p5)
}
  0x31   :  { %36 = dma.hbm_to_vmem [thread:$0]  %s5550_s2, 128, %s34_s13, [#allocation5]  }
  0x32   :  { %s4384_s20 = smov [#allocation9]   ;;  %s4385_s22 = smov [#allocation12]  }
  0x33   :  { %s53_s21 = sshll.u32 %s4384_s20, 4  ;;  %s72_s23 = sshll.u32 %s4385_s22, 4  ;;  %s54_s21 = int_to_ptr.vmem [resolvable:$true] %s53_s21  ;;  %s73_s23 = int_to_ptr.vmem [resolvable:$true] %s72_s23 }
  0x34   :  { %s4293_s24 = scalar_lea.vmem %s54_s21, 64  ;;  %p4298_p7 = scmp.lt.s32.totalorder %s54_s21, %s54_s21 }
  0x35   :  { %p4294_p6 = scmp.ne.s32.totalorder %s54_s21, %s4293_s24  ;;  %p4299_p8 = scmp.lt.s32.totalorder %s4293_s24, %s4293_s24 }
  0x37   :  { %p4300_p9 = por %p4299_p8, %p4298_p7 }
  0x39   :  { %p4301_p10 = pnand %p4300_p9, %p4294_p6 }
  0x3b   :  { %4304 = shalt.err (!%p4301_p10)
}
  0x3c   :  { %56 = dma.hbm_to_vmem [thread:$0]  %s5552_s4, 64, %s54_s21, [#allocation8]  }
  0x3d   :  { %s4313_s25 = scalar_lea.vmem %s73_s23, 256  ;;  %p4318_p12 = scmp.lt.s32.totalorder %s73_s23, %s73_s23 }
  0x3e   :  { %p4314_p11 = scmp.ne.s32.totalorder %s73_s23, %s4313_s25  ;;  %p4319_p13 = scmp.lt.s32.totalorder %s4313_s25, %s4313_s25 }
  0x40   :  { %p4320_p0 = por %p4319_p13, %p4318_p12 }
  0x42   :  { %p4321_p1 = pnand %p4320_p0, %p4314_p11 }
  0x44   :  { %4324 = shalt.err (!%p4321_p1)
}
  0x45   :  { %78 = dma.hbm_to_vmem [thread:$0]  %s5554_s6, 256, %s73_s23, [#allocation11], %s4382_s3, %s4382_s3, %s4383_s15  }
  0x46   :  { %s4386_s27 = smov [#allocation15]  }
  0x47   :  { %s101_s28 = sshll.u32 %s4386_s27, 4  ;;  %s102_s28 = int_to_ptr.vmem [resolvable:$true] %s101_s28 }
  0x48   :  { %s4333_s29 = scalar_lea.vmem %s102_s28, 128  ;;  %p4338_p3 = scmp.lt.s32.totalorder %s102_s28, %s102_s28 }
  0x49   :  { %p4334_p2 = scmp.ne.s32.totalorder %s102_s28, %s4333_s29  ;;  %p4339_p4 = scmp.lt.s32.totalorder %s4333_s29, %s4333_s29 }
  0x4b   :  { %p4340_p5 = por %p4339_p4, %p4338_p3 }
  0x4d   :  { %p4341_p6 = pnand %p4340_p5, %p4334_p2 }
  0x4f   :  { %4344 = shalt.err (!%p4341_p6)
}
  0x50   :  { %104 = dma.hbm_to_vmem [thread:$0]  %s5558_s10, 128, %s102_s28, [#allocation14]  }
  0x51   :  { %4367 = dma.done.wait [#allocation5], 128  }
  0x52   :  { %4368 = vsyncadd [#allocation5], 4294967168 }
  0x53   :  { %4369 = dma.done.wait [#allocation8], 192  }
  0x54   :  { %4370 = vsyncadd [#allocation8], 4294967104 }
  0x55   :  { %4371 = dma.done.wait [#allocation11], 288  }
  0x56   :  { %4372 = vsyncadd [#allocation11], 4294967008 }
  0x57   :  { %4373 = dma.done.wait [#allocation14], 384  }
  0x58   :  { %4374 = vsyncadd [#allocation14], 4294966912  ;;  %v141_v0 = vlaneseq  ;;  %vm454_vm0 = vcmask 1040384   ;;  %vm158_vm1 = vcmask 1042432   ;;  %vm455_vm2 = vcmask 1041408   ;;  %v353_v8 = vld [vmem:[#allocation4] sm:$0xff] }
  0x59   :  { %v4387_v4 = vmov 65535   ;;  %v136_v9 = vld [vmem:[#allocation9] sm:$0x7]  ;;  %v128_v12 = vld [vmem:[%s5549_s1] sm:$0xff]  ;;  %v129_v13 = vld [vmem:[%s5549_s1 + $0x8] sm:$0xff]  ;;  %vm145_vm3 = vcmask 48128  }
  0x5a   :  { %v4485_v1 = vshrl.u32 %v141_v0, 7  ;;  %v456_v5 = vsel %vm454_vm0, 4294967295, %v4387_v4  ;;  %3821 = vmatprep.subr.msk.bf16.mxu0 %vm158_vm1, %v136_v9  ;;  %v130_v14 = vld [vmem:[%s5549_s1 + $0x10] sm:$0xff]  ;;  %v131_v19 = vld [vmem:[%s5549_s1 + $0x18] sm:$0xff]  ;;  %v132_v20 = vld [vmem:[%s5549_s1 + $0x20] sm:$0xff]  ;;  %v160_v25 = vsel %vm158_vm1, %v136_v9, 0  ;;  %v137_v26 = vpack.c.bf16 %v129_v13, %v128_v12 }
  0x5b   :  { %v457_v15 = vsel %vm455_vm2, %v456_v5, 0  ;;  %v133_v21 = vld [vmem:[%s5549_s1 + $0x28] sm:$0xff]  ;;  %3650 = vmatpush3.bf16.msra.mxu0 %v160_v25  ;;  %v436_v27 = vld [vmem:[#allocation10] sm:$0x3]  ;;  %v138_v28 = vpack.c.bf16 %v131_v19, %v130_v14  ;;  %v135_v34 = vld [vmem:[%s5549_s1 + $0x38] sm:$0xff]  ;;  %v4561_v42 = vand.u32 127, %v141_v0 }
  0x5c   :  { %5572 = vst [vmem:[#allocation23_spill] sm:$0xff] %v4485_v1  ;;  %v4488_v2 = vsub.s32 0, %v4485_v1  ;;  %v4491_v3 = vsub.s32 2, %v4485_v1  ;;  %v4494_v6 = vsub.s32 3, %v4485_v1  ;;  %v4497_v7 = vsub.s32 1, %v4485_v1  ;;  %3651 = vmatprep.mubr.msk.bf16.mxu0 %vm145_vm3, %v137_v26  ;;  %v134_v33 = vld [vmem:[%s5549_s1 + $0x30] sm:$0xff] }
  0x5d   :  { %v4512_v16 = vsub.s32 5, %v4485_v1  ;;  %v4515_v17 = vsub.s32 4, %v4485_v1  ;;  %v405_v18 = vsub.s32 7, %v4485_v1  ;;  %v4530_v24 = vsub.s32 6, %v4485_v1  ;;  %v3839_v38 = vld [vmem:[%s5557_s9 + $0x18] sm:$0xff]   ;;  %v3840_v39 = vld [vmem:[%s5557_s9 + $0x10] sm:$0xff]  }
  0x5e   :  { %v371_v10 = vrot.slane %v353_v8, %v4491_v3  ;;  %v357_v11 = vrot.slane %v353_v8, %v4488_v2  ;;  %v378_v22 = vrot.slane %v353_v8, %v4494_v6  ;;  %v364_v23 = vrot.slane %v353_v8, %v4497_v7  ;;  %3652 = vmatmul.mubr.msk.bf16.vlgmr.msra.gmra.mxu0 %vm145_vm3, %v138_v28  ;;  %v3841_v40 = vld [vmem:[%s5557_s9 + $0x8] sm:$0xff]   ;;  %v3842_v41 = vld [vmem:[%s5557_s9] sm:$0xff]   ;;  %v4575_v0 = vld [vmem:[#allocation15] sm:$0xff]  ;;  %s3266_s25 = sld [smem:[#allocation3]]  ;;  %s4391_s26 = smov [#allocation16]  }
  0x5f   :  { %5573 = vst [vmem:[#allocation24_spill] sm:$0xff] %v4512_v16  ;;  %5574 = vst [vmem:[#allocation25_spill] sm:$0xff] %v4530_v24  ;;  %v139_v29 = vpack.c.bf16 %v133_v21, %v132_v20  ;;  %v459_v30 = vand.u32 %v457_v15, %v436_v27  ;;  %v392_v31 = vrot.slane %v353_v8, %v4512_v16  ;;  %3659 = vmatprep.subr.bf16.mxu1 %v3839_v38  ;;  %vm441_vm8 = vcmask 23552   ;;  %v3843_v13 = vld [vmem:[#allocation12 + $0x8] sm:$0xff]   ;;  %s3566_s2 = sld [smem:[#allocation3 + $0x1]]  ;;  %s3447_s27 = sshll.u32 %s4391_s26, 4  ;;  %s3448_s27 = int_to_ptr.vmem [resolvable:$true] %s3447_s27 }
  0x60   :  { %373 = vbcast.lane.b32.xlu1 %v371_v10, 256  ;;  %359 = vbcast.lane.b32.xlu0 %v357_v11, 256  ;;  %v385_v32 = vrot.slane %v353_v8, %v4515_v17  ;;  %v406_v35 = vrot.slane %v353_v8, %v405_v18  ;;  %v399_v36 = vrot.slane %v353_v8, %v4530_v24  ;;  %v4388_v47 = vmov 0.0   ;;  %s4345_s28 = scalar_lea.vmem %s3448_s27, 256  ;;  %p4350_p8 = scmp.lt.s32.totalorder %s3448_s27, %s3448_s27 }
  0x61   :  { %3675 = vmatprep.subr.bf16.mxu0 %v459_v30  ;;  %3655 = vmatprep.mubr.msk.bf16.mxu0 %vm145_vm3, %v139_v29  ;;  %v140_v37 = vpack.c.bf16 %v135_v34, %v134_v33  ;;  %5575 = vst [vmem:[#allocation26_spill] sm:$0xff] %v4561_v42  ;;  %v144_v4 = vrot.slane %v4575_v0, %v4488_v2  ;;  %vm275_vm13 = vcmask 523264   ;;  %v3844_v34 = vld [vmem:[#allocation12] sm:$0xff]   ;;  %vm558_vm14 = vcmask 261120   ;;  %p4346_p7 = scmp.ne.s32.totalorder %s3448_s27, %s4345_s28  ;;  %p4351_p9 = scmp.lt.s32.totalorder %s4345_s28, %s4345_s28 }
  0x62   :  { %3676 = vmatpush3.bf16.msra.mxu0 %v459_v30  ;;  %3660 = vmatpush3.bf16.msra.mxu1 %v3839_v38  ;;  %vm3054_vm15 = vcmask 1041409   ;;  %vm3056_vm0 = vcmask 1042434   ;;  %vm3058_vm1 = vcmask 1043459   ;;  %vm3060_vm2 = vcmask 1044484  }
  0x63   :  { %3661 = vmatprep.subr.bf16.mxu1 %v3840_v39  ;;  %p4352_p10 = por %p4351_p9, %p4350_p8 }
  0x64   :  { %380 = vbcast.lane.b32.xlu1 %v378_v22, 256  ;;  %366 = vbcast.lane.b32.xlu0 %v364_v23, 256 }
  0x65   :  { %p4353_p11 = pnand %p4352_p10, %p4346_p7 }
  0x66   :  { %3656 = vmatmul.mubr.msk.bf16.gmra.mxu0 %vm145_vm3, %v140_v37  ;;  %3662 = vmatpush3.bf16.msra.mxu1 %v3840_v39  ;;  %vm3062_vm3 = vcmask 1045509  }
  0x67   :  { %3663 = vmatprep.subr.bf16.mxu1 %v3841_v40 }
  0x68   :  { %394 = vbcast.lane.b32.xlu1 %v392_v31, 256  ;;  %387 = vbcast.lane.b32.xlu0 %v385_v32, 256 }
  0x6a   :  { %3664 = vmatpush3.bf16.msra.mxu1 %v3841_v40 }
  0x6b   :  { %3665 = vmatprep.subr.bf16.mxu1 %v3842_v41 }
  0x6c   :  { %408 = vbcast.lane.b32.xlu1 %v406_v35, 256  ;;  %401 = vbcast.lane.b32.xlu0 %v399_v36, 256 }
  0x6e   :  { %3666 = vmatpush3.bf16.msra.mxu1 %v3842_v41  ;;  %v3845_v41 = vld [vmem:[%s5555_s7 + $0x18] sm:$0xff]  }
  0x6f   :  { %3685 = vmatprep.subr.bf16.mxu1 %v3843_v13 }
  0xd2   :  { %v374_v43 = vpop.permute.xlu1 %373  ;;  %v360_v44 = vpop.permute.xlu0 %359 }
  0xd3   :  { %vm414_vm4 = vcmp.eq.s32.totalorder %v374_v43, %v4561_v42  ;;  %vm412_vm5 = vcmp.eq.s32.totalorder %v360_v44, %v4561_v42 }
  0xd4   :  { %v3476_v48 = vsel %vm414_vm4, 1.0, %v4388_v47  ;;  %v3474_v49 = vsel %vm412_vm5, 1.0, %v4388_v47  ;;  %vm3064_vm4 = vcmask 1046534   ;;  %vm3066_vm5 = vcmask 1047559  }
  0xd6   :  { %v381_v45 = vpop.permute.xlu1 %380  ;;  %v367_v46 = vpop.permute.xlu0 %366 }
  0xd7   :  { %vm415_vm6 = vcmp.eq.s32.totalorder %v381_v45, %v4561_v42  ;;  %vm413_vm7 = vcmp.eq.s32.totalorder %v367_v46, %v4561_v42 }
  0xd8   :  { %v3477_v50 = vsel %vm415_vm6, 1.0, %v4388_v47  ;;  %v3475_v51 = vsel %vm413_vm7, 1.0, %v4388_v47  ;;  %vm3324_vm6 = vcmask 64512  }
  0xd9   :  { %v438_v52 = vpack.c.bf16 %v3477_v50, %v3476_v48  ;;  %v437_v53 = vpack.c.bf16 %v3475_v51, %v3474_v49 }
  0xda   :  { %v395_v54 = vpop.permute.xlu1 %394  ;;  %v388_v55 = vpop.permute.xlu0 %387 }
  0xdb   :  { %vm417_vm9 = vcmp.eq.s32.totalorder %v395_v54, %v4561_v42  ;;  %vm416_vm10 = vcmp.eq.s32.totalorder %v388_v55, %v4561_v42  ;;  %3677 = vmatprep.mubr.msk.bf16.mxu0 %vm441_vm8, %v437_v53 }
  0xdc   :  { %v3479_v56 = vsel %vm417_vm9, 1.0, %v4388_v47  ;;  %v3478_v57 = vsel %vm416_vm10, 1.0, %v4388_v47  ;;  %3678 = vmatmul.mubr.msk.bf16.vlgmr.msra.gmra.mxu0 %vm441_vm8, %v438_v52 }
  0xdd   :  { %v439_v58 = vpack.c.bf16 %v3479_v56, %v3478_v57  ;;  %v3846_v57 = vld [vmem:[%s5555_s7 + $0x10] sm:$0xff]  }
  0xde   :  { %v409_v59 = vpop.permute.xlu1 %408  ;;  %v402_v60 = vpop.permute.xlu0 %401 }
  0xdf   :  { %vm419_vm11 = vcmp.eq.s32.totalorder %v409_v59, %v4561_v42  ;;  %vm418_vm12 = vcmp.eq.s32.totalorder %v402_v60, %v4561_v42  ;;  %3681 = vmatprep.mubr.msk.bf16.mxu0 %vm441_vm8, %v439_v58 }
  0xe0   :  { %v3481_v61 = vsel %vm419_vm11, 1.0, %v4388_v47  ;;  %v3480_v62 = vsel %vm418_vm12, 1.0, %v4388_v47 }
  0xe1   :  { %v440_v63 = vpack.c.bf16 %v3481_v61, %v3480_v62  ;;  %v3847_v61 = vld [vmem:[%s5555_s7 + $0x8] sm:$0xff]  }
  0xe4   :  { %3682 = vmatmul.mubr.msk.bf16.gmra.mxu0 %vm441_vm8, %v440_v63 }
 0x11e   :  { %v3653_v5 = vpop.f32.mrf.mxu0 }
 0x11f   :  { %v205_v8 = vadd.f32 %v3653_v5, %v144_v4  ;;  %v3848_v5 = vld [vmem:[%s5555_s7] sm:$0xff]  }
 0x120   :  { %v196_v9 = vpop.f32.mrf.mxu0 }
 0x121   :  { %v197_v10 = vadd.f32 %v196_v9, %v144_v4  ;;  %3859 = vtanh.f32 %v205_v8  ;;  %v250_v8 = vrot.slane %v4575_v0, %v4497_v7 }
 0x122   :  { %v3654_v11 = vpop.f32.mrf.mxu0 }
 0x123   :  { %v208_v12 = vadd.f32 %v3654_v11, %v144_v4  ;;  %3861 = vtanh.f32 %v197_v10 }
 0x124   :  { %v199_v14 = vpop.f32.mrf.mxu0 }
 0x125   :  { %3863 = vtanh.f32 %v208_v12  ;;  %v200_v15 = vadd.f32 %v199_v14, %v144_v4 }
 0x126   :  { %v3657_v19 = vpop.f32.mrf.mxu0 }
 0x127   :  { %3865 = vtanh.f32 %v200_v15  ;;  %v221_v20 = vadd.f32 %v3657_v19, %v144_v4  ;;  %v3849_v15 = vld [vmem:[#allocation13 + $0x8] sm:$0xff]  }
 0x128   :  { %v212_v21 = vpop.f32.mrf.mxu0  ;;  %3697 = vmatprep.subr.bf16.mxu0 %v3849_v15 }
 0x129   :  { %v213_v22 = vadd.f32 %v212_v21, %v144_v4  ;;  %3867 = vtanh.f32 %v221_v20  ;;  %3698 = vmatpush3.bf16.msra.mxu0 %v3849_v15 }
 0x12a   :  { %v3658_v23 = vpop.f32.mrf.mxu0 }
 0x12b   :  { %v224_v25 = vadd.f32 %v3658_v23, %v144_v4  ;;  %3869 = vtanh.f32 %v213_v22  ;;  %v3850_v23 = vld [vmem:[#allocation13] sm:$0xff]  }
 0x12c   :  { %v215_v26 = vpop.f32.mrf.mxu0  ;;  %3699 = vmatprep.subr.bf16.mxu0 %v3850_v23 }
 0x12d   :  { %3871 = vtanh.f32 %v224_v25  ;;  %v216_v27 = vadd.f32 %v215_v26, %v144_v4  ;;  %3700 = vmatpush3.bf16.msra.mxu0 %v3850_v23 }
 0x12e   :  { %v3860_v28 = vpop.eup %3859 }
 0x12f   :  { %3873 = vtanh.f32 %v216_v27 }
 0x130   :  { %v3862_v29 = vpop.eup %3861 }
 0x132   :  { %v3864_v30 = vpop.eup %3863 }
 0x133   :  { %v244_v32 = vpack.c.bf16 %v3864_v30, %v3860_v28 }
 0x134   :  { %v3866_v31 = vpop.eup %3865 }
 0x135   :  { %v243_v33 = vpack.c.bf16 %v3866_v31, %v3862_v29 }
 0x136   :  { %v3868_v35 = vpop.eup %3867 }
 0x137   :  { %3667 = vmatprep.mubr.msk.bf16.mxu1 %vm275_vm13, %v243_v33 }
 0x138   :  { %3668 = vmatmul.mubr.msk.bf16.vlgmr.msra.gmra.mxu1 %vm275_vm13, %v244_v32  ;;  %v3870_v36 = vpop.eup %3869 }
 0x139   :  { %3686 = vmatpush3.bf16.msra.mxu1 %v3843_v13 }
 0x13a   :  { %v3872_v37 = vpop.eup %3871  ;;  %3687 = vmatprep.subr.bf16.mxu1 %v3844_v34 }
 0x13b   :  { %v246_v39 = vpack.c.bf16 %v3872_v37, %v3868_v35 }
 0x13c   :  { %v3874_v38 = vpop.eup %3873 }
 0x13d   :  { %v245_v40 = vpack.c.bf16 %v3874_v38, %v3870_v36  ;;  %3688 = vmatpush3.bf16.msra.mxu1 %v3844_v34 }
 0x13e   :  { %3709 = vmatprep.subr.bf16.mxu1 %v3845_v41 }
 0x13f   :  { %3671 = vmatprep.mubr.msk.bf16.mxu1 %vm275_vm13, %v245_v40 }
 0x140   :  { %3672 = vmatmul.mubr.msk.bf16.gmra.mxu1 %vm275_vm13, %v246_v39 }
 0x19c   :  { %v3679_v43 = vpop.f32.mrf.mxu0 }
 0x19e   :  { %v495_v44 = vpop.f32.mrf.mxu0 }
 0x19f   :  { %3875 = vtanh.f32 %v495_v44 }
 0x1a0   :  { %v3680_v45 = vpop.f32.mrf.mxu0 }
 0x1a1   :  { %3877 = vtanh.f32 %v3680_v45  ;;  %v545_v45 = vrot.slane %v4575_v0, %v4491_v3 }
 0x1a2   :  { %v498_v46 = vpop.f32.mrf.mxu0 }
 0x1a3   :  { %3879 = vtanh.f32 %v498_v46 }
 0x1a4   :  { %3881 = vtanh.f32 %v3679_v43  ;;  %v3683_v47 = vpop.f32.mrf.mxu0 }
 0x1a5   :  { %3883 = vtanh.f32 %v3683_v47 }
 0x1a6   :  { %v511_v48 = vpop.f32.mrf.mxu0 }
 0x1a7   :  { %3885 = vtanh.f32 %v511_v48 }
 0x1a8   :  { %v3684_v49 = vpop.f32.mrf.mxu0 }
 0x1a9   :  { %3887 = vtanh.f32 %v3684_v49 }
 0x1aa   :  { %v514_v50 = vpop.f32.mrf.mxu0 }
 0x1ab   :  { %3889 = vtanh.f32 %v514_v50 }
 0x1ac   :  { %v3876_v51 = vpop.eup %3875 }
 0x1ae   :  { %v3878_v52 = vpop.eup %3877 }
 0x1b0   :  { %v3880_v53 = vpop.eup %3879 }
 0x1b1   :  { %v3882_v54 = vpop.eup %3881  ;;  %v538_v55 = vpack.c.bf16 %v3880_v53, %v3876_v51 }
 0x1b2   :  { %v539_v56 = vpack.c.bf16 %v3878_v52, %v3882_v54  ;;  %v3884_v58 = vpop.eup %3883 }
 0x1b3   :  { %3689 = vmatprep.mubr.msk.bf16.mxu1 %vm558_vm14, %v538_v55 }
 0x1b4   :  { %3690 = vmatmul.mubr.msk.bf16.vlgmr.msra.gmra.mxu1 %vm558_vm14, %v539_v56  ;;  %v3886_v59 = vpop.eup %3885 }
 0x1b5   :  { %3710 = vmatpush3.bf16.msra.mxu1 %v3845_v41 }
 0x1b6   :  { %v3888_v60 = vpop.eup %3887  ;;  %3711 = vmatprep.subr.bf16.mxu1 %v3846_v57 }
 0x1b7   :  { %v541_v63 = vpack.c.bf16 %v3888_v60, %v3884_v58 }
 0x1b8   :  { %v3890_v62 = vpop.eup %3889 }
 0x1b9   :  { %v540_v4 = vpack.c.bf16 %v3890_v62, %v3886_v59  ;;  %3712 = vmatpush3.bf16.msra.mxu1 %v3846_v57 }
 0x1ba   :  { %3713 = vmatprep.subr.bf16.mxu1 %v3847_v61 }
 0x1bb   :  { %3693 = vmatprep.mubr.msk.bf16.mxu1 %vm558_vm14, %v540_v4 }
 0x1bc   :  { %3694 = vmatmul.mubr.msk.bf16.gmra.mxu1 %vm558_vm14, %v541_v63 }
 0x1bd   :  { %3714 = vmatpush3.bf16.msra.mxu1 %v3847_v61 }
 0x1be   :  { %3715 = vmatprep.subr.bf16.mxu1 %v3848_v5 }
 0x1c1   :  { %3716 = vmatpush3.bf16.msra.mxu1 %v3848_v5 }
 0x1f8   :  { %v3669_v9 = vpop.f32.mrf.mxu1 }
 0x1f9   :  { %v331_v10 = vadd.f32 %v3669_v9, %v250_v8 }
 0x1fa   :  { %v322_v11 = vpop.f32.mrf.mxu1 }
 0x1fb   :  { %v323_v12 = vadd.f32 %v322_v11, %v250_v8  ;;  %3891 = vtanh.f32 %v331_v10 }
 0x1fc   :  { %v3670_v13 = vpop.f32.mrf.mxu1 }
 0x1fd   :  { %v334_v14 = vadd.f32 %v3670_v13, %v250_v8  ;;  %3893 = vtanh.f32 %v323_v12 }
 0x1fe   :  { %v325_v19 = vpop.f32.mrf.mxu1 }
 0x1ff   :  { %3895 = vtanh.f32 %v334_v14  ;;  %v326_v20 = vadd.f32 %v325_v19, %v250_v8 }
 0x200   :  { %v3673_v21 = vpop.f32.mrf.mxu1 }
 0x201   :  { %3897 = vtanh.f32 %v326_v20  ;;  %v347_v22 = vadd.f32 %v3673_v21, %v250_v8 }
 0x202   :  { %v338_v25 = vpop.f32.mrf.mxu1 }
 0x203   :  { %v339_v26 = vadd.f32 %v338_v25, %v250_v8  ;;  %3899 = vtanh.f32 %v347_v22 }
 0x204   :  { %v3674_v27 = vpop.f32.mrf.mxu1 }
 0x205   :  { %v350_v28 = vadd.f32 %v3674_v27, %v250_v8  ;;  %3901 = vtanh.f32 %v339_v26 }
 0x206   :  { %v341_v29 = vpop.f32.mrf.mxu1 }
 0x207   :  { %3903 = vtanh.f32 %v350_v28  ;;  %v342_v30 = vadd.f32 %v341_v29, %v250_v8 }
 0x208   :  { %v3892_v31 = vpop.eup %3891 }
 0x209   :  { %3905 = vtanh.f32 %v342_v30 }
 0x20a   :  { %v3894_v32 = vpop.eup %3893 }
 0x20c   :  { %v3896_v33 = vpop.eup %3895 }
 0x20d   :  { %v661_v35 = vpack.c.bf16 %v3896_v33, %v3892_v31 }
 0x20e   :  { %v3898_v34 = vpop.eup %3897 }
 0x20f   :  { %v660_v36 = vpack.c.bf16 %v3898_v34, %v3894_v32  ;;  %v3851_v32 = vld [vmem:[%s5557_s9 + $0x38] sm:$0xff]  }
 0x210   :  { %v3900_v37 = vpop.eup %3899  ;;  %3725 = vmatprep.subr.bf16.mxu0 %v3851_v32  ;;  %3813 = vmatprep.subr.bf16.mxu1 %v3851_v32 }
 0x211   :  { %3717 = vmatprep.mubr.msk.bf16.mxu1 %vm275_vm13, %v660_v36 }
 0x212   :  { %3718 = vmatmul.mubr.msk.bf16.vlgmr.msra.gmra.mxu1 %vm275_vm13, %v661_v35  ;;  %v3902_v38 = vpop.eup %3901 }
 0x213   :  { %3817 = vmatpush3.bf16.msra.mxu1 %v3851_v32 }
 0x214   :  { %v3904_v39 = vpop.eup %3903 }
 0x215   :  { %v663_v41 = vpack.c.bf16 %v3904_v39, %v3900_v37  ;;  %v3852_v37 = vld [vmem:[%s5557_s9 + $0x30] sm:$0xff]  }
 0x216   :  { %v3906_v40 = vpop.eup %3905  ;;  %3814 = vmatprep.subr.bf16.mxu1 %v3852_v37 }
 0x217   :  { %v662_v43 = vpack.c.bf16 %v3906_v40, %v3902_v38  ;;  %3818 = vmatpush3.bf16.msra.mxu1 %v3852_v37 }
 0x219   :  { %3721 = vmatprep.mubr.msk.bf16.mxu1 %vm275_vm13, %v662_v43 }
 0x21a   :  { %3722 = vmatmul.mubr.msk.bf16.gmra.mxu1 %vm275_vm13, %v663_v41 }
 0x274   :  { %v3691_v44 = vpop.f32.mrf.mxu1 }
 0x275   :  { %v614_v50 = vadd.f32 %v3691_v44, %v545_v45  ;;  %v3853_v44 = vld [vmem:[%s5557_s9 + $0x28] sm:$0xff]  }
 0x276   :  { %v605_v46 = vpop.f32.mrf.mxu1  ;;  %3815 = vmatprep.subr.bf16.mxu1 %v3853_v44 }
 0x277   :  { %v606_v47 = vadd.f32 %v605_v46, %v545_v45  ;;  %v3854_v46 = vld [vmem:[%s5557_s9 + $0x20] sm:$0xff]   ;;  %3819 = vmatpush3.bf16.msra.mxu1 %v3853_v44 }
 0x278   :  { %v3692_v48 = vpop.f32.mrf.mxu1  ;;  %3816 = vmatprep.subr.bf16.mxu1 %v3854_v46 }
 0x279   :  { %v617_v49 = vadd.f32 %v3692_v48, %v545_v45  ;;  %3907 = vtanh.f32 %v606_v47  ;;  %v2216_v48 = vld [vmem:[#allocation7] sm:$0xff] }
 0x27a   :  { %v608_v51 = vpop.f32.mrf.mxu1 }
 0x27b   :  { %v609_v52 = vadd.f32 %v608_v51, %v545_v45  ;;  %3909 = vtanh.f32 %v617_v49  ;;  %3820 = vmatpush3.bf16.msra.mxu1 %v3854_v46  ;;  %v2220_v49 = vrot.slane %v2216_v48, %v4488_v2  ;;  %v2234_v51 = vrot.slane %v2216_v48, %v4491_v3 }
 0x27c   :  { %v3695_v53 = vpop.f32.mrf.mxu1  ;;  %v4666_v3 = vrot.slane %v4575_v0, %v4494_v6 }
 0x27d   :  { %3911 = vtanh.f32 %v609_v52  ;;  %v630_v54 = vadd.f32 %v3695_v53, %v545_v45  ;;  %v2241_v52 = vrot.slane %v2216_v48, %v4494_v6  ;;  %v4389_v53 = vmov 1966171168  }
 0x27e   :  { %3913 = vtanh.f32 %v614_v50  ;;  %v621_v55 = vpop.f32.mrf.mxu1  ;;  %v2227_v50 = vrot.slane %v2216_v48, %v4497_v7  ;;  %v2269_v7 = vrot.slane %v2216_v48, %v405_v18 }
 0x27f   :  { %v622_v56 = vadd.f32 %v621_v55, %v545_v45  ;;  %3915 = vtanh.f32 %v630_v54  ;;  %v924_v54 = vunpack.c.l.s4 %v4389_v53  ;;  %v2248_v55 = vrot.slane %v2216_v48, %v4515_v17 }
 0x280   :  { %v3696_v57 = vpop.f32.mrf.mxu1 }
 0x281   :  { %v633_v58 = vadd.f32 %v3696_v57, %v545_v45  ;;  %3917 = vtanh.f32 %v622_v56  ;;  %v2255_v56 = vrot.slane %v2216_v48, %v4512_v16  ;;  %v925_v57 = vunpack.c.0.s8 %v924_v54 }
 0x282   :  { %v624_v59 = vpop.f32.mrf.mxu1 }
 0x283   :  { %3919 = vtanh.f32 %v633_v58  ;;  %v625_v60 = vadd.f32 %v624_v59, %v545_v45  ;;  %v2262_v58 = vrot.slane %v2216_v48, %v4530_v24 }
 0x285   :  { %3921 = vtanh.f32 %v625_v60  ;;  %v4671_v60 = vsub.s32 %v925_v57, %v4485_v1 }
 0x286   :  { %v3908_v61 = vpop.eup %3907 }
 0x288   :  { %v3910_v62 = vpop.eup %3909 }
 0x28a   :  { %v3912_v63 = vpop.eup %3911 }
 0x28b   :  { %v3914_v4 = vpop.eup %3913  ;;  %v668_v5 = vpack.c.bf16 %v3912_v63, %v3908_v61 }
 0x28c   :  { %v669_v8 = vpack.c.bf16 %v3910_v62, %v3914_v4  ;;  %v3916_v9 = vpop.eup %3915 }
 0x28d   :  { %3701 = vmatprep.mubr.msk.bf16.mxu0 %vm558_vm14, %v668_v5 }
 0x28e   :  { %3702 = vmatmul.mubr.msk.bf16.vlgmr.msra.gmra.mxu0 %vm558_vm14, %v669_v8  ;;  %v3918_v10 = vpop.eup %3917 }
 0x28f   :  { %3726 = vmatpush3.bf16.msra.mxu0 %v3851_v32 }
 0x290   :  { %v3920_v11 = vpop.eup %3919  ;;  %3727 = vmatprep.subr.bf16.mxu0 %v3852_v37 }
 0x291   :  { %v671_v13 = vpack.c.bf16 %v3920_v11, %v3916_v9 }
 0x292   :  { %v3922_v12 = vpop.eup %3921 }
 0x293   :  { %v670_v14 = vpack.c.bf16 %v3922_v12, %v3918_v10  ;;  %3728 = vmatpush3.bf16.msra.mxu0 %v3852_v37 }
 0x294   :  { %3729 = vmatprep.subr.bf16.mxu0 %v3853_v44 }
 0x295   :  { %3705 = vmatprep.mubr.msk.bf16.mxu0 %vm558_vm14, %v670_v14 }
 0x296   :  { %3706 = vmatmul.mubr.msk.bf16.gmra.mxu0 %vm558_vm14, %v671_v13 }
 0x297   :  { %3730 = vmatpush3.bf16.msra.mxu0 %v3853_v44 }
 0x298   :  { %3731 = vmatprep.subr.bf16.mxu0 %v3854_v46 }
 0x29b   :  { %3732 = vmatpush3.bf16.msra.mxu0 %v3854_v46 }
 0x2d2   :  { %v3719_v15 = vpop.f32.mrf.mxu1 }
 0x2d4   :  { %v831_v19 = vpop.f32.mrf.mxu1 }
 0x2d6   :  { %v3720_v20 = vpop.f32.mrf.mxu1 }
 0x2d8   :  { %v834_v21 = vpop.f32.mrf.mxu1 }
 0x2da   :  { %v3723_v23 = vpop.f32.mrf.mxu1 }
 0x2dc   :  { %v847_v28 = vpop.f32.mrf.mxu1 }
 0x2de   :  { %v3724_v34 = vpop.f32.mrf.mxu1 }
 0x2e0   :  { %v850_v39 = vpop.f32.mrf.mxu1 }
 0x34e   :  { %v3703_v22 = vpop.f32.mrf.mxu0 }
 0x34f   :  { %v4615_v30 = vadd.f32 %v3719_v15, %v3703_v22 }
 0x350   :  { %v730_v25 = vpop.f32.mrf.mxu0 }
 0x351   :  { %v4611_v26 = vadd.f32 %v831_v19, %v730_v25 }
 0x352   :  { %v3704_v27 = vpop.f32.mrf.mxu0 }
 0x353   :  { %870 = vrot.lane.b32.xlu0 %v4611_v26, %s4382_s3  ;;  %v4626_v36 = vadd.f32 %v3720_v20, %v3704_v27 }
 0x354   :  { %v733_v29 = vpop.f32.mrf.mxu0 }
 0x355   :  { %v4617_v31 = vadd.f32 %v834_v21, %v733_v29 }
 0x356   :  { %v3707_v33 = vpop.f32.mrf.mxu0 }
 0x357   :  { %872 = vrot.lane.b32.xlu1 %v4617_v31, %s4382_s3  ;;  %874 = vrot.lane.b32.xlu0 %v4615_v30, %s4382_s3  ;;  %v4644_v45 = vadd.f32 %v3723_v23, %v3707_v33 }
 0x358   :  { %v746_v35 = vpop.f32.mrf.mxu0 }
 0x359   :  { %v4633_v41 = vadd.f32 %v847_v28, %v746_v35 }
 0x35a   :  { %v3708_v38 = vpop.f32.mrf.mxu0 }
 0x35b   :  { %876 = vrot.lane.b32.xlu0 %v4626_v36, %s4382_s3  ;;  %v4651_v47 = vadd.f32 %v3724_v34, %v3708_v38 }
 0x35c   :  { %v749_v40 = vpop.f32.mrf.mxu0 }
 0x35d   :  { %v4635_v43 = vadd.f32 %v850_v39, %v749_v40 }
 0x35f   :  { %880 = vrot.lane.b32.xlu1 %v4635_v43, %s4382_s3  ;;  %878 = vrot.lane.b32.xlu0 %v4633_v41, %s4382_s3 }
 0x363   :  { %882 = vrot.lane.b32.xlu1 %v4644_v45, %s4382_s3  ;;  %2222 = vbcast.lane.b32.xlu0 %v2220_v49, 256 }
 0x367   :  { %884 = vrot.lane.b32.xlu1 %v4651_v47, %s4382_s3  ;;  %2236 = vbcast.lane.b32.xlu0 %v2234_v51, 256 }
 0x36b   :  { %2229 = vbcast.lane.b32.xlu1 %v2227_v50, 256  ;;  %2250 = vbcast.lane.b32.xlu0 %v2248_v55, 256 }
 0x36f   :  { %2243 = vbcast.lane.b32.xlu1 %v2241_v52, 256  ;;  %2264 = vbcast.lane.b32.xlu0 %v2262_v58, 256 }
 0x373   :  { %2257 = vbcast.lane.b32.xlu1 %v2255_v56, 256 }
 0x377   :  { %2271 = vbcast.lane.b32.xlu1 %v2269_v7, 256 }
 0x3c5   :  { %v4668_v59 = vpop.permute.xlu0 %870 }
 0x3c6   :  { %v894_v61 = vsub.f32 %v4611_v26, %v4668_v59 }
 0x3c8   :  { %v906_v62 = vadd.f32 %v4666_v3, %v894_v61 }
 0x3c9   :  { %v4676_v63 = vpop.permute.xlu1 %872  ;;  %v4678_v4 = vpop.permute.xlu0 %874 }
 0x3ca   :  { %v922_v18 = vcombine.high %v906_v62, %v906_v62  ;;  %v929_v6 = vrot.slane %v906_v62, %v4671_v60  ;;  %v895_v0 = vsub.f32 %v4617_v31, %v4676_v63  ;;  %v896_v5 = vsub.f32 %v4615_v30, %v4678_v4 }
 0x3cc   :  { %v937_v8 = vcombine.high %v929_v6, %v929_v6  ;;  %v945_v9 = vrot.slane %v929_v6, %v4671_v60  ;;  %v4687_v10 = vadd.f32 %v4666_v3, %v895_v0  ;;  %v4690_v11 = vadd.f32 %v4666_v3, %v896_v5 }
 0x3cd   :  { %v4692_v12 = vpop.permute.xlu0 %876  ;;  %v936_v13 = vrot.slane %v922_v18, %v4671_v60 }
 0x3ce   :  { %v959_v14 = vrot.slane %v937_v8, %v4671_v60  ;;  %v967_v15 = vcombine.high %v945_v9, %v945_v9  ;;  %v971_v19 = vcombine.high %v4687_v10, %v4687_v10  ;;  %v1020_v20 = vcombine.high %v4690_v11, %v4690_v11 }
 0x3cf   :  { %v897_v21 = vsub.f32 %v4626_v36, %v4692_v12  ;;  %v1317_v22 = vrot.slane %v945_v9, %v4488_v2  ;;  %v938_v23 = vcombine.high %v936_v13, %v936_v13  ;;  %v952_v25 = vrot.slane %v936_v13, %v4671_v60 }
 0x3d0   :  { %v969_v26 = vcombine.high %v959_v14, %v959_v14  ;;  %v1325_v27 = vrot.slane %v967_v15, %v4488_v2  ;;  %v1321_v28 = vrot.slane %v959_v14, %v4488_v2  ;;  %v978_v29 = vrot.slane %v4687_v10, %v4671_v60 }
 0x3d1   :  { %v4709_v30 = vadd.f32 %v4666_v3, %v897_v21  ;;  %v4711_v31 = vpop.permute.xlu1 %880  ;;  %v4713_v32 = vpop.permute.xlu0 %878  ;;  %v1634_v33 = vadd.f32 %v1317_v22, %v4668_v59  ;;  %v966_v34 = vrot.slane %v938_v23, %v4671_v60  ;;  %v1333_v35 = vrot.slane %v952_v25, %v4488_v2 }
 0x3d2   :  { %v1329_v36 = vrot.slane %v969_v26, %v4488_v2  ;;  %v1636_v37 = vadd.f32 %v1325_v27, %v4668_v59  ;;  %v899_v38 = vsub.f32 %v4635_v43, %v4711_v31  ;;  %v898_v39 = vsub.f32 %v4633_v41, %v4713_v32 }
 0x3d3   :  { %v1069_v40 = vcombine.high %v4709_v30, %v4709_v30  ;;  %v1635_v44 = vadd.f32 %v1321_v28, %v4668_v59  ;;  %3923 = vtanh.f32 %v1634_v33  ;;  %v1337_v46 = vrot.slane %v966_v34, %v4488_v2 }
 0x3d4   :  { %v1637_v48 = vadd.f32 %v1329_v36, %v4668_v59  ;;  %3925 = vtanh.f32 %v1636_v37  ;;  %v911_v49 = vadd.f32 %v4666_v3, %v899_v38  ;;  %v4731_v50 = vadd.f32 %v4666_v3, %v898_v39 }
 0x3d5   :  { %v4733_v43 = vpop.permute.xlu1 %882  ;;  %3927 = vtanh.f32 %v1635_v44  ;;  %v1638_v41 = vadd.f32 %v1333_v35, %v4668_v59  ;;  %v1639_v51 = vadd.f32 %v1337_v46, %v4668_v59  ;;  %v968_v52 = vcombine.high %v952_v25, %v952_v25 }
 0x3d6   :  { %3929 = vtanh.f32 %v1637_v48  ;;  %v1167_v53 = vcombine.high %v911_v49, %v911_v49  ;;  %v1174_v54 = vrot.slane %v911_v49, %v4671_v60  ;;  %v1118_v55 = vcombine.high %v4731_v50, %v4731_v50 }
 0x3d7   :  { %v900_v56 = vsub.f32 %v4644_v45, %v4733_v43  ;;  %3931 = vtanh.f32 %v1638_v41  ;;  %v970_v57 = vcombine.high %v966_v34, %v966_v34  ;;  %v1341_v58 = vrot.slane %v968_v52, %v4488_v2 }
 0x3d8   :  { %v1182_v7 = vcombine.high %v1174_v54, %v1174_v54  ;;  %v1190_v61 = vrot.slane %v1174_v54, %v4671_v60  ;;  %3933 = vtanh.f32 %v1639_v51  ;;  %v986_v62 = vcombine.high %v978_v29, %v978_v29 }
 0x3d9   :  { %v4745_v18 = vadd.f32 %v4666_v3, %v900_v56  ;;  %v4747_v6 = vpop.permute.xlu1 %884  ;;  %v1345_v0 = vrot.slane %v970_v57, %v4488_v2  ;;  %v1640_v5 = vadd.f32 %v1341_v58, %v4668_v59  ;;  %v994_v45 = vrot.slane %v978_v29, %v4671_v60 }
 0x3da   :  { %v1204_v8 = vrot.slane %v1182_v7, %v4671_v60  ;;  %v1212_v9 = vcombine.high %v1190_v61, %v1190_v61  ;;  %v901_v13 = vsub.f32 %v4651_v47, %v4747_v6  ;;  %v1008_v14 = vrot.slane %v986_v62, %v4671_v60 }
 0x3db   :  { %v1216_v15 = vcombine.high %v4745_v18, %v4745_v18  ;;  %v1641_v21 = vadd.f32 %v1345_v0, %v4668_v59  ;;  %3935 = vtanh.f32 %v1640_v5  ;;  %v1349_v22 = vrot.slane %v994_v45, %v4488_v2 }
 0x3dc   :  { %v1214_v23 = vcombine.high %v1204_v8, %v1204_v8  ;;  %v1485_v25 = vrot.slane %v1212_v9, %v4488_v2  ;;  %v4762_v26 = vadd.f32 %v4666_v3, %v901_v13  ;;  %v1353_v27 = vrot.slane %v1008_v14, %v4488_v2 }
 0x3dd   :  { %3937 = vtanh.f32 %v1641_v21  ;;  %v1642_v47 = vadd.f32 %v1349_v22, %v4676_v63  ;;  %v1477_v28 = vrot.slane %v1190_v61, %v4488_v2  ;;  %v1481_v29 = vrot.slane %v1204_v8, %v4488_v2 }
 0x3de   :  { %v1489_v59 = vrot.slane %v1214_v23, %v4488_v2  ;;  %v1676_v33 = vadd.f32 %v1485_v25, %v4711_v31  ;;  %v1265_v34 = vcombine.high %v4762_v26, %v4762_v26  ;;  %v1643_v35 = vadd.f32 %v1353_v27, %v4676_v63 }
 0x3df   :  { %3939 = vtanh.f32 %v1642_v47  ;;  %v1674_v3 = vadd.f32 %v1477_v28, %v4711_v31  ;;  %v1675_v36 = vadd.f32 %v1481_v29, %v4711_v31  ;;  %v1181_v37 = vrot.slane %v1167_v53, %v4671_v60 }
 0x3e0   :  { %v3924_v38 = vpop.eup %3923  ;;  %v1677_v39 = vadd.f32 %v1489_v59, %v4711_v31  ;;  %3941 = vtanh.f32 %v1676_v33  ;;  %v1016_v44 = vcombine.high %v994_v45, %v994_v45  ;;  %v1018_v46 = vcombine.high %v1008_v14, %v1008_v14 }
 0x3e1   :  { %v3926_v48 = vpop.eup %3925  ;;  %3943 = vtanh.f32 %v1643_v35  ;;  %v1183_v49 = vcombine.high %v1181_v37, %v1181_v37  ;;  %v1197_v41 = vrot.slane %v1181_v37, %v4671_v60  ;;  %v985_v51 = vrot.slane %v971_v19, %v4671_v60 }
 0x3e2   :  { %v3928_v52 = vpop.eup %3927  ;;  %3945 = vtanh.f32 %v1677_v39  ;;  %v1357_v53 = vrot.slane %v1016_v44, %v4488_v2  ;;  %v1361_v54 = vrot.slane %v1018_v46, %v4488_v2  ;;  %v1223_v56 = vrot.slane %v4745_v18, %v4671_v60 }
 0x3e3   :  { %v3930_v57 = vpop.eup %3929  ;;  %v1771_v58 = vpack.c.bf16 %v3928_v52, %v3924_v38  ;;  %3947 = vtanh.f32 %v1674_v3  ;;  %v1211_v7 = vrot.slane %v1183_v49, %v4671_v60  ;;  %v1493_v61 = vrot.slane %v1197_v41, %v4488_v2 }
 0x3e4   :  { %v3932_v62 = vpop.eup %3931  ;;  %v1772_v0 = vpack.c.bf16 %v3930_v57, %v3926_v48  ;;  %3949 = vtanh.f32 %v1675_v36  ;;  %v1644_v10 = vadd.f32 %v1357_v53, %v4676_v63  ;;  %v1645_v19 = vadd.f32 %v1361_v54, %v4676_v63 }
 0x3e5   :  { %v3934_v5 = vpop.eup %3933  ;;  %3733 = vmatprep.mubr.msk.bf16.mxu0 %vm275_vm13, %v1771_v58  ;;  %v1497_v45 = vrot.slane %v1211_v7, %v4488_v2  ;;  %v1678_v8 = vadd.f32 %v1493_v61, %v4711_v31  ;;  %v987_v9 = vcombine.high %v985_v51, %v985_v51  ;;  %v1001_v13 = vrot.slane %v985_v51, %v4671_v60 }
 0x3e6   :  { %3734 = vmatmul.mubr.msk.bf16.vlgmr.msra.gmra.mxu0 %vm275_vm13, %v1772_v0  ;;  %v1773_v14 = vpack.c.bf16 %v3934_v5, %v3932_v62  ;;  %3951 = vtanh.f32 %v1644_v10  ;;  %v1213_v21 = vcombine.high %v1197_v41, %v1197_v41  ;;  %v1215_v22 = vcombine.high %v1211_v7, %v1211_v7 }
 0x3e7   :  { %v1679_v23 = vadd.f32 %v1497_v45, %v4711_v31  ;;  %3953 = vtanh.f32 %v1678_v8  ;;  %v1015_v25 = vrot.slane %v987_v9, %v4671_v60  ;;  %v1365_v27 = vrot.slane %v1001_v13, %v4488_v2 }
 0x3e8   :  { %v3936_v47 = vpop.eup %3935  ;;  %3737 = vmatprep.mubr.msk.bf16.mxu0 %vm275_vm13, %v1773_v14  ;;  %3955 = vtanh.f32 %v1645_v19  ;;  %v1501_v28 = vrot.slane %v1213_v21, %v4488_v2  ;;  %v1505_v29 = vrot.slane %v1215_v22, %v4488_v2  ;;  %v1231_v59 = vcombine.high %v1223_v56, %v1223_v56 }
 0x3e9   :  { %3957 = vtanh.f32 %v1679_v23  ;;  %v1369_v33 = vrot.slane %v1015_v25, %v4488_v2  ;;  %v1646_v35 = vadd.f32 %v1365_v27, %v4676_v63  ;;  %v1239_v3 = vrot.slane %v1223_v56, %v4671_v60 }
 0x3ea   :  { %v3938_v36 = vpop.eup %3937  ;;  %v1680_v37 = vadd.f32 %v1501_v28, %v4711_v31  ;;  %v1681_v38 = vadd.f32 %v1505_v29, %v4711_v31  ;;  %v1253_v39 = vrot.slane %v1231_v59, %v4671_v60  ;;  %v1017_v44 = vcombine.high %v1001_v13, %v1001_v13 }
 0x3eb   :  { %v1774_v46 = vpack.c.bf16 %v3938_v36, %v3936_v47  ;;  %v1647_v48 = vadd.f32 %v1369_v33, %v4676_v63  ;;  %3959 = vtanh.f32 %v1646_v35  ;;  %v1509_v49 = vrot.slane %v1239_v3, %v4488_v2 }
 0x3ec   :  { %v3940_v41 = vpop.eup %3939  ;;  %3961 = vtanh.f32 %v1680_v37  ;;  %v1513_v51 = vrot.slane %v1253_v39, %v4488_v2  ;;  %v1019_v52 = vcombine.high %v1015_v25, %v1015_v25  ;;  %v1373_v53 = vrot.slane %v1017_v44, %v4488_v2 }
 0x3ed   :  { %v3942_v54 = vpop.eup %3941  ;;  %3963 = vtanh.f32 %v1647_v48  ;;  %v1682_v31 = vadd.f32 %v1509_v49, %v4733_v43  ;;  %v1027_v56 = vrot.slane %v4690_v11, %v4671_v60  ;;  %v1261_v57 = vcombine.high %v1239_v3, %v1239_v3 }
 0x3ee   :  { %v3944_v58 = vpop.eup %3943  ;;  %3738 = vmatmul.mubr.msk.bf16.gmra.mxu0 %vm275_vm13, %v1774_v46  ;;  %3965 = vtanh.f32 %v1681_v38  ;;  %v1683_v7 = vadd.f32 %v1513_v51, %v4733_v43  ;;  %v1377_v61 = vrot.slane %v1019_v52, %v4488_v2  ;;  %v1648_v62 = vadd.f32 %v1373_v53, %v4676_v63 }
 0x3ef   :  { %v3946_v0 = vpop.eup %3945  ;;  %v1775_v10 = vpack.c.bf16 %v3944_v58, %v3940_v41  ;;  %3967 = vtanh.f32 %v1682_v31  ;;  %v1035_v19 = vcombine.high %v1027_v56, %v1027_v56  ;;  %v1043_v5 = vrot.slane %v1027_v56, %v4671_v60 }
 0x3f0   :  { %v3948_v45 = vpop.eup %3947  ;;  %v1792_v8 = vpack.c.bf16 %v3946_v0, %v3942_v54  ;;  %3969 = vtanh.f32 %v1683_v7  ;;  %v1649_v9 = vadd.f32 %v1377_v61, %v4676_v63  ;;  %v1263_v13 = vcombine.high %v1253_v39, %v1253_v39 }
 0x3f1   :  { %v3950_v14 = vpop.eup %3949  ;;  %3741 = vmatprep.mubr.msk.bf16.mxu0 %vm275_vm13, %v1775_v10  ;;  %3971 = vtanh.f32 %v1648_v62  ;;  %v1057_v21 = vrot.slane %v1035_v19, %v4671_v60  ;;  %v1381_v22 = vrot.slane %v1043_v5, %v4488_v2  ;;  %v1517_v23 = vrot.slane %v1261_v57, %v4488_v2 }
 0x3f2   :  { %v1791_v25 = vpack.c.bf16 %v3950_v14, %v3948_v45  ;;  %3973 = vtanh.f32 %v1649_v9  ;;  %v1521_v27 = vrot.slane %v1263_v13, %v4488_v2  ;;  %v1230_v63 = vrot.slane %v1216_v15, %v4671_v60 }
 0x3f3   :  { %v3952_v47 = vpop.eup %3951  ;;  %v1385_v28 = vrot.slane %v1057_v21, %v4488_v2  ;;  %v1650_v29 = vadd.f32 %v1381_v22, %v4678_v4  ;;  %v1684_v59 = vadd.f32 %v1517_v23, %v4733_v43  ;;  %v1065_v33 = vcombine.high %v1043_v5, %v1043_v5 }
 0x3f4   :  { %v3954_v35 = vpop.eup %3953  ;;  %3773 = vmatprep.mubr.msk.bf16.mxu1 %vm275_vm13, %v1791_v25  ;;  %v1685_v3 = vadd.f32 %v1521_v27, %v4733_v43  ;;  %v1232_v36 = vcombine.high %v1230_v63, %v1230_v63  ;;  %v1246_v37 = vrot.slane %v1230_v63, %v4671_v60  ;;  %v1067_v38 = vcombine.high %v1057_v21, %v1057_v21 }
 0x3f5   :  { %v3956_v39 = vpop.eup %3955  ;;  %3774 = vmatmul.mubr.msk.bf16.vlgmr.msra.gmra.mxu1 %vm275_vm13, %v1792_v8  ;;  %v1651_v18 = vadd.f32 %v1385_v28, %v4678_v4  ;;  %3975 = vtanh.f32 %v1650_v29  ;;  %v1389_v15 = vrot.slane %v1065_v33, %v4488_v2  ;;  %v1034_v44 = vrot.slane %v1020_v20, %v4671_v60 }
 0x3f6   :  { %v3958_v46 = vpop.eup %3957  ;;  %v1776_v48 = vpack.c.bf16 %v3956_v39, %v3952_v47  ;;  %3977 = vtanh.f32 %v1684_v59  ;;  %v1260_v49 = vrot.slane %v1232_v36, %v4671_v60  ;;  %v1525_v41 = vrot.slane %v1246_v37, %v4488_v2 }
 0x3f7   :  { %v1793_v51 = vpack.c.bf16 %v3958_v46, %v3954_v35  ;;  %3979 = vtanh.f32 %v1651_v18  ;;  %v1393_v52 = vrot.slane %v1067_v38, %v4488_v2  ;;  %v1652_v53 = vadd.f32 %v1389_v15, %v4678_v4 }
 0x3f8   :  { %v3960_v54 = vpop.eup %3959  ;;  %3742 = vmatmul.mubr.msk.bf16.gmra.mxu0 %vm275_vm13, %v1776_v48  ;;  %3981 = vtanh.f32 %v1685_v3  ;;  %v1529_v11 = vrot.slane %v1260_v49, %v4488_v2  ;;  %v1686_v20 = vadd.f32 %v1525_v41, %v4733_v43  ;;  %v1036_v31 = vcombine.high %v1034_v44, %v1034_v44 }
 0x3f9   :  { %v3962_v56 = vpop.eup %3961  ;;  %3777 = vmatprep.mubr.msk.bf16.mxu1 %vm275_vm13, %v1793_v51  ;;  %v1653_v57 = vadd.f32 %v1393_v52, %v4678_v4  ;;  %3983 = vtanh.f32 %v1652_v53  ;;  %v1050_v58 = vrot.slane %v1034_v44, %v4671_v60  ;;  %v1262_v7 = vcombine.high %v1246_v37, %v1246_v37 }
 0x3fa   :  { %v3964_v61 = vpop.eup %3963  ;;  %v1687_v62 = vadd.f32 %v1529_v11, %v4733_v43  ;;  %3985 = vtanh.f32 %v1686_v20  ;;  %v1064_v0 = vrot.slane %v1036_v31, %v4671_v60  ;;  %v1264_v10 = vcombine.high %v1260_v49, %v1260_v49 }
 0x3fb   :  { %v3966_v19 = vpop.eup %3965  ;;  %v1777_v5 = vpack.c.bf16 %v3964_v61, %v3960_v54  ;;  %3987 = vtanh.f32 %v1653_v57  ;;  %v1397_v45 = vrot.slane %v1050_v58, %v4488_v2  ;;  %v1533_v8 = vrot.slane %v1262_v7, %v4488_v2 }
 0x3fc   :  { %v3968_v9 = vpop.eup %3967  ;;  %v1794_v13 = vpack.c.bf16 %v3966_v19, %v3962_v56  ;;  %3989 = vtanh.f32 %v1687_v62  ;;  %v1401_v14 = vrot.slane %v1064_v0, %v4488_v2  ;;  %v1537_v21 = vrot.slane %v1264_v10, %v4488_v2 }
 0x3fd   :  { %v3970_v22 = vpop.eup %3969  ;;  %3745 = vmatprep.mubr.msk.bf16.mxu0 %vm275_vm13, %v1777_v5  ;;  %v1654_v23 = vadd.f32 %v1397_v45, %v4678_v4  ;;  %v1688_v25 = vadd.f32 %v1533_v8, %v4733_v43  ;;  %v1272_v27 = vrot.slane %v4762_v26, %v4671_v60  ;;  %v1066_v63 = vcombine.high %v1050_v58, %v1050_v58 }
 0x3fe   :  { %v3972_v47 = vpop.eup %3971  ;;  %3778 = vmatmul.mubr.msk.bf16.gmra.mxu1 %vm275_vm13, %v1794_v13  ;;  %v1795_v28 = vpack.c.bf16 %v3970_v22, %v3968_v9  ;;  %v1655_v29 = vadd.f32 %v1401_v14, %v4678_v4  ;;  %v1689_v59 = vadd.f32 %v1537_v21, %v4733_v43  ;;  %v1068_v33 = vcombine.high %v1064_v0, %v1064_v0 }
 0x3ff   :  { %v3974_v35 = vpop.eup %3973  ;;  %3991 = vtanh.f32 %v1654_v23  ;;  %v1280_v3 = vcombine.high %v1272_v27, %v1272_v27  ;;  %v1288_v36 = vrot.slane %v1272_v27, %v4671_v60  ;;  %v1405_v37 = vrot.slane %v1066_v63, %v4488_v2 }
 0x400   :  { %3781 = vmatprep.mubr.msk.bf16.mxu1 %vm275_vm13, %v1795_v28  ;;  %v1778_v38 = vpack.c.bf16 %v3974_v35, %v3972_v47  ;;  %3993 = vtanh.f32 %v1655_v29  ;;  %v1409_v39 = vrot.slane %v1068_v33, %v4488_v2  ;;  %v1076_v18 = vrot.slane %v4709_v30, %v4671_v60 }
 0x401   :  { %3995 = vtanh.f32 %v1688_v25  ;;  %v1302_v43 = vrot.slane %v1280_v3, %v4671_v60  ;;  %v1541_v15 = vrot.slane %v1288_v36, %v4488_v2  ;;  %v1656_v44 = vadd.f32 %v1405_v37, %v4678_v4 }
 0x402   :  { %v3976_v46 = vpop.eup %3975  ;;  %3746 = vmatmul.mubr.msk.bf16.gmra.mxu0 %vm275_vm13, %v1778_v38  ;;  %3997 = vtanh.f32 %v1689_v59  ;;  %v1657_v48 = vadd.f32 %v1409_v39, %v4678_v4  ;;  %v1084_v49 = vcombine.high %v1076_v18, %v1076_v18  ;;  %v1092_v41 = vrot.slane %v1076_v18, %v4671_v60 }
 0x403   :  { %v3978_v51 = vpop.eup %3977  ;;  %v1545_v52 = vrot.slane %v1302_v43, %v4488_v2  ;;  %v1690_v53 = vadd.f32 %v1541_v15, %v4747_v6  ;;  %3999 = vtanh.f32 %v1656_v44  ;;  %v1310_v54 = vcombine.high %v1288_v36, %v1288_v36 }
 0x404   :  { %v3980_v11 = vpop.eup %3979  ;;  %4001 = vtanh.f32 %v1657_v48  ;;  %v1106_v20 = vrot.slane %v1084_v49, %v4671_v60  ;;  %v1413_v31 = vrot.slane %v1092_v41, %v4488_v2  ;;  %v1312_v56 = vcombine.high %v1302_v43, %v1302_v43 }
 0x405   :  { %v3982_v57 = vpop.eup %3981  ;;  %v1779_v58 = vpack.c.bf16 %v3980_v11, %v3976_v46  ;;  %v1691_v4 = vadd.f32 %v1545_v52, %v4747_v6  ;;  %4003 = vtanh.f32 %v1690_v53  ;;  %v1549_v7 = vrot.slane %v1310_v54, %v4488_v2 }
 0x406   :  { %v3984_v61 = vpop.eup %3983  ;;  %v1796_v62 = vpack.c.bf16 %v3982_v57, %v3978_v51  ;;  %v1417_v0 = vrot.slane %v1106_v20, %v4488_v2  ;;  %v1658_v10 = vadd.f32 %v1413_v31, %v4692_v12  ;;  %v1553_v19 = vrot.slane %v1312_v56, %v4488_v2 }
 0x407   :  { %v3986_v5 = vpop.eup %3985  ;;  %3749 = vmatprep.mubr.msk.bf16.mxu0 %vm275_vm13, %v1779_v58  ;;  %4005 = vtanh.f32 %v1691_v4  ;;  %v1692_v45 = vadd.f32 %v1549_v7, %v4747_v6  ;;  %v1279_v8 = vrot.slane %v1265_v34, %v4671_v60  ;;  %v1114_v9 = vcombine.high %v1092_v41, %v1092_v41 }
 0x408   :  { %v3988_v13 = vpop.eup %3987  ;;  %3782 = vmatmul.mubr.msk.bf16.gmra.mxu1 %vm275_vm13, %v1796_v62  ;;  %v1659_v14 = vadd.f32 %v1417_v0, %v4692_v12  ;;  %4007 = vtanh.f32 %v1658_v10  ;;  %v1693_v21 = vadd.f32 %v1553_v19, %v4747_v6  ;;  %v1116_v22 = vcombine.high %v1106_v20, %v1106_v20 }
 0x409   :  { %v3990_v23 = vpop.eup %3989  ;;  %v1780_v25 = vpack.c.bf16 %v3988_v13, %v3984_v61  ;;  %4009 = vtanh.f32 %v1692_v45  ;;  %v1281_v27 = vcombine.high %v1279_v8, %v1279_v8  ;;  %v1295_v63 = vrot.slane %v1279_v8, %v4671_v60 }
 0x40a   :  { %v1797_v47 = vpack.c.bf16 %v3990_v23, %v3986_v5  ;;  %4011 = vtanh.f32 %v1659_v14  ;;  %v1421_v26 = vrot.slane %v1114_v9, %v4488_v2  ;;  %v1425_v34 = vrot.slane %v1116_v22, %v4488_v2 }
 0x40b   :  { %3750 = vmatmul.mubr.msk.bf16.gmra.mxu0 %vm275_vm13, %v1780_v25  ;;  %4013 = vtanh.f32 %v1693_v21  ;;  %v1309_v28 = vrot.slane %v1281_v27, %v4671_v60  ;;  %v1557_v29 = vrot.slane %v1295_v63, %v4488_v2  ;;  %v1083_v59 = vrot.slane %v1069_v40, %v4671_v60 }
 0x40c   :  { %v3992_v33 = vpop.eup %3991  ;;  %3785 = vmatprep.mubr.msk.bf16.mxu1 %vm275_vm13, %v1797_v47  ;;  %v1660_v35 = vadd.f32 %v1421_v26, %v4692_v12  ;;  %v1661_v3 = vadd.f32 %v1425_v34, %v4692_v12  ;;  %v1311_v36 = vcombine.high %v1295_v63, %v1295_v63  ;;  %v1125_v37 = vrot.slane %v4731_v50, %v4671_v60 }
 0x40d   :  { %v3994_v38 = vpop.eup %3993  ;;  %v1561_v39 = vrot.slane %v1309_v28, %v4488_v2  ;;  %v1694_v18 = vadd.f32 %v1557_v29, %v4747_v6  ;;  %v1085_v43 = vcombine.high %v1083_v59, %v1083_v59  ;;  %v1099_v30 = vrot.slane %v1083_v59, %v4671_v60 }
 0x40e   :  { %v3996_v40 = vpop.eup %3995  ;;  %v1781_v15 = vpack.c.bf16 %v3994_v38, %v3992_v33  ;;  %4015 = vtanh.f32 %v1660_v35  ;;  %v1313_v44 = vcombine.high %v1309_v28, %v1309_v28  ;;  %v1565_v46 = vrot.slane %v1311_v36, %v4488_v2 }
 0x40f   :  { %v3998_v48 = vpop.eup %3997  ;;  %v1695_v49 = vadd.f32 %v1561_v39, %v4747_v6  ;;  %4017 = vtanh.f32 %v1694_v18  ;;  %v1113_v41 = vrot.slane %v1085_v43, %v4671_v60  ;;  %v1429_v51 = vrot.slane %v1099_v30, %v4488_v2 }
 0x410   :  { %v4000_v52 = vpop.eup %3999  ;;  %3753 = vmatprep.mubr.msk.bf16.mxu0 %vm275_vm13, %v1781_v15  ;;  %v1798_v53 = vpack.c.bf16 %v3998_v48, %v3996_v40  ;;  %4019 = vtanh.f32 %v1661_v3  ;;  %v1569_v54 = vrot.slane %v1313_v44, %v4488_v2  ;;  %v1696_v11 = vadd.f32 %v1565_v46, %v4747_v6 }
 0x411   :  { %v4002_v20 = vpop.eup %4001  ;;  %4021 = vtanh.f32 %v1695_v49  ;;  %v1433_v31 = vrot.slane %v1113_v41, %v4488_v2  ;;  %v1662_v56 = vadd.f32 %v1429_v51, %v4692_v12  ;;  %v1115_v57 = vcombine.high %v1099_v30, %v1099_v30 }
 0x412   :  { %v4004_v58 = vpop.eup %4003  ;;  %3786 = vmatmul.mubr.msk.bf16.gmra.mxu1 %vm275_vm13, %v1798_v53  ;;  %v1782_v4 = vpack.c.bf16 %v4002_v20, %v4000_v52  ;;  %v1697_v7 = vadd.f32 %v1569_v54, %v4747_v6  ;;  %4023 = vtanh.f32 %v1696_v11  ;;  %v1117_v61 = vcombine.high %v1113_v41, %v1113_v41 }
 0x413   :  { %v1663_v62 = vadd.f32 %v1433_v31, %v4692_v12  ;;  %4025 = vtanh.f32 %v1662_v56  ;;  %v1437_v0 = vrot.slane %v1115_v57, %v4488_v2  ;;  %v1133_v10 = vcombine.high %v1125_v37, %v1125_v37 }
 0x414   :  { %v4006_v19 = vpop.eup %4005  ;;  %3754 = vmatmul.mubr.msk.bf16.gmra.mxu0 %vm275_vm13, %v1782_v4  ;;  %4027 = vtanh.f32 %v1697_v7  ;;  %v1441_v5 = vrot.slane %v1117_v61, %v4488_v2  ;;  %v1141_v45 = vrot.slane %v1125_v37, %v4671_v60  ;;  %v1132_v6 = vrot.slane %v1118_v55, %v4671_v60 }
 0x415   :  { %v4008_v8 = vpop.eup %4007  ;;  %v1799_v9 = vpack.c.bf16 %v4006_v19, %v4004_v58  ;;  %4029 = vtanh.f32 %v1663_v62  ;;  %v1664_v13 = vadd.f32 %v1437_v0, %v4692_v12  ;;  %v1155_v14 = vrot.slane %v1133_v10, %v4671_v60 }
 0x416   :  { %v4010_v21 = vpop.eup %4009  ;;  %v1665_v22 = vadd.f32 %v1441_v5, %v4692_v12  ;;  %v1445_v23 = vrot.slane %v1141_v45, %v4488_v2  ;;  %v1163_v25 = vcombine.high %v1141_v45, %v1141_v45  ;;  %v1134_v27 = vcombine.high %v1132_v6, %v1132_v6 }
 0x417   :  { %v4012_v63 = vpop.eup %4011  ;;  %3789 = vmatprep.mubr.msk.bf16.mxu1 %vm275_vm13, %v1799_v9  ;;  %4031 = vtanh.f32 %v1664_v13  ;;  %v1449_v50 = vrot.slane %v1155_v14, %v4488_v2  ;;  %v1165_v55 = vcombine.high %v1155_v14, %v1155_v14  ;;  %v1148_v47 = vrot.slane %v1132_v6, %v4671_v60  ;;  %v4967_v9 = vpop.permute.xlu0 %2222  ;;  %v4195_v14 = vld [vmem:[#allocation15] sm:$0xff] }
 0x418   :  { %v4014_v26 = vpop.eup %4013  ;;  %v1783_v34 = vpack.c.bf16 %v4012_v63, %v4008_v8  ;;  %4033 = vtanh.f32 %v1665_v22  ;;  %v1666_v28 = vadd.f32 %v1445_v23, %v4713_v32  ;;  %v1453_v12 = vrot.slane %v1163_v25, %v4488_v2 }
 0x419   :  { %v1800_v29 = vpack.c.bf16 %v4014_v26, %v4010_v21  ;;  %v1667_v59 = vadd.f32 %v1449_v50, %v4713_v32  ;;  %v1457_v33 = vrot.slane %v1165_v55, %v4488_v2  ;;  %v1162_v35 = vrot.slane %v1134_v27, %v4671_v60  ;;  %v4977_v50 = vpop.permute.xlu1 %2229 }
 0x41a   :  { %3757 = vmatprep.mubr.msk.bf16.mxu0 %vm275_vm13, %v1783_v34  ;;  %4035 = vtanh.f32 %v1666_v28  ;;  %v1461_v3 = vrot.slane %v1148_v47, %v4488_v2  ;;  %v1668_v43 = vadd.f32 %v1453_v12, %v4713_v32  ;;  %v1164_v30 = vcombine.high %v1148_v47, %v1148_v47 }
 0x41b   :  { %v4016_v36 = vpop.eup %4015  ;;  %3790 = vmatmul.mubr.msk.bf16.gmra.mxu1 %vm275_vm13, %v1800_v29  ;;  %4037 = vtanh.f32 %v1667_v59  ;;  %v1669_v37 = vadd.f32 %v1457_v33, %v4713_v32  ;;  %v1465_v38 = vrot.slane %v1162_v35, %v4488_v2  ;;  %v1166_v39 = vcombine.high %v1162_v35, %v1162_v35  ;;  %v4975_v27 = vpop.permute.xlu0 %2236 }
 0x41c   :  { %v4018_v18 = vpop.eup %4017  ;;  %v1670_v60 = vadd.f32 %v1461_v3, %v4713_v32  ;;  %v1469_v52 = vrot.slane %v1164_v30, %v4488_v2  ;;  %v4970_v21 = vrot.slane %v4195_v14, %v4515_v17 }
 0x41d   :  { %v4020_v40 = vpop.eup %4019  ;;  %v1671_v15 = vadd.f32 %v1465_v38, %v4713_v32  ;;  %4039 = vtanh.f32 %v1669_v37  ;;  %v1473_v48 = vrot.slane %v1166_v39, %v4488_v2  ;;  %v4991_v35 = vpop.permute.xlu1 %2243 }
 0x41e   :  { %v4022_v44 = vpop.eup %4021  ;;  %v1784_v46 = vpack.c.bf16 %v4020_v40, %v4016_v36  ;;  %v1672_v57 = vadd.f32 %v1469_v52, %v4713_v32 }
 0x41f   :  { %v4024_v49 = vpop.eup %4023  ;;  %v1801_v41 = vpack.c.bf16 %v4022_v44, %v4018_v18  ;;  %4041 = vtanh.f32 %v1671_v15  ;;  %v1673_v20 = vadd.f32 %v1473_v48, %v4713_v32  ;;  %v4987_v59 = vpop.permute.xlu0 %2250 }
 0x420   :  { %v4026_v51 = vpop.eup %4025  ;;  %3758 = vmatmul.mubr.msk.bf16.gmra.mxu0 %vm275_vm13, %v1784_v46  ;;  %4043 = vtanh.f32 %v1668_v43 }
 0x421   :  { %v4028_v53 = vpop.eup %4027  ;;  %3793 = vmatprep.mubr.msk.bf16.mxu1 %vm275_vm13, %v1801_v41  ;;  %4045 = vtanh.f32 %v1670_v60  ;;  %v4997_v46 = vpop.permute.xlu1 %2257 }
 0x422   :  { %v4030_v54 = vpop.eup %4029  ;;  %v1802_v11 = vpack.c.bf16 %v4028_v53, %v4024_v49  ;;  %4047 = vtanh.f32 %v1673_v20 }
 0x423   :  { %v1785_v31 = vpack.c.bf16 %v4030_v54, %v4026_v51  ;;  %4049 = vtanh.f32 %v1672_v57 }
 0x424   :  { %v4032_v56 = vpop.eup %4031  ;;  %3794 = vmatmul.mubr.msk.bf16.gmra.mxu1 %vm275_vm13, %v1802_v11 }
 0x425   :  { %v4034_v58 = vpop.eup %4033  ;;  %3761 = vmatprep.mubr.msk.bf16.mxu0 %vm275_vm13, %v1785_v31 }
 0x426   :  { %v1786_v4 = vpack.c.bf16 %v4034_v58, %v4032_v56 }
 0x427   :  { %v4036_v2 = vpop.eup %4035 }
 0x428   :  { %v4038_v7 = vpop.eup %4037  ;;  %3762 = vmatmul.mubr.msk.bf16.gmra.mxu0 %vm275_vm13, %v1786_v4 }
 0x429   :  { %v1787_v61 = vpack.c.bf16 %v4038_v7, %v4036_v2 }
 0x42a   :  { %v4040_v62 = vpop.eup %4039 }
 0x42b   :  { %3765 = vmatprep.mubr.msk.bf16.mxu0 %vm275_vm13, %v1787_v61 }
 0x42c   :  { %v4042_v0 = vpop.eup %4041 }
 0x42d   :  { %v4044_v10 = vpop.eup %4043 }
 0x42e   :  { %v4046_v19 = vpop.eup %4045  ;;  %v1788_v5 = vpack.c.bf16 %v4040_v62, %v4044_v10 }
 0x42f   :  { %v1789_v45 = vpack.c.bf16 %v4042_v0, %v4046_v19  ;;  %v4048_v32 = vpop.eup %4047 }
 0x430   :  { %3766 = vmatmul.mubr.msk.bf16.gmra.mxu0 %vm275_vm13, %v1788_v5  ;;  %v4050_v6 = vpop.eup %4049 }
 0x431   :  { %3769 = vmatprep.mubr.msk.bf16.mxu0 %vm275_vm13, %v1789_v45  ;;  %v1790_v8 = vpack.c.bf16 %v4048_v32, %v4050_v6 }
 0x438   :  { %3770 = vmatmul.mubr.msk.bf16.gmra.mxu0 %vm275_vm13, %v1790_v8 }
 0x4a6   :  { %v3735_v13 = vpop.f32.mrf.mxu0 }
 0x4a7   :  { %v1970_v54 = vadd.f32 %v3735_v13, %v4970_v21 }
 0x4a8   :  { %v1961_v22 = vpop.f32.mrf.mxu0 }
 0x4a9   :  { %v1962_v23 = vadd.f32 %v1961_v22, %v4970_v21  ;;  %v2275_v45 = vadd.f32 %v4975_v27, %v1970_v54 }
 0x4aa   :  { %v4973_v25 = vpop.f32.mrf.mxu0 }
 0x4ab   :  { %v2273_v47 = vadd.f32 %v4967_v9, %v1962_v23 }
 0x4ac   :  { %v1964_v63 = vpop.f32.mrf.mxu0 }
 0x4ad   :  { %v1965_v55 = vadd.f32 %v1964_v63, %v4970_v21  ;;  %v2337_v29 = vsel %vm275_vm13, %v2273_v47, -inf }
 0x4ae   :  { %v4981_v26 = vpop.f32.mrf.mxu0  ;;  %v2338_v38 = vrot.slane %v2337_v29, 4 }
 0x4af   :  { %v2274_v34 = vadd.f32 %v4977_v50, %v1965_v55 }
 0x4b0   :  { %v1977_v17 = vpop.f32.mrf.mxu0  ;;  %v2339_v44 = vmax.f32 %v2337_v29, %v2338_v38 }
 0x4b1   :  { %v2344_v28 = vsel %vm275_vm13, %v2274_v34, -inf  ;;  %v1978_v12 = vadd.f32 %v1977_v17, %v4970_v21  ;;  %v2351_v17 = vsel %vm275_vm13, %v2275_v45, -inf }
 0x4b2   :  { %v4989_v33 = vpop.f32.mrf.mxu0  ;;  %v2345_v36 = vrot.slane %v2344_v28, 4  ;;  %v2340_v2 = vrot.slane %v2339_v44, 2 }
 0x4b3   :  { %v2277_v3 = vadd.f32 %v4987_v59, %v1978_v12 }
 0x4b4   :  { %v1980_v37 = vpop.f32.mrf.mxu0  ;;  %v2346_v60 = vmax.f32 %v2344_v28, %v2345_v36  ;;  %v2341_v14 = vmax.f32 %v2339_v44, %v2340_v2  ;;  %v1973_v28 = vadd.f32 %v4973_v25, %v4970_v21 }
 0x4b5   :  { %v3775_v39 = vpop.f32.mrf.mxu1  ;;  %v1981_v18 = vadd.f32 %v1980_v37, %v4970_v21  ;;  %v2365_v43 = vsel %vm275_vm13, %v2277_v3, -inf }
 0x4b6   :  { %v2130_v30 = vadd.f32 %v3775_v39, %v4970_v21  ;;  %v2366_v51 = vrot.slane %v2365_v43, 4  ;;  %v2347_v56 = vrot.slane %v2346_v60, 2 }
 0x4b7   :  { %v2121_v40 = vpop.f32.mrf.mxu1  ;;  %v2278_v52 = vadd.f32 %v4997_v46, %v1981_v18 }
 0x4b8   :  { %v3743_v15 = vpop.f32.mrf.mxu0  ;;  %v2315_v48 = vadd.f32 %v4975_v27, %v2130_v30  ;;  %v2122_v49 = vadd.f32 %v2121_v40, %v4970_v21  ;;  %v2367_v62 = vmax.f32 %v2365_v43, %v2366_v51  ;;  %v2348_v32 = vmax.f32 %v2346_v60, %v2347_v56 }
 0x4b9   :  { %v3776_v41 = vpop.f32.mrf.mxu1  ;;  %v2002_v53 = vadd.f32 %v3743_v15, %v4970_v21  ;;  %v2372_v58 = vsel %vm275_vm13, %v2278_v52, -inf  ;;  %v2342_v40 = vrot.slane %v2341_v14, 1  ;;  %v2352_v60 = vrot.slane %v2351_v17, 4 }
 0x4ba   :  { %v2631_v11 = vsel %vm275_vm13, %v2315_v48, -inf  ;;  %v2313_v20 = vadd.f32 %v4967_v9, %v2122_v49  ;;  %v2133_v31 = vadd.f32 %v3776_v41, %v4970_v21  ;;  %v1993_v61 = vpop.f32.mrf.mxu0  ;;  %v2373_v0 = vrot.slane %v2372_v58, 4 }
 0x4bb   :  { %v2632_v57 = vrot.slane %v2631_v11, 4  ;;  %v2283_v4 = vadd.f32 %v4975_v27, %v2002_v53  ;;  %v2124_v5 = vpop.f32.mrf.mxu1  ;;  %v1994_v13 = vadd.f32 %v1993_v61, %v4970_v21  ;;  %v2368_v63 = vrot.slane %v2367_v62, 2 }
 0x4bc   :  { %v2617_v7 = vsel %vm275_vm13, %v2313_v20, -inf  ;;  %v2316_v19 = vadd.f32 %v4991_v35, %v2133_v31  ;;  %v2125_v23 = vadd.f32 %v2124_v5, %v4970_v21  ;;  %v2374_v55 = vmax.f32 %v2372_v58, %v2373_v0  ;;  %v3744_v38 = vpop.f32.mrf.mxu0 }
 0x4bd   :  { %v2407_v10 = vsel %vm275_vm13, %v2283_v4, -inf  ;;  %v2633_v6 = vmax.f32 %v2631_v11, %v2632_v57  ;;  %v2618_v8 = vrot.slane %v2617_v7, 4  ;;  %v2281_v34 = vadd.f32 %v4967_v9, %v1994_v13 }
 0x4be   :  { %v2408_v22 = vrot.slane %v2407_v10, 4  ;;  %v2638_v47 = vsel %vm275_vm13, %v2316_v19, -inf  ;;  %v2314_v12 = vadd.f32 %v4977_v50, %v2125_v23  ;;  %v2349_v29 = vrot.slane %v2348_v32, 1  ;;  %v3779_v41 = vpop.f32.mrf.mxu1  ;;  %v1996_v31 = vpop.f32.mrf.mxu0 }
 0x4bf   :  { %v2634_v3 = vrot.slane %v2633_v6, 2  ;;  %v2619_v36 = vmax.f32 %v2617_v7, %v2618_v8  ;;  %v2393_v37 = vsel %vm275_vm13, %v2281_v34, -inf  ;;  %v2639_v18 = vrot.slane %v2638_v47, 4 }
 0x4c0   :  { %v2409_v39 = vmax.f32 %v2407_v10, %v2408_v22  ;;  %v2394_v43 = vrot.slane %v2393_v37, 4  ;;  %v2624_v30 = vsel %vm275_vm13, %v2314_v12, -inf  ;;  %v2369_v15 = vmax.f32 %v2367_v62, %v2368_v63  ;;  %v2137_v0 = vpop.f32.mrf.mxu1 }
 0x4c1   :  { %v2375_v44 = vrot.slane %v2374_v55, 2  ;;  %v2276_v48 = vadd.f32 %v4991_v35, %v1973_v28  ;;  %v2005_v49 = vadd.f32 %v3744_v38, %v4970_v21  ;;  %v2620_v51 = vrot.slane %v2619_v36, 2 }
 0x4c2   :  { %v2395_v25 = vmax.f32 %v2393_v37, %v2394_v43  ;;  %v2625_v52 = vrot.slane %v2624_v30, 4  ;;  %v2350_v53 = vmax.f32 %v2348_v32, %v2349_v29  ;;  %v2635_v54 = vmax.f32 %v2633_v6, %v2634_v3  ;;  %v3747_v37 = vpop.f32.mrf.mxu0 }
 0x4c3   :  { %v2410_v11 = vrot.slane %v2409_v39, 2  ;;  %v2640_v20 = vmax.f32 %v2638_v47, %v2639_v18  ;;  %v2343_v56 = vmax.f32 %v2341_v14, %v2342_v40  ;;  %v2353_v57 = vmax.f32 %v2351_v17, %v2352_v60  ;;  %v5031_v14 = vpop.permute.xlu0 %2264 }
 0x4c4   :  { %v2370_v58 = vrot.slane %v2369_v15, 1  ;;  %v2376_v4 = vmax.f32 %v2374_v55, %v2375_v44  ;;  %v2358_v2 = vsel %vm275_vm13, %v2276_v48, -inf  ;;  %v2396_v7 = vrot.slane %v2395_v25, 2 }
 0x4c5   :  { %v2284_v61 = vadd.f32 %v4991_v35, %v2005_v49  ;;  %v2146_v62 = vadd.f32 %v3779_v41, %v4970_v21  ;;  %v1986_v10 = vadd.f32 %v4981_v26, %v4970_v21  ;;  %v2621_v19 = vmax.f32 %v2619_v36, %v2620_v51 }
 0x4c6   :  { %v2626_v5 = vmax.f32 %v2624_v30, %v2625_v52  ;;  %v1997_v45 = vadd.f32 %v1996_v31, %v4970_v21  ;;  %4051 = vtanh.f32 %v2350_v53  ;;  %v2636_v32 = vrot.slane %v2635_v54, 1 }
 0x4c7   :  { %v2411_v6 = vmax.f32 %v2409_v39, %v2410_v11  ;;  %v2641_v8 = vrot.slane %v2640_v20, 2  ;;  %4053 = vtanh.f32 %v2343_v56  ;;  %v2371_v13 = vmax.f32 %v2369_v15, %v2370_v58  ;;  %v3780_v15 = vpop.f32.mrf.mxu1 }
 0x4c8   :  { %v2377_v22 = vrot.slane %v2376_v4, 1  ;;  %v2138_v23 = vadd.f32 %v2137_v0, %v4970_v21  ;;  %v2397_v63 = vmax.f32 %v2395_v25, %v2396_v7  ;;  %v2414_v55 = vsel %vm275_vm13, %v2284_v61, -inf  ;;  %v3855_v61 = vld [vmem:[%s5557_s9 + $0x58] sm:$0xff]  }
 0x4c9   :  { %v2319_v26 = vadd.f32 %v5031_v14, %v2146_v62  ;;  %v2282_v47 = vadd.f32 %v4977_v50, %v1997_v45  ;;  %v2354_v34 = vrot.slane %v2353_v57, 2  ;;  %v2622_v17 = vrot.slane %v2621_v19, 1  ;;  %3797 = vmatprep.subr.bf16.mxu1 %v3855_v61 }
 0x4ca   :  { %v2627_v28 = vrot.slane %v2626_v5, 2  ;;  %v2637_v12 = vmax.f32 %v2635_v54, %v2636_v32  ;;  %v2412_v29 = vrot.slane %v2411_v6, 1  ;;  %v2642_v3 = vmax.f32 %v2640_v20, %v2641_v8  ;;  %3798 = vmatpush3.bf16.msra.mxu1 %v3855_v61 }
 0x4cb   :  { %v2317_v36 = vadd.f32 %v4987_v59, %v2138_v23  ;;  %v2359_v38 = vrot.slane %v2358_v2, 4  ;;  %4055 = vtanh.f32 %v2371_v13  ;;  %v2279_v39 = vadd.f32 %v5031_v14, %v1986_v10  ;;  %v5051_v10 = vpop.permute.xlu1 %2271 }
 0x4cc   :  { %v2415_v18 = vrot.slane %v2414_v55, 4  ;;  %v2378_v43 = vmax.f32 %v2376_v4, %v2377_v22  ;;  %v2398_v30 = vrot.slane %v2397_v63, 1  ;;  %v2659_v40 = vsel %vm275_vm13, %v2319_v26, -inf }
 0x4cd   :  { %v2400_v60 = vsel %vm275_vm13, %v2282_v47, -inf  ;;  %v2355_v44 = vmax.f32 %v2353_v57, %v2354_v34  ;;  %v2623_v48 = vmax.f32 %v2621_v19, %v2622_v17  ;;  %v2628_v25 = vmax.f32 %v2626_v5, %v2627_v28  ;;  %v2009_v19 = vpop.f32.mrf.mxu0  ;;  %v2140_v28 = vpop.f32.mrf.mxu1 }
 0x4ce   :  { %v2018_v49 = vadd.f32 %v3747_v37, %v4970_v21  ;;  %4057 = vtanh.f32 %v2637_v12  ;;  %v2413_v41 = vmax.f32 %v2411_v6, %v2412_v29  ;;  %v2643_v51 = vrot.slane %v2642_v3, 1 }
 0x4cf   :  { %v2645_v52 = vsel %vm275_vm13, %v2317_v36, -inf  ;;  %v2416_v53 = vmax.f32 %v2414_v55, %v2415_v18  ;;  %v2660_v54 = vrot.slane %v2659_v40, 4  ;;  %v2401_v11 = vrot.slane %v2400_v60, 4  ;;  %v3748_v12 = vpop.f32.mrf.mxu0 }
 0x4d0   :  { %v2149_v20 = vadd.f32 %v3780_v15, %v4970_v21  ;;  %v2360_v31 = vmax.f32 %v2358_v2, %v2359_v38  ;;  %v2379_v56 = vsel %vm275_vm13, %v2279_v39, -inf  ;;  %4059 = vtanh.f32 %v2378_v43 }
 0x4d1   :  { %v2399_v58 = vmax.f32 %v2397_v63, %v2398_v30  ;;  %4061 = vtanh.f32 %v2623_v48  ;;  %v2629_v57 = vrot.slane %v2628_v25, 1  ;;  %v2646_v4 = vrot.slane %v2645_v52, 4 }
 0x4d2   :  { %v2287_v7 = vadd.f32 %v5031_v14, %v2018_v49  ;;  %v2356_v62 = vrot.slane %v2355_v44, 1  ;;  %v1989_v0 = vadd.f32 %v4989_v33, %v4970_v21  ;;  %4063 = vtanh.f32 %v2413_v41  ;;  %v2012_v49 = vpop.f32.mrf.mxu0 }
 0x4d3   :  { %v2644_v2 = vmax.f32 %v2642_v3, %v2643_v51  ;;  %v4052_v5 = vpop.eup %4051  ;;  %v2417_v45 = vrot.slane %v2416_v53, 2  ;;  %v2661_v32 = vmax.f32 %v2659_v40, %v2660_v54  ;;  %v2402_v6 = vmax.f32 %v2400_v60, %v2401_v11 }
 0x4d4   :  { %v2320_v8 = vadd.f32 %v5051_v10, %v2149_v20  ;;  %v4054_v13 = vpop.eup %4053  ;;  %v2361_v22 = vrot.slane %v2360_v31, 2  ;;  %v2380_v23 = vrot.slane %v2379_v56, 4  ;;  %4065 = vtanh.f32 %v2399_v58  ;;  %v3783_v58 = vpop.f32.mrf.mxu1 }
 0x4d5   :  { %v2630_v63 = vmax.f32 %v2628_v25, %v2629_v57  ;;  %v2647_v55 = vmax.f32 %v2645_v52, %v2646_v4  ;;  %v2435_v33 = vsel %vm275_vm13, %v2287_v7, -inf  ;;  %v2010_v26 = vadd.f32 %v2009_v19, %v4970_v21 }
 0x4d6   :  { %v2357_v47 = vmax.f32 %v2355_v44, %v2356_v62  ;;  %v2859_v34 = vpack.c.bf16 %v4052_v5, %v4052_v5  ;;  %v2280_v17 = vadd.f32 %v5051_v10, %v1989_v0  ;;  %4067 = vtanh.f32 %v2644_v2 }
 0x4d7   :  { %v2418_v29 = vmax.f32 %v2416_v53, %v2417_v45  ;;  %v2662_v3 = vrot.slane %v2661_v32, 2  ;;  %v2403_v36 = vrot.slane %v2402_v6, 2  ;;  %v2666_v37 = vsel %vm275_vm13, %v2320_v8, -inf }
 0x4d8   :  { %v4056_v38 = vpop.eup %4055  ;;  %v2858_v39 = vpack.c.bf16 %v4054_v13, %v4054_v13  ;;  %v5058_v18 = vmax.f32 %v2360_v31, %v2361_v22  ;;  %v2436_v43 = vrot.slane %v2435_v33, 4  ;;  %4069 = vtanh.f32 %v2630_v63 }
 0x4d9   :  { %v2648_v30 = vrot.slane %v2647_v55, 2  ;;  %v2285_v40 = vadd.f32 %v4987_v59, %v2010_v26  ;;  %v2141_v60 = vadd.f32 %v2140_v28, %v4970_v21  ;;  %v2991_v15 = vunpack.c.l.b16 %v2859_v34  ;;  %v3751_v28 = vpop.f32.mrf.mxu0 }
 0x4da   :  { %v5062_v44 = vmax.f32 %v2379_v56, %v2380_v23  ;;  %v5065_v48 = vsel %vm275_vm13, %v2280_v17, -inf  ;;  %v2667_v25 = vrot.slane %v2666_v37, 4  ;;  %4071 = vtanh.f32 %v2357_v47 }
 0x4db   :  { %v5067_v41 = vpop.eup %4057  ;;  %v2419_v51 = vrot.slane %v2418_v29, 1  ;;  %v2663_v52 = vmax.f32 %v2661_v32, %v2662_v3  ;;  %v2404_v53 = vmax.f32 %v2402_v6, %v2403_v36  ;;  %v2990_v54 = vunpack.c.l.b16 %v2858_v39 }
 0x4dc   :  { %5576 = vst [vmem:[#allocation27_spill] sm:$0xff] %v5067_v41  ;;  %v2862_v11 = vpack.c.bf16 %v4056_v38, %v4056_v38  ;;  %v2437_v20 = vmax.f32 %v2435_v33, %v2436_v43  ;;  %v2021_v31 = vadd.f32 %v3748_v12, %v4970_v21  ;;  %v2649_v56 = vmax.f32 %v2647_v55, %v2648_v30 }
 0x4dd   :  { %v4060_v57 = vpop.eup %4059  ;;  %v2421_v4 = vsel %vm275_vm13, %v2285_v40, -inf  ;;  %v2318_v7 = vadd.f32 %v4997_v46, %v2141_v60  ;;  %v2013_v61 = vadd.f32 %v2012_v49, %v4970_v21  ;;  %v5077_v2 = vsel %vm3054_vm15, %v2991_v15, %v2990_v54 }
 0x4de   :  { %v5073_v62 = vpop.eup %4061  ;;  %v2668_v5 = vmax.f32 %v2666_v37, %v2667_v25  ;;  %v2420_v32 = vmax.f32 %v2418_v29, %v2419_v51  ;;  %v2664_v6 = vrot.slane %v2663_v52, 1  ;;  %v2405_v8 = vrot.slane %v2404_v53, 1  ;;  %v2153_v37 = vpop.f32.mrf.mxu1 }
 0x4df   :  { %5577 = vst [vmem:[#allocation28_spill] sm:$0xff] %v5073_v62  ;;  %v4064_v45 = vpop.eup %4063  ;;  %v2162_v13 = vadd.f32 %v3783_v58, %v4970_v21  ;;  %v5081_v22 = vunpack.c.l.b16 %v2862_v11  ;;  %v2422_v23 = vrot.slane %v2421_v4, 4  ;;  %v2288_v63 = vadd.f32 %v5051_v10, %v2021_v31  ;;  %v2025_v31 = vpop.f32.mrf.mxu0 }
 0x4e0   :  { %v2286_v55 = vadd.f32 %v4997_v46, %v2013_v61  ;;  %v2863_v26 = vpack.c.bf16 %v4060_v57, %v4060_v57  ;;  %v2650_v47 = vrot.slane %v2649_v56, 1  ;;  %v2438_v34 = vrot.slane %v2437_v20, 2 }
 0x4e1   :  { %v4066_v33 = vpop.eup %4065  ;;  %v2652_v17 = vsel %vm275_vm13, %v2318_v7, -inf  ;;  %v2868_v3 = vpack.c.bf16 %v4064_v45, %v4064_v45  ;;  %v2669_v36 = vrot.slane %v2668_v5, 2  ;;  %4073 = vtanh.f32 %v2420_v32  ;;  %v3784_v7 = vpop.f32.mrf.mxu1 }
 0x4e2   :  { %v2665_v39 = vmax.f32 %v2663_v52, %v2664_v6  ;;  %v2406_v43 = vmax.f32 %v2404_v53, %v2405_v8  ;;  %v2323_v30 = vadd.f32 %v4975_v27, %v2162_v13  ;;  %v2423_v40 = vmax.f32 %v2421_v4, %v2422_v23 }
 0x4e3   :  { %v5090_v38 = vpop.eup %4067  ;;  %v2653_v60 = vrot.slane %v2652_v17, 4  ;;  %v2442_v15 = vsel %vm275_vm13, %v2288_v63, -inf  ;;  %v2428_v25 = vsel %vm275_vm13, %v2286_v55, -inf  ;;  %v5095_v49 = vunpack.c.l.b16 %v2863_v26  ;;  %v3752_v63 = vpop.f32.mrf.mxu0 }
 0x4e4   :  { %5578 = vst [vmem:[#allocation29_spill] sm:$0xff] %v5090_v38  ;;  %v2866_v51 = vpack.c.bf16 %v4066_v33, %v4066_v33  ;;  %v2651_v54 = vmax.f32 %v2649_v56, %v2650_v47  ;;  %v2439_v11 = vmax.f32 %v2437_v20, %v2438_v34  ;;  %v5097_v57 = vunpack.c.l.b16 %v2868_v3  ;;  %v2156_v34 = vpop.f32.mrf.mxu1 }
 0x4e5   :  { %v4070_v58 = vpop.eup %4069  ;;  %v2670_v53 = vmax.f32 %v2668_v5, %v2669_v36  ;;  %v2154_v4 = vadd.f32 %v2153_v37, %v4970_v21  ;;  %4075 = vtanh.f32 %v2665_v39  ;;  %v2443_v61 = vrot.slane %v2442_v15, 4 }
 0x4e6   :  { %v2429_v45 = vrot.slane %v2428_v25, 4  ;;  %v2034_v32 = vadd.f32 %v3751_v28, %v4970_v21  ;;  %4077 = vtanh.f32 %v2406_v43  ;;  %v2424_v20 = vrot.slane %v2423_v40, 2 }
 0x4e7   :  { %v5103_v6 = vpop.eup %4071  ;;  %v2654_v56 = vmax.f32 %v2652_v17, %v2653_v60  ;;  %v2687_v8 = vsel %vm275_vm13, %v2323_v30, -inf  ;;  %v5106_v13 = vunpack.c.l.b16 %v2866_v51  ;;  %v2899_v23 = vpack.c.bf16 %v4070_v58, %v4070_v58 }
 0x4e8   :  { %4079 = vtanh.f32 %v2651_v54  ;;  %v2440_v5 = vrot.slane %v2439_v11, 1  ;;  %v2671_v55 = vrot.slane %v2670_v53, 1  ;;  %v2321_v33 = vadd.f32 %v4967_v9, %v2154_v4 }
 0x4e9   :  { %v2291_v26 = vadd.f32 %v4975_v27, %v2034_v32  ;;  %v2165_v47 = vadd.f32 %v3784_v7, %v4970_v21  ;;  %v2444_v28 = vmax.f32 %v2442_v15, %v2443_v61  ;;  %v2688_v3 = vrot.slane %v2687_v8, 4  ;;  %v3787_v32 = vpop.f32.mrf.mxu1 }
 0x4ea   :  { %v2430_v36 = vmax.f32 %v2428_v25, %v2429_v45  ;;  %v2026_v17 = vadd.f32 %v2025_v31, %v4970_v21  ;;  %v2425_v37 = vmax.f32 %v2423_v40, %v2424_v20  ;;  %v2655_v39 = vrot.slane %v2654_v56, 2  ;;  %v2028_v20 = vpop.f32.mrf.mxu0 }
 0x4eb   :  { %v2463_v43 = vsel %vm275_vm13, %v2291_v26, -inf  ;;  %v2037_v30 = vadd.f32 %v3752_v63, %v4970_v21  ;;  %v5114_v60 = vunpack.c.l.b16 %v2899_v23  ;;  %v2441_v51 = vmax.f32 %v2439_v11, %v2440_v5  ;;  %v2169_v29 = vpop.f32.mrf.mxu1 }
 0x4ec   :  { %v2464_v54 = vrot.slane %v2463_v43, 4  ;;  %v2157_v58 = vadd.f32 %v2156_v34, %v4970_v21  ;;  %v2673_v4 = vsel %vm275_vm13, %v2321_v33, -inf  ;;  %v2324_v15 = vadd.f32 %v4991_v35, %v2165_v47 }
 0x4ed   :  { %5579 = vst [vmem:[#allocation30_spill] sm:$0xff] %v5114_v60  ;;  %v2289_v25 = vadd.f32 %v4967_v9, %v2026_v17  ;;  %v2292_v31 = vadd.f32 %v4991_v35, %v2037_v30  ;;  %v2672_v40 = vmax.f32 %v2670_v53, %v2671_v55  ;;  %v2445_v7 = vrot.slane %v2444_v28, 2 }
 0x4ee   :  { %v2689_v61 = vmax.f32 %v2687_v8, %v2688_v3  ;;  %v2431_v45 = vrot.slane %v2430_v36, 2  ;;  %v4074_v23 = vpop.eup %4073  ;;  %v2426_v63 = vrot.slane %v2425_v37, 1  ;;  %v2656_v11 = vmax.f32 %v2654_v56, %v2655_v39 }
 0x4ef   :  { %v2449_v5 = vsel %vm275_vm13, %v2289_v25, -inf  ;;  %v2470_v26 = vsel %vm275_vm13, %v2292_v31, -inf  ;;  %v2674_v33 = vrot.slane %v2673_v4, 4  ;;  %v2465_v34 = vmax.f32 %v2463_v43, %v2464_v54 }
 0x4f0   :  { %v2450_v47 = vrot.slane %v2449_v5, 4  ;;  %v2322_v17 = vadd.f32 %v4977_v50, %v2157_v58  ;;  %v2694_v30 = vsel %vm275_vm13, %v2324_v15, -inf  ;;  %v2471_v53 = vrot.slane %v2470_v26, 4 }
 0x4f1   :  { %v2178_v8 = vadd.f32 %v3787_v32, %v4970_v21  ;;  %v2029_v55 = vadd.f32 %v2028_v20, %v4970_v21  ;;  %v2869_v3 = vpack.c.bf16 %v4074_v23, %v4074_v23  ;;  %4081 = vtanh.f32 %v2441_v51 }
 0x4f2   :  { %v2432_v52 = vmax.f32 %v2430_v36, %v2431_v45  ;;  %v2451_v56 = vmax.f32 %v2449_v5, %v2450_v47  ;;  %v5127_v39 = vpop.eup %4075  ;;  %4083 = vtanh.f32 %v2672_v40  ;;  %v2446_v25 = vmax.f32 %v2444_v28, %v2445_v7 }
 0x4f3   :  { %5580 = vst [vmem:[#allocation31_spill] sm:$0xff] %v5127_v39  ;;  %v2690_v31 = vrot.slane %v2689_v61, 2  ;;  %v2290_v43 = vadd.f32 %v4977_v50, %v2029_v55  ;;  %v5130_v54 = vpop.eup %4077  ;;  %v2427_v58 = vmax.f32 %v2425_v37, %v2426_v63  ;;  %v2466_v15 = vrot.slane %v2465_v34, 2  ;;  %v3755_v55 = vpop.f32.mrf.mxu0 }
 0x4f4   :  { %v2695_v12 = vrot.slane %v2694_v30, 4  ;;  %v2680_v32 = vsel %vm275_vm13, %v2322_v17, -inf  ;;  %v2657_v51 = vrot.slane %v2656_v11, 1  ;;  %v2675_v36 = vmax.f32 %v2673_v4, %v2674_v33  ;;  %v3856_v4 = vld [vmem:[%s5557_s9 + $0x50] sm:$0xff]  }
 0x4f5   :  { %v5133_v20 = vpop.eup %4079  ;;  %v2472_v45 = vmax.f32 %v2470_v26, %v2471_v53  ;;  %v2327_v23 = vadd.f32 %v5031_v14, %v2178_v8  ;;  %v5136_v40 = vunpack.c.l.b16 %v2869_v3  ;;  %v2433_v28 = vrot.slane %v2432_v52, 1  ;;  %v3788_v8 = vpop.f32.mrf.mxu1  ;;  %3799 = vmatprep.subr.bf16.mxu1 %v3856_v4 }
 0x4f6   :  { %5581 = vst [vmem:[#allocation32_spill] sm:$0xff] %v5133_v20  ;;  %v2452_v7 = vrot.slane %v2451_v56, 2  ;;  %v2456_v5 = vsel %vm275_vm13, %v2290_v43, -inf  ;;  %v2447_v63 = vrot.slane %v2446_v25, 1  ;;  %v5141_v47 = vmax.f32 %v2689_v61, %v2690_v31  ;;  %3800 = vmatpush3.bf16.msra.mxu1 %v3856_v4 }
 0x4f7   :  { %v2681_v17 = vrot.slane %v2680_v32, 4  ;;  %4085 = vtanh.f32 %v2427_v58  ;;  %v2467_v26 = vmax.f32 %v2465_v34, %v2466_v15  ;;  %v2696_v33 = vmax.f32 %v2694_v30, %v2695_v12 }
 0x4f8   :  { %v2457_v53 = vrot.slane %v2456_v5, 4  ;;  %v5146_v3 = vmax.f32 %v2656_v11, %v2657_v51  ;;  %v2676_v43 = vrot.slane %v2675_v36, 2  ;;  %v2473_v19 = vrot.slane %v2472_v45, 2  ;;  %v2041_v11 = vpop.f32.mrf.mxu0 }
 0x4f9   :  { %v2715_v0 = vsel %vm275_vm13, %v2327_v23, -inf  ;;  %v2434_v61 = vmax.f32 %v2432_v52, %v2433_v28  ;;  %v2453_v31 = vmax.f32 %v2451_v56, %v2452_v7  ;;  %v2170_v42 = vadd.f32 %v2169_v29, %v4970_v21  ;;  %v3857_v52 = vld [vmem:[%s5557_s9 + $0x48] sm:$0xff]   ;;  %v3858_v29 = vld [vmem:[%s5557_s9 + $0x40] sm:$0xff]   ;;  %s4390_s9 = smov 96  }
 0x4fa   :  { %v2458_v37 = vmax.f32 %v2456_v5, %v2457_v53  ;;  %v5150_v1 = vmax.f32 %v2446_v25, %v2447_v63  ;;  %v2682_v58 = vmax.f32 %v2680_v32, %v2681_v17  ;;  %v2050_v12 = vadd.f32 %v3755_v55, %v4970_v21  ;;  %v2172_v63 = vpop.f32.mrf.mxu1  ;;  %3801 = vmatprep.subr.bf16.mxu1 %v3857_v52 }
 0x4fb   :  { %v2181_v34 = vadd.f32 %v3788_v8, %v4970_v21  ;;  %v2468_v30 = vrot.slane %v2467_v26, 1  ;;  %v2697_v15 = vrot.slane %v2696_v33, 2  ;;  %v2716_v51 = vrot.slane %v2715_v0, 4  ;;  %3802 = vmatpush3.bf16.msra.mxu1 %v3857_v52 }
 0x4fc   :  { %v2459_v24 = vrot.slane %v2458_v37, 2  ;;  %v2692_v56 = vrot.slane %v5141_v47, 1  ;;  %v2474_v25 = vmax.f32 %v2472_v45, %v2473_v19  ;;  %v2325_v32 = vadd.f32 %v4987_v59, %v2170_v42  ;;  %v3756_v19 = vpop.f32.mrf.mxu0  ;;  %3803 = vmatprep.subr.bf16.mxu1 %v3858_v29 }
 0x4fd   :  { %v2295_v23 = vadd.f32 %v5031_v14, %v2050_v12  ;;  %4087 = vtanh.f32 %v2434_v61  ;;  %v2677_v28 = vmax.f32 %v2675_v36, %v2676_v43  ;;  %v2454_v7 = vrot.slane %v2453_v31, 1 }
 0x4fe   :  { %v2328_v5 = vadd.f32 %v5051_v10, %v2181_v34  ;;  %v5164_v17 = vpop.eup %4081  ;;  %v2683_v55 = vrot.slane %v2682_v58, 2  ;;  %v2460_v4 = vmax.f32 %v2458_v37, %v2459_v24  ;;  %v2701_v53 = vsel %vm275_vm13, %v2325_v32, -inf }
 0x4ff   :  { %v2491_v8 = vsel %vm275_vm13, %v2295_v23, -inf  ;;  %v5168_v42 = vpop.eup %4083  ;;  %v2469_v45 = vmax.f32 %v2467_v26, %v2468_v30  ;;  %v2698_v61 = vmax.f32 %v2696_v33, %v2697_v15  ;;  %v2717_v36 = vmax.f32 %v2715_v0, %v2716_v51  ;;  %3804 = vmatpush3.bf16.msra.mxu1 %v3858_v29 }
 0x500   :  { %5582 = vst [vmem:[#allocation33_spill] sm:$0xff] %v5168_v42  ;;  %v2492_v43 = vrot.slane %v2491_v8, 4  ;;  %v2475_v12 = vrot.slane %v2474_v25, 1  ;;  %v2461_v34 = vrot.slane %v2460_v4, 1  ;;  %v2042_v16 = vadd.f32 %v2041_v11, %v4970_v21 }
 0x501   :  { %v2173_v39 = vadd.f32 %v2172_v63, %v4970_v21  ;;  %v2455_v24 = vmax.f32 %v2453_v31, %v2454_v7  ;;  %v2702_v37 = vrot.slane %v2701_v53, 4  ;;  %v2722_v32 = vsel %vm275_vm13, %v2328_v5, -inf  ;;  %v3791_v5 = vpop.f32.mrf.mxu1 }
 0x502   :  { %v2053_v23 = vadd.f32 %v3756_v19, %v4970_v21  ;;  %v2684_v52 = vmax.f32 %v2682_v58, %v2683_v55  ;;  %v2462_v60 = vmax.f32 %v2460_v4, %v2461_v34  ;;  %v2293_v26 = vadd.f32 %v4987_v59, %v2042_v16  ;;  %v2044_v34 = vpop.f32.mrf.mxu0 }
 0x503   :  { %v2326_v0 = vadd.f32 %v4997_v46, %v2173_v39  ;;  %4089 = vtanh.f32 %v2469_v45  ;;  %v2718_v33 = vrot.slane %v2717_v36, 2  ;;  %v2493_v30 = vmax.f32 %v2491_v8, %v2492_v43 }
 0x504   :  { %v2296_v11 = vadd.f32 %v5051_v10, %v2053_v23  ;;  %v5177_v15 = vpop.eup %4085  ;;  %v2476_v31 = vmax.f32 %v2474_v25, %v2475_v12  ;;  %4091 = vtanh.f32 %v2462_v60  ;;  %v2723_v51 = vrot.slane %v2722_v32, 4 }
 0x505   :  { %v2477_v7 = vsel %vm275_vm13, %v2293_v26, -inf  ;;  %v5583_v58 = vpack.c.bf16 %v5130_v54, %v5130_v54  ;;  %v2678_v63 = vrot.slane %v2677_v28, 1  ;;  %4093 = vtanh.f32 %v2455_v24 }
 0x506   :  { %v2703_v39 = vmax.f32 %v2701_v53, %v2702_v37  ;;  %v2693_v29 = vmax.f32 %v5141_v47, %v2692_v56  ;;  %v2699_v55 = vrot.slane %v2698_v61, 1  ;;  %v2478_v4 = vrot.slane %v2477_v7, 4 }
 0x507   :  { %v2999_v16 = vunpack.c.l.b16 %v5583_v58  ;;  %v2708_v8 = vsel %vm275_vm13, %v2326_v0, -inf  ;;  %v2685_v19 = vrot.slane %v2684_v52, 1  ;;  %v2494_v25 = vrot.slane %v2493_v30, 2 }
 0x508   :  { %v2498_v60 = vsel %vm275_vm13, %v2296_v11, -inf  ;;  %v2194_v45 = vadd.f32 %v3791_v5, %v4970_v21  ;;  %v2872_v43 = vpack.c.bf16 %v5164_v17, %v5164_v17  ;;  %4095 = vtanh.f32 %v2476_v31  ;;  %v2185_v11 = vpop.f32.mrf.mxu1 }
 0x509   :  { %v2719_v54 = vmax.f32 %v2717_v36, %v2718_v33  ;;  %v2724_v12 = vmax.f32 %v2722_v32, %v2723_v51  ;;  %4097 = vtanh.f32 %v5146_v3  ;;  %v2679_v53 = vmax.f32 %v2677_v28, %v2678_v63  ;;  %v3759_v51 = vpop.f32.mrf.mxu0 }
 0x50a   :  { %v2704_v47 = vrot.slane %v2703_v39, 2  ;;  %v2709_v56 = vrot.slane %v2708_v8, 4  ;;  %v5190_v24 = vpop.eup %4087  ;;  %v5194_v37 = vsel %vm3054_vm15, %v2999_v16, %v5106_v13  ;;  %v2700_v23 = vmax.f32 %v2698_v61, %v2699_v55 }
 0x50b   :  { %v2479_v26 = vmax.f32 %v2477_v7, %v2478_v4  ;;  %v2499_v0 = vrot.slane %v2498_v60, 4  ;;  %4099 = vtanh.f32 %v5150_v1  ;;  %v2686_v17 = vmax.f32 %v2684_v52, %v2685_v19 }
 0x50c   :  { %v2495_v36 = vmax.f32 %v2493_v30, %v2494_v25  ;;  %v2331_v3 = vadd.f32 %v4975_v27, %v2194_v45  ;;  %v5198_v28 = vunpack.c.l.b16 %v2872_v43  ;;  %4101 = vtanh.f32 %v2693_v29  ;;  %v3792_v30 = vpop.f32.mrf.mxu1 }
 0x50d   :  { %v2720_v32 = vrot.slane %v2719_v54, 1  ;;  %v2725_v33 = vrot.slane %v2724_v12, 2  ;;  %4103 = vtanh.f32 %v2679_v53  ;;  %v2705_v13 = vmax.f32 %v2703_v39, %v2704_v47 }
 0x50e   :  { %v2710_v61 = vmax.f32 %v2708_v8, %v2709_v56  ;;  %4105 = vtanh.f32 %v2700_v23  ;;  %v2480_v1 = vrot.slane %v2479_v26, 2  ;;  %v2500_v52 = vmax.f32 %v2498_v60, %v2499_v0 }
 0x50f   :  { %4107 = vtanh.f32 %v2686_v17  ;;  %v2496_v5 = vrot.slane %v2495_v36, 1  ;;  %v2743_v58 = vsel %vm275_vm13, %v2331_v3, -inf  ;;  %v2045_v16 = vadd.f32 %v2044_v34, %v4970_v21 }
 0x510   :  { %v4090_v63 = vpop.eup %4089  ;;  %v2721_v29 = vmax.f32 %v2719_v54, %v2720_v32  ;;  %v2726_v55 = vmax.f32 %v2724_v12, %v2725_v33  ;;  %v2186_v39 = vadd.f32 %v2185_v11, %v4970_v21  ;;  %v2066_v4 = vadd.f32 %v3759_v51, %v4970_v21  ;;  %v2057_v32 = vpop.f32.mrf.mxu0 }
 0x511   :  { %v4092_v8 = vpop.eup %4091  ;;  %v2706_v19 = vrot.slane %v2705_v13, 1  ;;  %v2711_v25 = vrot.slane %v2710_v61, 2  ;;  %v2294_v45 = vadd.f32 %v4997_v46, %v2045_v16  ;;  %v2197_v60 = vadd.f32 %v3792_v30, %v4970_v21 }
 0x512   :  { %v4094_v43 = vpop.eup %4093  ;;  %v2481_v53 = vmax.f32 %v2479_v26, %v2480_v1  ;;  %v2501_v47 = vrot.slane %v2500_v52, 2  ;;  %v2744_v56 = vrot.slane %v2743_v58, 4  ;;  %v2329_v34 = vadd.f32 %v4967_v9, %v2186_v39 }
 0x513   :  { %v2875_v23 = vpack.c.bf16 %v4092_v8, %v4092_v8  ;;  %v2497_v54 = vmax.f32 %v2495_v36, %v2496_v5  ;;  %v2484_v12 = vsel %vm275_vm13, %v2294_v45, -inf  ;;  %v2299_v0 = vadd.f32 %v4975_v27, %v2066_v4 }
 0x514   :  { %v2876_v11 = vpack.c.bf16 %v4090_v63, %v4090_v63  ;;  %4109 = vtanh.f32 %v2721_v29  ;;  %v2485_v17 = vrot.slane %v2484_v12, 4  ;;  %v2332_v3 = vadd.f32 %v4991_v35, %v2197_v60 }
 0x515   :  { %v4096_v33 = vpop.eup %4095  ;;  %v2874_v51 = vpack.c.bf16 %v4094_v43, %v4094_v43  ;;  %v2727_v26 = vrot.slane %v2726_v55, 1  ;;  %v2712_v1 = vmax.f32 %v2710_v61, %v2711_v25  ;;  %v2729_v30 = vsel %vm275_vm13, %v2329_v34, -inf }
 0x516   :  { %v5215_v16 = vpop.eup %4097  ;;  %v2482_v36 = vrot.slane %v2481_v53, 1  ;;  %v2502_v5 = vmax.f32 %v2500_v52, %v2501_v47  ;;  %v2745_v39 = vmax.f32 %v2743_v58, %v2744_v56  ;;  %v2519_v4 = vsel %vm275_vm13, %v2299_v0, -inf  ;;  %v2188_v56 = vpop.f32.mrf.mxu1 }
 0x517   :  { %5584 = vst [vmem:[#allocation34_spill] sm:$0xff] %v5215_v16  ;;  %v3007_v63 = vunpack.c.l.b16 %v2875_v23  ;;  %v2707_v29 = vmax.f32 %v2705_v13, %v2706_v19  ;;  %4111 = vtanh.f32 %v2497_v54  ;;  %v2058_v8 = vadd.f32 %v2057_v32, %v4970_v21  ;;  %v3760_v32 = vpop.f32.mrf.mxu0 }
 0x518   :  { %v5219_v45 = vpop.eup %4099  ;;  %v2877_v60 = vpack.c.bf16 %v4096_v33, %v4096_v33  ;;  %v2486_v43 = vmax.f32 %v2484_v12, %v2485_v17  ;;  %v2730_v7 = vrot.slane %v2729_v30, 4  ;;  %v2750_v61 = vsel %vm275_vm13, %v2332_v3, -inf  ;;  %v3795_v41 = vpop.f32.mrf.mxu1 }
 0x519   :  { %v5222_v25 = vpop.eup %4101  ;;  %v3006_v34 = vunpack.c.l.b16 %v2874_v51  ;;  %v2713_v52 = vrot.slane %v2712_v1, 1  ;;  %v2520_v58 = vrot.slane %v2519_v4, 4  ;;  %v2297_v47 = vadd.f32 %v4967_v9, %v2058_v8 }
 0x51a   :  { %5585 = vst [vmem:[#allocation35_spill] sm:$0xff] %v5222_v25  ;;  %v5225_v13 = vpop.eup %4103  ;;  %v3008_v19 = vunpack.c.l.b16 %v2876_v11  ;;  %v2483_v23 = vmax.f32 %v2481_v53, %v2482_v36  ;;  %v2503_v54 = vrot.slane %v2502_v5, 1  ;;  %v2746_v0 = vrot.slane %v2745_v39, 2 }
 0x51b   :  { %5586 = vst [vmem:[#allocation36_spill] sm:$0xff] %v5225_v13  ;;  %v5227_v12 = vpop.eup %4105  ;;  %v3075_v17 = vsel %vm3054_vm15, %v3007_v63, %v3006_v34  ;;  %v2728_v3 = vmax.f32 %v2726_v55, %v2727_v26  ;;  %v2751_v33 = vrot.slane %v2750_v61, 4  ;;  %v2505_v51 = vsel %vm275_vm13, %v2297_v47, -inf  ;;  %v2060_v26 = vpop.f32.mrf.mxu0 }
 0x51c   :  { %5587 = vst [vmem:[#allocation37_spill] sm:$0xff] %v5227_v12  ;;  %v5231_v31 = vpop.eup %4107  ;;  %v3009_v42 = vunpack.c.l.b16 %v2877_v60  ;;  %4113 = vtanh.f32 %v2707_v29  ;;  %v2487_v8 = vrot.slane %v2486_v43, 2  ;;  %v2731_v16 = vmax.f32 %v2729_v30, %v2730_v7 }
 0x51d   :  { %5588 = vst [vmem:[#allocation38_spill] sm:$0xff] %v5231_v31  ;;  %v2714_v38 = vmax.f32 %v2712_v1, %v2713_v52  ;;  %v2521_v11 = vmax.f32 %v2519_v4, %v2520_v58  ;;  %v2506_v53 = vrot.slane %v2505_v51, 4  ;;  %v2189_v36 = vadd.f32 %v2188_v56, %v4970_v21  ;;  %v2201_v56 = vpop.f32.mrf.mxu1 }
 0x51e   :  { %v3076_v12 = vsel %vm3056_vm0, %v3008_v19, %v3075_v17  ;;  %4115 = vtanh.f32 %v2483_v23  ;;  %v2504_v63 = vmax.f32 %v2502_v5, %v2503_v54  ;;  %v2747_v55 = vmax.f32 %v2745_v39, %v2746_v0  ;;  %v3763_v19 = vpop.f32.mrf.mxu0 }
 0x51f   :  { %v2752_v34 = vmax.f32 %v2750_v61, %v2751_v33  ;;  %v2507_v47 = vmax.f32 %v2505_v51, %v2506_v53  ;;  %v2330_v25 = vadd.f32 %v4977_v50, %v2189_v36  ;;  %v2069_v29 = vadd.f32 %v3760_v32, %v4970_v21 }
 0x520   :  { %4117 = vtanh.f32 %v2728_v3  ;;  %v2488_v7 = vmax.f32 %v2486_v43, %v2487_v8  ;;  %v2732_v1 = vrot.slane %v2731_v16, 2  ;;  %v2210_v30 = vadd.f32 %v3795_v41, %v4970_v21 }
 0x521   :  { %v5238_v4 = vpop.eup %4109  ;;  %v5590_v60 = vpack.c.bf16 %v5177_v15, %v5177_v15  ;;  %v5591_v5 = vpack.c.bf16 %v5190_v24, %v5190_v24  ;;  %4119 = vtanh.f32 %v2714_v38  ;;  %v2522_v61 = vrot.slane %v2521_v11, 2 }
 0x522   :  { %5589 = vst [vmem:[#allocation39_spill] sm:$0xff] %v5238_v4  ;;  %v5253_v58 = vsel %vm3058_vm1, %v3009_v42, %v3076_v12  ;;  %4121 = vtanh.f32 %v2504_v63  ;;  %v2748_v41 = vrot.slane %v2747_v55, 1  ;;  %v2753_v15 = vrot.slane %v2752_v34, 2 }
 0x523   :  { %v5243_v52 = vunpack.c.l.b16 %v5590_v60  ;;  %v5248_v39 = vunpack.c.l.b16 %v5591_v5  ;;  %v2508_v23 = vrot.slane %v2507_v47, 2  ;;  %v2736_v54 = vsel %vm275_vm13, %v2330_v25, -inf }
 0x524   :  { %v2300_v24 = vadd.f32 %v4991_v35, %v2069_v29  ;;  %v4112_v0 = vpop.eup %4111  ;;  %v2489_v32 = vrot.slane %v2488_v7, 1  ;;  %v2733_v38 = vmax.f32 %v2731_v16, %v2732_v1  ;;  %v2335_v17 = vadd.f32 %v5031_v14, %v2210_v30 }
 0x525   :  { %v2061_v3 = vadd.f32 %v2060_v26, %v4970_v21  ;;  %v2523_v33 = vmax.f32 %v2521_v11, %v2522_v61  ;;  %v2202_v12 = vadd.f32 %v2201_v56, %v4970_v21  ;;  %v2082_v51 = vadd.f32 %v3763_v19, %v4970_v21  ;;  %v3796_v19 = vpop.f32.mrf.mxu1 }
 0x526   :  { %v2526_v42 = vsel %vm275_vm13, %v2300_v24, -inf  ;;  %v2749_v8 = vmax.f32 %v2747_v55, %v2748_v41  ;;  %v2737_v53 = vrot.slane %v2736_v54, 4  ;;  %v2880_v63 = vpack.c.bf16 %v4112_v0, %v4112_v0  ;;  %v2073_v24 = vpop.f32.mrf.mxu0 }
 0x527   :  { %v2527_v36 = vrot.slane %v2526_v42, 4  ;;  %v2298_v25 = vadd.f32 %v4977_v50, %v2061_v3  ;;  %v2509_v29 = vmax.f32 %v2507_v47, %v2508_v23  ;;  %v2333_v16 = vadd.f32 %v4987_v59, %v2202_v12 }
 0x528   :  { %v2303_v1 = vadd.f32 %v5031_v14, %v2082_v51  ;;  %v2754_v30 = vmax.f32 %v2752_v34, %v2753_v15  ;;  %v2771_v11 = vsel %vm275_vm13, %v2335_v17, -inf  ;;  %v2490_v61 = vmax.f32 %v2488_v7, %v2489_v32 }
 0x529   :  { %v2528_v26 = vmax.f32 %v2526_v42, %v2527_v36  ;;  %v2512_v60 = vsel %vm275_vm13, %v2298_v25, -inf  ;;  %v5267_v5 = vpop.eup %4113  ;;  %v2734_v55 = vrot.slane %v2733_v38, 1  ;;  %v2524_v41 = vrot.slane %v2523_v33, 1 }
 0x52a   :  { %5592 = vst [vmem:[#allocation40_spill] sm:$0xff] %v5267_v5  ;;  %v2513_v56 = vrot.slane %v2512_v60, 4  ;;  %v2738_v0 = vmax.f32 %v2736_v54, %v2737_v53  ;;  %v2757_v23 = vsel %vm275_vm13, %v2333_v16, -inf  ;;  %v2547_v3 = vsel %vm275_vm13, %v2303_v1, -inf  ;;  %v3764_v16 = vpop.f32.mrf.mxu0 }
 0x52b   :  { %v2529_v47 = vrot.slane %v2528_v26, 2  ;;  %v4116_v34 = vpop.eup %4115  ;;  %4123 = vtanh.f32 %v2749_v8  ;;  %v2510_v15 = vrot.slane %v2509_v29, 1  ;;  %v2772_v17 = vrot.slane %v2771_v11, 4 }
 0x52c   :  { %v2514_v42 = vmax.f32 %v2512_v60, %v2513_v56  ;;  %v2755_v12 = vrot.slane %v2754_v30, 1  ;;  %v2548_v36 = vrot.slane %v2547_v3, 4  ;;  %v2213_v7 = vadd.f32 %v3796_v19, %v4970_v21 }
 0x52d   :  { %v2530_v51 = vmax.f32 %v2528_v26, %v2529_v47  ;;  %v5272_v32 = vpop.eup %4117  ;;  %4125 = vtanh.f32 %v2490_v61  ;;  %v2735_v54 = vmax.f32 %v2733_v38, %v2734_v55  ;;  %v2758_v25 = vrot.slane %v2757_v23, 4 }
 0x52e   :  { %5593 = vst [vmem:[#allocation41_spill] sm:$0xff] %v5272_v32  ;;  %v2515_v53 = vrot.slane %v2514_v42, 2  ;;  %v5274_v43 = vpop.eup %4119  ;;  %v2878_v1 = vpack.c.bf16 %v4116_v34, %v4116_v34  ;;  %v2525_v8 = vmax.f32 %v2523_v33, %v2524_v41  ;;  %v2739_v4 = vrot.slane %v2738_v0, 2  ;;  %v2204_v33 = vpop.f32.mrf.mxu1 }
 0x52f   :  { %5594 = vst [vmem:[#allocation42_spill] sm:$0xff] %v5274_v43  ;;  %v2549_v5 = vmax.f32 %v2547_v3, %v2548_v36  ;;  %v5276_v60 = vpop.eup %4121  ;;  %v5278_v26 = vunpack.c.l.b16 %v2880_v63  ;;  %v2511_v56 = vmax.f32 %v2509_v29, %v2510_v15  ;;  %v2773_v19 = vmax.f32 %v2771_v11, %v2772_v17  ;;  %v2076_v41 = vpop.f32.mrf.mxu0 }
 0x530   :  { %v2516_v47 = vmax.f32 %v2514_v42, %v2515_v53  ;;  %v2531_v32 = vrot.slane %v2530_v51, 1  ;;  %v2336_v38 = vadd.f32 %v5051_v10, %v2213_v7  ;;  %v2074_v61 = vadd.f32 %v2073_v24, %v4970_v21 }
 0x531   :  { %v2550_v31 = vrot.slane %v2549_v5, 2  ;;  %4127 = vtanh.f32 %v2735_v54  ;;  %v2756_v55 = vmax.f32 %v2754_v30, %v2755_v12  ;;  %v2759_v34 = vmax.f32 %v2757_v23, %v2758_v25  ;;  %v3767_v54 = vpop.f32.mrf.mxu0 }
 0x532   :  { %v2517_v43 = vrot.slane %v2516_v47, 1  ;;  %v3010_v3 = vunpack.c.l.b16 %v2878_v1  ;;  %v2881_v63 = vpack.c.bf16 %v5276_v60, %v5276_v60  ;;  %4129 = vtanh.f32 %v2525_v8 }
 0x533   :  { %v2740_v29 = vmax.f32 %v2738_v0, %v2739_v4  ;;  %4131 = vtanh.f32 %v2511_v56  ;;  %v2774_v11 = vrot.slane %v2773_v19, 2  ;;  %v2551_v17 = vmax.f32 %v2549_v5, %v2550_v31 }
 0x534   :  { %v2518_v15 = vmax.f32 %v2516_v47, %v2517_v43  ;;  %v2532_v42 = vmax.f32 %v2530_v51, %v2531_v32  ;;  %v2778_v36 = vsel %vm275_vm13, %v2336_v38, -inf  ;;  %v2301_v24 = vadd.f32 %v4987_v59, %v2074_v61  ;;  %v2089_v47 = vpop.f32.mrf.mxu0 }
 0x535   :  { %v2205_v30 = vadd.f32 %v2204_v33, %v4970_v21  ;;  %v2760_v23 = vrot.slane %v2759_v34, 2  ;;  %v2552_v12 = vrot.slane %v2551_v17, 1  ;;  %v2085_v7 = vadd.f32 %v3764_v16, %v4970_v21 }
 0x536   :  { %4133 = vtanh.f32 %v2518_v15  ;;  %v5290_v4 = vsel %vm3060_vm2, %v3010_v3, %v5253_v58  ;;  %v2533_v43 = vsel %vm275_vm13, %v2301_v24, -inf  ;;  %v2077_v5 = vadd.f32 %v2076_v41, %v4970_v21 }
 0x537   :  { %v2334_v31 = vadd.f32 %v4997_v46, %v2205_v30  ;;  %4135 = vtanh.f32 %v2756_v55  ;;  %v2741_v0 = vrot.slane %v2740_v29, 1  ;;  %v2779_v51 = vrot.slane %v2778_v36, 4 }
 0x538   :  { %v2534_v32 = vrot.slane %v2533_v43, 4  ;;  %v5295_v53 = vpop.eup %4123  ;;  %4137 = vtanh.f32 %v2532_v42  ;;  %v2304_v16 = vadd.f32 %v5051_v10, %v2085_v7  ;;  %v2302_v58 = vadd.f32 %v4997_v46, %v2077_v5 }
 0x539   :  { %5595 = vst [vmem:[#allocation43_spill] sm:$0xff] %v5295_v53  ;;  %v2764_v25 = vsel %vm275_vm13, %v2334_v31, -inf  ;;  %v2775_v1 = vmax.f32 %v2773_v19, %v2774_v11  ;;  %v2761_v8 = vmax.f32 %v2759_v34, %v2760_v23  ;;  %v2553_v60 = vmax.f32 %v2551_v17, %v2552_v12 }
 0x53a   :  { %v2535_v56 = vmax.f32 %v2533_v43, %v2534_v32  ;;  %v4126_v38 = vpop.eup %4125  ;;  %v2765_v61 = vrot.slane %v2764_v25, 4  ;;  %v2554_v55 = vsel %vm275_vm13, %v2304_v16, -inf  ;;  %v2540_v33 = vsel %vm275_vm13, %v2302_v58, -inf }
 0x53b   :  { %v2098_v41 = vadd.f32 %v3767_v54, %v4970_v21  ;;  %v2780_v3 = vmax.f32 %v2778_v36, %v2779_v51  ;;  %v2555_v42 = vrot.slane %v2554_v55, 4  ;;  %v2541_v24 = vrot.slane %v2540_v33, 4 }
 0x53c   :  { %v2536_v15 = vrot.slane %v2535_v56, 2  ;;  %v2742_v30 = vmax.f32 %v2740_v29, %v2741_v0  ;;  %v2766_v7 = vmax.f32 %v2764_v25, %v2765_v61  ;;  %v2090_v34 = vadd.f32 %v2089_v47, %v4970_v21 }
 0x53d   :  { %v2307_v19 = vadd.f32 %v4975_v27, %v2098_v41  ;;  %v2879_v11 = vpack.c.bf16 %v4126_v38, %v4126_v38  ;;  %v2556_v23 = vmax.f32 %v2554_v55, %v2555_v42  ;;  %v2542_v12 = vmax.f32 %v2540_v33, %v2541_v24  ;;  %v3768_v42 = vpop.f32.mrf.mxu0 }
 0x53e   :  { %v2537_v17 = vmax.f32 %v2535_v56, %v2536_v15  ;;  %v5305_v43 = vpop.eup %4127  ;;  %v2776_v31 = vrot.slane %v2775_v1, 1  ;;  %v2762_v5 = vrot.slane %v2761_v8, 1  ;;  %4139 = vtanh.f32 %v2553_v60 }
 0x53f   :  { %v2575_v36 = vsel %vm275_vm13, %v2307_v19, -inf  ;;  %v4130_v54 = vpop.eup %4129  ;;  %v2781_v51 = vrot.slane %v2780_v3, 2  ;;  %v2557_v0 = vrot.slane %v2556_v23, 2  ;;  %v2543_v32 = vrot.slane %v2542_v12, 2 }
 0x540   :  { %v2538_v29 = vrot.slane %v2537_v17, 1  ;;  %v4132_v27 = vpop.eup %4131  ;;  %v5308_v25 = vunpack.c.l.b16 %v2881_v63  ;;  %v2767_v16 = vrot.slane %v2766_v7, 2  ;;  %v2576_v58 = vrot.slane %v2575_v36, 4 }
 0x541   :  { %v2305_v56 = vadd.f32 %v4967_v9, %v2090_v34  ;;  %v3011_v47 = vunpack.c.l.b16 %v2879_v11  ;;  %4141 = vtanh.f32 %v2742_v30  ;;  %v2558_v61 = vmax.f32 %v2556_v23, %v2557_v0 }
 0x542   :  { %v2539_v38 = vmax.f32 %v2537_v17, %v2538_v29  ;;  %v2884_v60 = vpack.c.bf16 %v4130_v54, %v4130_v54  ;;  %v2777_v33 = vmax.f32 %v2775_v1, %v2776_v31  ;;  %v2544_v41 = vmax.f32 %v2542_v12, %v2543_v32  ;;  %v2092_v12 = vpop.f32.mrf.mxu0 }
 0x543   :  { %v4134_v55 = vpop.eup %4133  ;;  %v2577_v15 = vmax.f32 %v2575_v36, %v2576_v58  ;;  %v2763_v24 = vmax.f32 %v2761_v8, %v2762_v5  ;;  %v2782_v19 = vmax.f32 %v2780_v3, %v2781_v51  ;;  %v2559_v53 = vrot.slane %v2558_v61, 1 }
 0x544   :  { %4143 = vtanh.f32 %v2539_v38  ;;  %v5311_v63 = vpop.eup %4135  ;;  %v2882_v62 = vpack.c.bf16 %v4132_v27, %v4132_v27  ;;  %v2768_v13 = vmax.f32 %v2766_v7, %v2767_v16  ;;  %v2545_v20 = vrot.slane %v2544_v41, 1  ;;  %v3771_v58 = vpop.f32.mrf.mxu0 }
 0x545   :  { %v2561_v9 = vsel %vm275_vm13, %v2305_v56, -inf  ;;  %v4138_v30 = vpop.eup %4137  ;;  %v2883_v34 = vpack.c.bf16 %v4134_v55, %v4134_v55  ;;  %v2578_v11 = vrot.slane %v2577_v15, 2  ;;  %v2101_v1 = vadd.f32 %v3768_v42, %v4970_v21 }
 0x546   :  { %v2562_v17 = vrot.slane %v2561_v9, 4  ;;  %v5317_v23 = vsel %vm3062_vm3, %v3011_v47, %v5290_v4  ;;  %4145 = vtanh.f32 %v2777_v33  ;;  %v2560_v8 = vmax.f32 %v2558_v61, %v2559_v53 }
 0x547   :  { %v2546_v3 = vmax.f32 %v2544_v41, %v2545_v20  ;;  %v3016_v31 = vunpack.c.l.b16 %v2884_v60  ;;  %4147 = vtanh.f32 %v2763_v24  ;;  %v2783_v7 = vrot.slane %v2782_v19, 1 }
 0x548   :  { %v2563_v5 = vmax.f32 %v2561_v9, %v2562_v17  ;;  %v3014_v36 = vunpack.c.l.b16 %v2882_v62  ;;  %v2885_v54 = vpack.c.bf16 %v4138_v30, %v4138_v30  ;;  %v2769_v51 = vrot.slane %v2768_v13, 1 }
 0x549   :  { %4149 = vtanh.f32 %v2546_v3  ;;  %v3015_v29 = vunpack.c.l.b16 %v2883_v34  ;;  %v2579_v0 = vmax.f32 %v2577_v15, %v2578_v11  ;;  %v2308_v27 = vadd.f32 %v4991_v35, %v2101_v1  ;;  %v2105_v11 = vpop.f32.mrf.mxu0 }
 0x54a   :  { %v2564_v32 = vrot.slane %v2563_v5, 2  ;;  %4151 = vtanh.f32 %v2560_v8  ;;  %v2093_v4 = vadd.f32 %v2092_v12, %v4970_v21  ;;  %v5596_v53 = vrot.slane %v5058_v18, 1 }
 0x54b   :  { %v2382_v16 = vrot.slane %v5062_v44, 2  ;;  %v4140_v56 = vpop.eup %4139  ;;  %v5325_v62 = vmax.f32 %v2782_v19, %v2783_v7  ;;  %v2582_v38 = vsel %vm275_vm13, %v2308_v27, -inf  ;;  %v5597_v61 = vrot.slane %v5065_v48, 4 }
 0x54c   :  { %v2364_v20 = vmax.f32 %v5058_v18, %v5596_v53  ;;  %v2565_v47 = vmax.f32 %v2563_v5, %v2564_v32  ;;  %v2770_v55 = vmax.f32 %v2768_v13, %v2769_v51  ;;  %v2583_v60 = vrot.slane %v2582_v38, 4  ;;  %v3772_v32 = vpop.f32.mrf.mxu0 }
 0x54d   :  { %v2388_v35 = vmax.f32 %v5065_v48, %v5597_v61  ;;  %v2306_v33 = vadd.f32 %v4977_v50, %v2093_v4  ;;  %v2383_v41 = vmax.f32 %v5062_v44, %v2382_v16  ;;  %v3017_v18 = vunpack.c.l.b16 %v2885_v54 }
 0x54e   :  { %v3082_v15 = vsel %vm3054_vm15, %v3015_v29, %v3014_v36  ;;  %4153 = vtanh.f32 %v2364_v20  ;;  %v5334_v24 = vpop.eup %4141  ;;  %v2580_v19 = vrot.slane %v2579_v0, 1  ;;  %v2584_v9 = vmax.f32 %v2582_v38, %v2583_v60  ;;  %v2108_v60 = vpop.f32.mrf.mxu0 }
 0x54f   :  { %v2389_v42 = vrot.slane %v2388_v35, 2  ;;  %v2568_v30 = vsel %vm275_vm13, %v2306_v33, -inf  ;;  %v2384_v34 = vrot.slane %v2383_v41, 1  ;;  %v2888_v48 = vpack.c.bf16 %v4140_v56, %v4140_v56 }
 0x550   :  { %v2566_v13 = vrot.slane %v2565_v47, 1  ;;  %v2569_v17 = vrot.slane %v2568_v30, 4  ;;  %4155 = vtanh.f32 %v2770_v55  ;;  %v2585_v44 = vrot.slane %v2584_v9, 2 }
 0x551   :  { %v2390_v1 = vmax.f32 %v2388_v35, %v2389_v42  ;;  %v4144_v50 = vpop.eup %4143  ;;  %v2385_v8 = vmax.f32 %v2383_v41, %v2384_v34  ;;  %v2860_v3 = vpack.c.bf16 %v5103_v6, %v5103_v6  ;;  %v3083_v12 = vsel %vm3056_vm0, %v3016_v31, %v3082_v15 }
 0x552   :  { %v2886_v7 = vpack.c.bf16 %v4144_v50, %v4144_v50  ;;  %v2570_v5 = vmax.f32 %v2568_v30, %v2569_v17  ;;  %v2581_v54 = vmax.f32 %v2579_v0, %v2580_v19  ;;  %v2873_v51 = vpack.c.bf16 %v5219_v45, %v5219_v45 }
 0x553   :  { %v2391_v36 = vrot.slane %v2390_v1, 1  ;;  %4157 = vtanh.f32 %v2385_v8  ;;  %v3069_v29 = vsel %vm3056_vm0, %v5097_v57, %v5194_v37  ;;  %v5345_v27 = vpop.eup %4145  ;;  %v5347_v4 = vunpack.c.l.b16 %v2888_v48 }
 0x554   :  { %v2567_v6 = vmax.f32 %v2565_v47, %v2566_v13  ;;  %v2571_v53 = vrot.slane %v2570_v5, 2  ;;  %v5349_v20 = vpop.eup %4147  ;;  %v3018_v16 = vunpack.c.l.b16 %v2886_v7  ;;  %v2586_v0 = vmax.f32 %v2584_v9, %v2585_v44 }
 0x555   :  { %v2392_v31 = vmax.f32 %v2390_v1, %v2391_v36  ;;  %v2992_v56 = vunpack.c.l.b16 %v2860_v3  ;;  %v2114_v38 = vadd.f32 %v3771_v58, %v4970_v21  ;;  %v3084_v61 = vsel %vm3058_vm1, %v3017_v18, %v3083_v12 }
 0x556   :  { %v4150_v45 = vpop.eup %4149  ;;  %v2572_v35 = vmax.f32 %v2570_v5, %v2571_v53  ;;  %v3070_v57 = vsel %vm3058_vm1, %v5136_v40, %v3069_v29  ;;  %v5355_v47 = vunpack.c.l.b16 %v2873_v51  ;;  %v3085_v18 = vsel %vm3060_vm2, %v3018_v16, %v3084_v61 }
 0x557   :  { %4159 = vtanh.f32 %v2392_v31  ;;  %v2887_v37 = vpack.c.bf16 %v4150_v45, %v4150_v45  ;;  %v3057_v55 = vsel %vm3056_vm0, %v2992_v56, %v5077_v2  ;;  %v4152_v33 = vpop.eup %4151  ;;  %v2311_v58 = vadd.f32 %v5031_v14, %v2114_v38 }
 0x558   :  { %4161 = vtanh.f32 %v2581_v54  ;;  %v2573_v41 = vrot.slane %v2572_v35, 1  ;;  %v2587_v15 = vrot.slane %v2586_v0, 1  ;;  %v3071_v40 = vsel %vm3060_vm2, %v5243_v52, %v3070_v57 }
 0x559   :  { %4163 = vtanh.f32 %v2567_v6  ;;  %v2106_v42 = vadd.f32 %v2105_v11, %v4970_v21  ;;  %v2603_v9 = vsel %vm275_vm13, %v2311_v58, -inf  ;;  %v2117_v2 = vadd.f32 %v3772_v32, %v4970_v21 }
 0x55a   :  { %v2574_v19 = vmax.f32 %v2572_v35, %v2573_v41  ;;  %v2109_v30 = vadd.f32 %v2108_v60, %v4970_v21  ;;  %v2889_v48 = vpack.c.bf16 %v4152_v33, %v4152_v33  ;;  %v3019_v13 = vunpack.c.l.b16 %v2887_v37 }
 0x55b   :  { %v4154_v34 = vpop.eup %4153  ;;  %v2604_v17 = vrot.slane %v2603_v9, 4  ;;  %v2309_v14 = vadd.f32 %v4987_v59, %v2106_v42  ;;  %v2312_v52 = vadd.f32 %v5051_v10, %v2117_v2  ;;  %v2588_v50 = vmax.f32 %v2586_v0, %v2587_v15 }
 0x55c   :  { %4165 = vtanh.f32 %v2574_v19  ;;  %v2861_v1 = vpack.c.bf16 %v4154_v34, %v4154_v34  ;;  %v2310_v11 = vadd.f32 %v4997_v46, %v2109_v30  ;;  %v3072_v44 = vsel %vm3062_vm3, %v5248_v39, %v3071_v40 }
 0x55d   :  { %v2605_v8 = vmax.f32 %v2603_v9, %v2604_v17  ;;  %v2589_v21 = vsel %vm275_vm13, %v2309_v14, -inf  ;;  %v5373_v3 = vpop.eup %4155  ;;  %v2610_v59 = vsel %vm275_vm13, %v2312_v52, -inf  ;;  %v3086_v36 = vsel %vm3062_vm3, %v3019_v13, %v3085_v18  ;;  %v5598_v52 = vld [vmem:[#allocation32_spill] sm:$0xff] }
 0x55e   :  { %v2993_v12 = vunpack.c.l.b16 %v2861_v1  ;;  %v2590_v7 = vrot.slane %v2589_v21, 4  ;;  %v2596_v5 = vsel %vm275_vm13, %v2310_v11, -inf  ;;  %v2611_v54 = vrot.slane %v2610_v59, 4 }
 0x55f   :  { %v2606_v10 = vrot.slane %v2605_v8, 2  ;;  %v2597_v46 = vrot.slane %v2596_v5, 4  ;;  %v3021_v29 = vunpack.c.l.b16 %v2889_v48  ;;  %v3073_v32 = vsel %vm3064_vm4, %v5198_v28, %v3072_v44 }
 0x560   :  { %v4158_v51 = vpop.eup %4157  ;;  %v3059_v39 = vsel %vm3058_vm1, %v2993_v12, %v3057_v55  ;;  %v2591_v6 = vmax.f32 %v2589_v21, %v2590_v7  ;;  %v2612_v0 = vmax.f32 %v2610_v59, %v2611_v54  ;;  %v3087_v61 = vsel %vm3064_vm4, %v5347_v4, %v3086_v36  ;;  %v5602_v21 = vld [vmem:[#allocation35_spill] sm:$0xff] }
 0x561   :  { %v2864_v53 = vpack.c.bf16 %v4158_v51, %v4158_v51  ;;  %v3061_v31 = vsel %vm3060_vm2, %v5081_v22, %v3059_v39  ;;  %v2607_v16 = vmax.f32 %v2605_v8, %v2606_v10  ;;  %v2598_v45 = vmax.f32 %v2596_v5, %v2597_v46  ;;  %v5605_v36 = vld [vmem:[#allocation43_spill] sm:$0xff]  ;;  %v5608_v39 = vld [vmem:[#allocation29_spill] sm:$0xff] }
 0x562   :  { %v3063_v56 = vsel %vm3062_vm3, %v5095_v49, %v3061_v31  ;;  %v2592_v38 = vrot.slane %v2591_v6, 2  ;;  %4167 = vtanh.f32 %v2588_v50  ;;  %v2613_v28 = vrot.slane %v2612_v0, 2  ;;  %v5600_v50 = vld [vmem:[#allocation28_spill] sm:$0xff]  ;;  %v5606_v46 = vld [vmem:[#allocation27_spill] sm:$0xff] }
 0x563   :  { %v2996_v57 = vunpack.c.l.b16 %v2864_v53  ;;  %v2608_v37 = vrot.slane %v2607_v16, 1  ;;  %v2599_v22 = vrot.slane %v2598_v45, 2  ;;  %v3080_v41 = vsel %vm3064_vm4, %v5278_v26, %v5317_v23  ;;  %v5610_v53 = vld [vmem:[#allocation30_spill] sm:$0xff] }
 0x564   :  { %v4160_v35 = vpop.eup %4159  ;;  %v2593_v33 = vmax.f32 %v2591_v6, %v2592_v38  ;;  %v2614_v15 = vmax.f32 %v2612_v0, %v2613_v28  ;;  %v3088_v4 = vsel %vm3066_vm5, %v3021_v29, %v3087_v61  ;;  %v3074_v42 = vsel %vm3066_vm5, %v5355_v47, %v3073_v32 }
 0x565   :  { %v5387_v55 = vpop.eup %4161  ;;  %v2865_v60 = vpack.c.bf16 %v4160_v35, %v4160_v35  ;;  %v3065_v58 = vsel %vm3064_vm4, %v2996_v57, %v3063_v56  ;;  %v2609_v18 = vmax.f32 %v2607_v16, %v2608_v37  ;;  %v2600_v9 = vmax.f32 %v2598_v45, %v2599_v22  ;;  %v5611_v56 = vld [vmem:[#allocation34_spill] sm:$0xff]  ;;  %v5612_v57 = vld [vmem:[#allocation37_spill] sm:$0xff] }
 0x566   :  { %v4164_v49 = vpop.eup %4163  ;;  %v2594_v19 = vrot.slane %v2593_v33, 1  ;;  %v2915_v2 = vpack.c.bf16 %v5334_v24, %v5334_v24  ;;  %4169 = vtanh.f32 %v5325_v62  ;;  %v2615_v30 = vrot.slane %v2614_v15, 1  ;;  %v5599_v62 = vld [vmem:[#allocation36_spill] sm:$0xff] }
 0x567   :  { %v2997_v40 = vunpack.c.l.b16 %v2865_v60  ;;  %v3081_v26 = vsel %vm3066_vm5, %v5308_v25, %v3080_v41  ;;  %v2601_v48 = vrot.slane %v2600_v9, 1  ;;  %v2914_v47 = vpack.c.bf16 %v5305_v43, %v5305_v43  ;;  %v5603_v43 = vld [vmem:[#allocation38_spill] sm:$0xff] }
 0x568   :  { %v2595_v34 = vmax.f32 %v2593_v33, %v2594_v19  ;;  %v3118_v13 = vpack.c.b16 %v3088_v4, %v3081_v26  ;;  %4171 = vtanh.f32 %v2609_v18  ;;  %v2616_v1 = vmax.f32 %v2614_v15, %v2615_v30  ;;  %v5613_v15 = vld [vmem:[#allocation40_spill] sm:$0xff]  ;;  %v5614_v19 = vld [vmem:[#allocation42_spill] sm:$0xff] }
 0x569   :  { %v3067_v23 = vsel %vm3066_vm5, %v2997_v40, %v3065_v58  ;;  %v4166_v17 = vpop.eup %4165  ;;  %v2902_v24 = vpack.c.bf16 %v5598_v52, %v5598_v52  ;;  %v2906_v11 = vpack.c.bf16 %v5599_v62, %v5599_v62  ;;  %v2602_v25 = vmax.f32 %v2600_v9, %v2601_v48  ;;  %v5615_v62 = vld [vmem:[#allocation31_spill] sm:$0xff] }
 0x56a   :  { %v3117_v14 = vpack.c.b16 %v3074_v42, %v3067_v23  ;;  %4173 = vtanh.f32 %v2595_v34  ;;  %v5601_v44 = vpack.c.bf16 %v5600_v50, %v5600_v50  ;;  %v2908_v12 = vpack.c.bf16 %v5602_v21, %v5602_v21 }
 0x56b   :  { %v3047_v7 = vunpack.c.l.b16 %v2915_v2  ;;  %4175 = vtanh.f32 %v2616_v1  ;;  %v5604_v59 = vpack.c.bf16 %v5603_v43, %v5603_v43  ;;  %v2916_v10 = vpack.c.bf16 %v5605_v36, %v5605_v36 }
 0x56c   :  { %v3030_v8 = vunpack.c.l.b16 %v5601_v44  ;;  %3805 = vmatprep.mubr.msk.bf16.mxu1 %vm275_vm13, %v3117_v14  ;;  %v2891_v54 = vpack.c.bf16 %v4166_v17, %v4166_v17  ;;  %4177 = vtanh.f32 %v2602_v25  ;;  %v5607_v51 = vpack.c.bf16 %v5606_v46, %v5606_v46  ;;  %v5616_v25 = vld [vmem:[#allocation39_spill] sm:$0xff] }
 0x56d   :  { %v3039_v5 = vunpack.c.l.b16 %v5604_v59  ;;  %3806 = vmatmul.mubr.msk.bf16.vlgmr.msra.gmra.mxu1 %vm275_vm13, %v3118_v13  ;;  %v5609_v32 = vpack.c.bf16 %v5608_v39, %v5608_v39  ;;  %v3046_v16 = vunpack.c.l.b16 %v2914_v47  ;;  %v3034_v0 = vunpack.c.l.b16 %v2902_v24 }
 0x56e   :  { %v3032_v29 = vunpack.c.l.b16 %v5607_v51  ;;  %v3096_v31 = vsel %vm3054_vm15, %v5610_v53, %v3030_v8  ;;  %v2903_v38 = vpack.c.bf16 %v5611_v56, %v5611_v56  ;;  %v3038_v45 = vunpack.c.l.b16 %v2906_v11 }
 0x56f   :  { %v3033_v6 = vunpack.c.l.b16 %v5609_v32  ;;  %v2890_v61 = vpack.c.bf16 %v4164_v49, %v4164_v49  ;;  %v3040_v35 = vunpack.c.l.b16 %v2908_v12  ;;  %v2909_v37 = vpack.c.bf16 %v5612_v57, %v5612_v57  ;;  %v4168_v33 = vpop.eup %4167  ;;  %v5617_v12 = vld [vmem:[#allocation33_spill] sm:$0xff] }
 0x570   :  { %v2917_v28 = vpack.c.bf16 %v5311_v63, %v5311_v63  ;;  %v3110_v60 = vsel %vm3054_vm15, %v3047_v7, %v3046_v16  ;;  %v3103_v22 = vsel %vm3054_vm15, %v3039_v5, %v3038_v45  ;;  %v3048_v41 = vunpack.c.l.b16 %v2916_v10 }
 0x571   :  { %v2918_v58 = vpack.c.bf16 %v5349_v20, %v5349_v20  ;;  %v3023_v18 = vunpack.c.l.b16 %v2891_v54  ;;  %v2910_v49 = vpack.c.bf16 %v5613_v15, %v5613_v15  ;;  %v2919_v4 = vpack.c.bf16 %v5373_v3, %v5373_v3 }
 0x572   :  { %v2892_v40 = vpack.c.bf16 %v5387_v55, %v5387_v55  ;;  %v3097_v63 = vsel %vm3056_vm0, %v3032_v29, %v3096_v31  ;;  %v3035_v42 = vunpack.c.l.b16 %v2903_v38  ;;  %v2911_v9 = vpack.c.bf16 %v5614_v19, %v5614_v19  ;;  %v5618_v38 = vld [vmem:[#allocation41_spill] sm:$0xff] }
 0x573   :  { %v3022_v2 = vunpack.c.l.b16 %v2890_v61  ;;  %v3111_v30 = vsel %vm3056_vm0, %v3048_v41, %v3110_v60  ;;  %v3041_v20 = vunpack.c.l.b16 %v2909_v37  ;;  %v3049_v26 = vunpack.c.l.b16 %v2917_v28  ;;  %v4170_v3 = vpop.eup %4169 }
 0x574   :  { %v2920_v23 = vpack.c.bf16 %v5345_v27, %v5345_v27  ;;  %v3104_v34 = vsel %vm3056_vm0, %v3040_v35, %v3103_v22  ;;  %v3050_v48 = vunpack.c.l.b16 %v2918_v58  ;;  %v2893_v13 = vpack.c.bf16 %v4168_v33, %v4168_v33 }
 0x575   :  { %v3089_v55 = vsel %vm3054_vm15, %v3023_v18, %v3022_v2  ;;  %v3098_v17 = vsel %vm3058_vm1, %v3033_v6, %v3097_v63  ;;  %v3042_v47 = vunpack.c.l.b16 %v2910_v49  ;;  %v3051_v14 = vunpack.c.l.b16 %v2919_v4  ;;  %v4172_v24 = vpop.eup %4171 }
 0x576   :  { %v3024_v1 = vunpack.c.l.b16 %v2892_v40  ;;  %v3112_v52 = vsel %vm3058_vm1, %v3049_v26, %v3111_v30  ;;  %v2904_v11 = vpack.c.bf16 %v5615_v62, %v5615_v62  ;;  %v2912_v27 = vpack.c.bf16 %v5616_v25, %v5616_v25  ;;  %v4196_v30 = vld [vmem:[#allocation15] sm:$0xff] }
 0x577   :  { %v3043_v50 = vunpack.c.l.b16 %v2911_v9  ;;  %v3105_v44 = vsel %vm3058_vm1, %v3041_v20, %v3104_v34  ;;  %v4174_v8 = vpop.eup %4173  ;;  %v3052_v21 = vunpack.c.l.b16 %v2920_v23  ;;  %v2905_v7 = vpack.c.bf16 %v5617_v12, %v5617_v12  ;;  %v5619_v20 = vld [vmem:[#allocation24_spill] sm:$0xff] }
 0x578   :  { %v3090_v43 = vsel %vm3056_vm0, %v3024_v1, %v3089_v55  ;;  %v3099_v59 = vsel %vm3060_vm2, %v3034_v0, %v3098_v17  ;;  %v4176_v5 = vpop.eup %4175  ;;  %v3025_v36 = vunpack.c.l.b16 %v2893_v13  ;;  %v2894_v10 = vpack.c.bf16 %v4174_v8, %v4174_v8 }
 0x579   :  { %v3100_v54 = vsel %vm3062_vm3, %v3035_v42, %v3099_v59  ;;  %v3113_v46 = vsel %vm3060_vm2, %v3050_v48, %v3112_v52  ;;  %v4178_v51 = vpop.eup %4177  ;;  %v2896_v29 = vpack.c.bf16 %v4172_v24, %v4172_v24  ;;  %v2921_v39 = vpack.c.bf16 %v4170_v3, %v4170_v3 }
 0x57a   :  { %v3106_v32 = vsel %vm3060_vm2, %v3042_v47, %v3105_v44  ;;  %v3114_v6 = vsel %vm3062_vm3, %v3051_v14, %v3113_v46  ;;  %v3026_v53 = vunpack.c.l.b16 %v2894_v10  ;;  %v2895_v31 = vpack.c.bf16 %v4178_v51, %v4178_v51  ;;  %v5620_v14 = vld [vmem:[#allocation25_spill] sm:$0xff] }
 0x57b   :  { %v2897_v16 = vpack.c.bf16 %v4176_v5, %v4176_v5  ;;  %v3091_v56 = vsel %vm3058_vm1, %v3025_v36, %v3090_v43  ;;  %v3036_v0 = vunpack.c.l.b16 %v2904_v11  ;;  %v2913_v45 = vpack.c.bf16 %v5618_v38, %v5618_v38 }
 0x57c   :  { %v3107_v61 = vsel %vm3062_vm3, %v3043_v50, %v3106_v32  ;;  %v3044_v35 = vunpack.c.l.b16 %v2912_v27  ;;  %v3027_v57 = vunpack.c.l.b16 %v2895_v31  ;;  %v3115_v37 = vsel %vm3064_vm4, %v3052_v21, %v3114_v6 }
 0x57d   :  { %v3028_v28 = vunpack.c.l.b16 %v2896_v29  ;;  %v3092_v60 = vsel %vm3060_vm2, %v3026_v53, %v3091_v56  ;;  %v3101_v33 = vsel %vm3064_vm4, %v3036_v0, %v3100_v54  ;;  %v3053_v22 = vunpack.c.l.b16 %v2921_v39 }
 0x57e   :  { %v3029_v41 = vunpack.c.l.b16 %v2897_v16  ;;  %v3037_v58 = vunpack.c.l.b16 %v2905_v7  ;;  %v3093_v18 = vsel %vm3062_vm3, %v3027_v57, %v3092_v60  ;;  %v3108_v15 = vsel %vm3064_vm4, %v3044_v35, %v3107_v61 }
 0x57f   :  { %v3094_v49 = vsel %vm3064_vm4, %v3028_v28, %v3093_v18  ;;  %v3045_v4 = vunpack.c.l.b16 %v2913_v45  ;;  %v3116_v40 = vsel %vm3066_vm5, %v3053_v22, %v3115_v37  ;;  %v2925_v26 = vrot.slane %v4196_v30, %v5619_v20 }
 0x580   :  { %v3095_v63 = vsel %vm3066_vm5, %v3029_v41, %v3094_v49  ;;  %v3102_v42 = vsel %vm3066_vm5, %v3037_v58, %v3101_v33  ;;  %v3233_v1 = vrot.slane %v4196_v30, %v5620_v14  ;;  %v3267_v30 = vstv %s3266_s25 }
 0x581   :  { %v3119_v19 = vpack.c.b16 %v3102_v42, %v3095_v63  ;;  %v3109_v9 = vsel %vm3066_vm5, %v3045_v4, %v3108_v15 }
 0x582   :  { %v3120_v2 = vpack.c.b16 %v3116_v40, %v3109_v9 }
 0x583   :  { %3809 = vmatprep.mubr.msk.bf16.mxu1 %vm275_vm13, %v3119_v19 }
 0x584   :  { %3810 = vmatmul.mubr.msk.bf16.gmra.mxu1 %vm275_vm13, %v3120_v2 }
 0x62d   :  { %v3807_v23 = vpop.f32.mrf.mxu1 }
 0x62e   :  { %v3200_v34 = vadd.f32 %v3807_v23, %v2925_v26 }
 0x62f   :  { %v3191_v3 = vpop.f32.mrf.mxu1 }
 0x630   :  { %4179 = vtanh.f32 %v3200_v34  ;;  %v3192_v48 = vadd.f32 %v3191_v3, %v2925_v26  ;;  %v5621_v3 = vld [vmem:[#allocation23_spill] sm:$0xff] }
 0x631   :  { %v3808_v13 = vpop.f32.mrf.mxu1 }
 0x632   :  { %4181 = vtanh.f32 %v3192_v48  ;;  %v3203_v55 = vadd.f32 %v3808_v13, %v2925_v26  ;;  %v5622_v48 = vld [vmem:[#allocation26_spill] sm:$0xff] }
 0x633   :  { %v3194_v17 = vpop.f32.mrf.mxu1  ;;  %v5511_v13 = vsub.s32 %v5622_v48, %v5621_v3 }
 0x634   :  { %4183 = vtanh.f32 %v3203_v55  ;;  %v3195_v47 = vadd.f32 %v3194_v17, %v2925_v26 }
 0x636   :  { %4185 = vtanh.f32 %v3195_v47 }
 0x63d   :  { %v4180_v52 = vpop.eup %4179 }
 0x63e   :  { %v3236_v24 = vmul.f32 %v4180_v52, %v3233_v1 }
 0x63f   :  { %v4182_v62 = vpop.eup %4181 }
 0x640   :  { %3338 = vrot.lane.b32.xlu0 %v3236_v24, %s4390_s9  ;;  %v3234_v27 = vmul.f32 %v4182_v62, %v3233_v1  ;;  %v3248_v16 = vsel %vm558_vm14, %v3236_v24, 0.0 }
 0x641   :  { %v4184_v11 = vpop.eup %4183 }
 0x642   :  { %v3237_v25 = vmul.f32 %v4184_v11, %v3233_v1  ;;  %v3242_v53 = vsel %vm558_vm14, %v3234_v27, 0.0 }
 0x643   :  { %v4186_v50 = vpop.eup %4185 }
 0x644   :  { %3340 = vrot.lane.b32.xlu1 %v3237_v25, %s4390_s9  ;;  %3334 = vrot.lane.b32.xlu0 %v3234_v27, %s4390_s9  ;;  %v3811_v44 = vpop.f32.mrf.mxu1  ;;  %v3235_v8 = vmul.f32 %v4186_v50, %v3233_v1  ;;  %v3251_v56 = vsel %vm558_vm14, %v3237_v25, 0.0 }
 0x645   :  { %v3216_v12 = vadd.f32 %v3811_v44, %v2925_v26 }
 0x646   :  { %v3207_v21 = vpop.f32.mrf.mxu1  ;;  %v3245_v31 = vsel %vm558_vm14, %v3235_v8, 0.0 }
 0x647   :  { %v3208_v7 = vadd.f32 %v3207_v21, %v2925_v26 }
 0x648   :  { %3336 = vrot.lane.b32.xlu1 %v3235_v8, %s4390_s9  ;;  %v3812_v43 = vpop.f32.mrf.mxu1 }
 0x649   :  { %4187 = vtanh.f32 %v3208_v7  ;;  %v3219_v5 = vadd.f32 %v3812_v43, %v2925_v26 }
 0x64a   :  { %v3210_v59 = vpop.f32.mrf.mxu1  ;;  %4189 = vtanh.f32 %v3216_v12 }
 0x64b   :  { %v3211_v36 = vadd.f32 %v3210_v59, %v2925_v26 }
 0x64d   :  { %4191 = vtanh.f32 %v3211_v36 }
 0x64e   :  { %4193 = vtanh.f32 %v3219_v5 }
 0x656   :  { %v4188_v10 = vpop.eup %4187 }
 0x657   :  { %v3238_v54 = vmul.f32 %v4188_v10, %v3233_v1  ;;  %v4190_v46 = vpop.eup %4189 }
 0x658   :  { %v3240_v39 = vmul.f32 %v4190_v46, %v3233_v1 }
 0x659   :  { %3342 = vrot.lane.b32.xlu0 %v3238_v54, %s4390_s9  ;;  %v3254_v0 = vsel %vm558_vm14, %v3238_v54, 0.0 }
 0x65a   :  { %v4192_v51 = vpop.eup %4191  ;;  %v3260_v38 = vsel %vm558_vm14, %v3240_v39, 0.0 }
 0x65b   :  { %v3239_v29 = vmul.f32 %v4192_v51, %v3233_v1  ;;  %v4194_v32 = vpop.eup %4193 }
 0x65c   :  { %v3241_v6 = vmul.f32 %v4194_v32, %v3233_v1 }
 0x65d   :  { %3344 = vrot.lane.b32.xlu1 %v3239_v29, %s4390_s9  ;;  %3346 = vrot.lane.b32.xlu0 %v3240_v39, %s4390_s9  ;;  %v3257_v45 = vsel %vm558_vm14, %v3239_v29, 0.0 }
 0x65e   :  { %v3263_v61 = vsel %vm558_vm14, %v3241_v6, 0.0 }
 0x661   :  { %3348 = vrot.lane.b32.xlu1 %v3241_v6, %s4390_s9  ;;  %v3383_v6 = vstv %s3566_s2 }
 0x67c   :  { %3243 = vadd.xlane.f32.xlu0 %v3242_v53 }
 0x685   :  { %3246 = vadd.xlane.f32.xlu1 %v3245_v31 }
 0x689   :  { %3249 = vadd.xlane.f32.xlu1 %v3248_v16 }
 0x68d   :  { %3252 = vadd.xlane.f32.xlu1 %v3251_v56 }
 0x691   :  { %3255 = vadd.xlane.f32.xlu1 %v3254_v0 }
 0x695   :  { %3261 = vadd.xlane.f32.xlu1 %v3260_v38 }
 0x699   :  { %3258 = vadd.xlane.f32.xlu1 %v3257_v45 }
 0x69d   :  { %3264 = vadd.xlane.f32.xlu1 %v3263_v61 }
 0x6b2   :  { %v3339_v35 = vpop.permute.xlu0 %3338 }
 0x6b3   :  { %v3364_v57 = vsel %vm558_vm14, %v3339_v35, 0.0 }
 0x6b4   :  { %3365 = vadd.xlane.f32.xlu0 %v3364_v57 }
 0x6b6   :  { %v3341_v37 = vpop.permute.xlu1 %3340  ;;  %v3335_v28 = vpop.permute.xlu0 %3334 }
 0x6b7   :  { %v3358_v60 = vsel %vm558_vm14, %v3335_v28, 0.0  ;;  %v3367_v33 = vsel %vm558_vm14, %v3341_v37, 0.0 }
 0x6b8   :  { %3359 = vadd.xlane.f32.xlu0 %v3358_v60 }
 0x6ba   :  { %v3337_v22 = vpop.permute.xlu1 %3336 }
 0x6bb   :  { %v3361_v41 = vsel %vm558_vm14, %v3337_v22, 0.0 }
 0x6bc   :  { %3368 = vadd.xlane.f32.xlu0 %v3367_v33 }
 0x6c0   :  { %3362 = vadd.xlane.f32.xlu0 %v3361_v41 }
 0x6cb   :  { %v3343_v58 = vpop.permute.xlu0 %3342 }
 0x6cc   :  { %v3370_v4 = vsel %vm558_vm14, %v3343_v58, 0.0 }
 0x6cf   :  { %v3347_v18 = vpop.permute.xlu0 %3346  ;;  %v3345_v49 = vpop.permute.xlu1 %3344 }
 0x6d0   :  { %v3376_v15 = vsel %vm558_vm14, %v3347_v18, 0.0  ;;  %v3373_v40 = vsel %vm558_vm14, %v3345_v49, 0.0 }
 0x6d1   :  { %3377 = vadd.xlane.f32.xlu0 %v3376_v15 }
 0x6d3   :  { %v3349_v63 = vpop.permute.xlu1 %3348 }
 0x6d4   :  { %v3379_v42 = vsel %vm558_vm14, %v3349_v63, 0.0 }
 0x6d5   :  { %3371 = vadd.xlane.f32.xlu0 %v3370_v4 }
 0x6d9   :  { %3374 = vadd.xlane.f32.xlu0 %v3373_v40 }
 0x6dd   :  { %3380 = vadd.xlane.f32.xlu0 %v3379_v42 }
 0x705   :  { %v3244_v20 = vpop.xlane.xlu0 %3243 }
 0x706   :  { %v3268_v55 = vadd.f32 %v3267_v30, %v3244_v20 }
 0x708   :  { %v3287_v24 = vrot.slane %v3268_v55, %v5511_v13 }
 0x70e   :  { %v3247_v19 = vpop.xlane.xlu1 %3246 }
 0x70f   :  { %v3269_v23 = vadd.f32 %v3267_v30, %v3247_v19 }
 0x711   :  { %v3291_v1 = vrot.slane %v3269_v23, %v5511_v13 }
 0x712   :  { %v3250_v9 = vpop.xlane.xlu1 %3249 }
 0x713   :  { %v3270_v34 = vadd.f32 %v3267_v30, %v3250_v9  ;;  %v3316_v27 = vsel %vm3054_vm15, %v3291_v1, %v3287_v24 }
 0x715   :  { %v3295_v52 = vrot.slane %v3270_v34, %v5511_v13 }
 0x716   :  { %v3253_v2 = vpop.xlane.xlu1 %3252 }
 0x717   :  { %v3271_v17 = vadd.f32 %v3267_v30, %v3253_v2  ;;  %v3317_v44 = vsel %vm3056_vm0, %v3295_v52, %v3316_v27 }
 0x719   :  { %v3299_v62 = vrot.slane %v3271_v17, %v5511_v13 }
 0x71a   :  { %v3256_v26 = vpop.xlane.xlu1 %3255 }
 0x71b   :  { %v3272_v47 = vadd.f32 %v3267_v30, %v3256_v26  ;;  %v3318_v21 = vsel %vm3058_vm1, %v3299_v62, %v3317_v44 }
 0x71d   :  { %v3303_v11 = vrot.slane %v3272_v47, %v5511_v13 }
 0x71e   :  { %v3262_v14 = vpop.xlane.xlu1 %3261 }
 0x71f   :  { %v3274_v8 = vadd.f32 %v3267_v30, %v3262_v14  ;;  %v3319_v7 = vsel %vm3060_vm2, %v3303_v11, %v3318_v21 }
 0x721   :  { %v3311_v36 = vrot.slane %v3274_v8, %v5511_v13 }
 0x722   :  { %v3259_v25 = vpop.xlane.xlu1 %3258 }
 0x723   :  { %v3273_v50 = vadd.f32 %v3267_v30, %v3259_v25 }
 0x725   :  { %v3307_v12 = vrot.slane %v3273_v50, %v5511_v13 }
 0x726   :  { %v3265_v43 = vpop.xlane.xlu1 %3264 }
 0x727   :  { %v3320_v59 = vsel %vm3062_vm3, %v3307_v12, %v3319_v7  ;;  %v3275_v5 = vadd.f32 %v3267_v30, %v3265_v43 }
 0x728   :  { %v3321_v54 = vsel %vm3064_vm4, %v3311_v36, %v3320_v59 }
 0x729   :  { %v3315_v10 = vrot.slane %v3275_v5, %v5511_v13 }
 0x72b   :  { %v3322_v46 = vsel %vm3066_vm5, %v3315_v10, %v3321_v54 }
 0x72c   :  { %3325 = vst.msk [vmem:[#allocation16] sm:$0xff] %vm3324_vm6, %v3322_v46 }
 0x73d   :  { %v3366_v51 = vpop.xlane.xlu0 %3365 }
 0x73e   :  { %v3386_v0 = vadd.f32 %v3383_v6, %v3366_v51 }
 0x740   :  { %v3411_v37 = vrot.slane %v3386_v0, %v5511_v13 }
 0x741   :  { %v3360_v29 = vpop.xlane.xlu0 %3359 }
 0x742   :  { %v3384_v31 = vadd.f32 %v3383_v6, %v3360_v29 }
 0x744   :  { %v3403_v38 = vrot.slane %v3384_v31, %v5511_v13 }
 0x745   :  { %v3369_v39 = vpop.xlane.xlu0 %3368 }
 0x746   :  { %v3387_v61 = vadd.f32 %v3383_v6, %v3369_v39 }
 0x748   :  { %v3415_v22 = vrot.slane %v3387_v61, %v5511_v13 }
 0x749   :  { %v3363_v32 = vpop.xlane.xlu0 %3362 }
 0x74a   :  { %v3385_v53 = vadd.f32 %v3383_v6, %v3363_v32 }
 0x74c   :  { %v3407_v56 = vrot.slane %v3385_v53, %v5511_v13 }
 0x74e   :  { %v3432_v35 = vsel %vm3054_vm15, %v3407_v56, %v3403_v38 }
 0x74f   :  { %v3433_v28 = vsel %vm3056_vm0, %v3411_v37, %v3432_v35 }
 0x750   :  { %v3434_v18 = vsel %vm3058_vm1, %v3415_v22, %v3433_v28 }
 0x75a   :  { %v3378_v16 = vpop.xlane.xlu0 %3377 }
 0x75b   :  { %v3390_v58 = vadd.f32 %v3383_v6, %v3378_v16 }
 0x75d   :  { %v3427_v42 = vrot.slane %v3390_v58, %v5511_v13 }
 0x75e   :  { %v3372_v45 = vpop.xlane.xlu0 %3371 }
 0x75f   :  { %v3388_v57 = vadd.f32 %v3383_v6, %v3372_v45 }
 0x761   :  { %v3419_v60 = vrot.slane %v3388_v57, %v5511_v13 }
 0x762   :  { %v3375_v33 = vpop.xlane.xlu0 %3374 }
 0x763   :  { %v3389_v41 = vadd.f32 %v3383_v6, %v3375_v33  ;;  %v3435_v49 = vsel %vm3060_vm2, %v3419_v60, %v3434_v18 }
 0x765   :  { %v3423_v15 = vrot.slane %v3389_v41, %v5511_v13 }
 0x766   :  { %v3381_v4 = vpop.xlane.xlu0 %3380 }
 0x767   :  { %v3436_v40 = vsel %vm3062_vm3, %v3423_v15, %v3435_v49  ;;  %v3391_v63 = vadd.f32 %v3383_v6, %v3381_v4 }
 0x768   :  { %v3437_v9 = vsel %vm3064_vm4, %v3427_v42, %v3436_v40 }
 0x769   :  { %v3431_v19 = vrot.slane %v3391_v63, %v5511_v13 }
 0x76b   :  { %v3438_v2 = vsel %vm3066_vm5, %v3431_v19, %v3437_v9 }
 0x76c   :  { %3441 = vst.msk [vmem:[#allocation16 + $0x8] sm:$0xff] %vm3324_vm6, %v3438_v2 }
 0x76d   :  { %4356 = shalt.err (!%p4353_p11)
}
 0x76e   :  { %s4392_s29 = smov 128   ;;  %s4393_s4 = smov 8  }
 0x76f   :  { %3453 = dma.vmem_to_hbm [thread:$0]  %s3448_s27, 256, %s5559_s11, [#allocation6], %s4392_s29, %s4392_s29, %s4393_s4  }
 0x770   :  { %4375 = dma.done.wait [#allocation6], 256  }
 0x771   :  { %4376 = vsyncadd [#allocation6], 4294967040 }
 0x772   :  { %3457 = vsyncpa [#allocation5], 1 }
 0x773   :  { %3458 = vsyncpa [#allocation8], 1 }
 0x774   :  { %3459 = vsyncpa [#allocation11], 1 }
 0x775   :  { %3460 = vsyncpa [#allocation14], 1 }
 0x776   :  { %3461 = vsyncpa [#allocation6], 1 }

</bundles_post_ra>
